<compile_context>
chip_gen: v7x
topology: tpu7x:2x2x1
jax: 0.10.0
libtpu: 0.0.40
codegen_flags: <defaults>
</compile_context>

<pallas_src>
import jax
import jax.numpy as jnp
from jax.experimental import pallas as pl
from jax.experimental.pallas import tpu as pltpu

NUM_CLASSES = 14                   # CheXpert-style label count
EMB = 128                          # projected_patch_embeddings channels
GRID = 16                          # 16x16 patch grid -> avg_pool2d(4) -> 4x4
POOL = 4
PATCH = 4                          # stand-in encoder patch size
C_IN = 3
IMG = GRID * PATCH                 # 64
N_PATCHES = GRID * GRID            # 256
F_IN = C_IN * PATCH * PATCH        # 48
N_POOLED = (GRID // POOL) ** 2     # 16
FC1_OUT = 512
MAX_TB = 32                        # batch tile cap; tune 16-32 (v5e) / 32-64 (v7x) / 64-128 (v6e)


def chexpert_kernel(patches_ref, wproj_ref, bproj_ref, pool_ref,
                    w1_ref, b1_ref, w2_ref, b2_ref, out_ref):
    TB = patches_ref.shape[0]

    # Stand-in encoder: single 2D patch-projection matmul, M = TB*256
    # (amortizes MXU fill/drain vs. a batched per-sample einsum).
    patches2d = patches_ref[...].reshape(TB * N_PATCHES, F_IN)            # (TB*256, 48) bf16
    pe = jnp.dot(patches2d, wproj_ref[...],
                 preferred_element_type=jnp.float32) + bproj_ref[...]     # (TB*256, 128) f32
    pe = pe.astype(jnp.bfloat16).reshape(TB, N_PATCHES, EMB)              # (TB, 256, 128)

    # avg_pool2d(kernel=4, stride=4) over the 16x16 patch grid as a pooling
    # matmul; output laid out (q, b, e) so the fc1 loop slices the leading dim.
    pooled = jnp.einsum('qp,bpe->qbe', pool_ref[...], pe,
                        preferred_element_type=jnp.float32)               # (16, TB, 128) f32
    pooled = pooled.astype(jnp.bfloat16)

    # fc1 accumulated over the 16 pooled positions (== torch's NCHW flatten+fc1,
    # via the pre-permuted (16, 128, 512) weight) -- no (TB, 2048) flatten.
    h = jnp.zeros((TB, FC1_OUT), jnp.float32)
    for q in range(N_POOLED):
        h = h + jnp.dot(pooled[q], w1_ref[q],
                        preferred_element_type=jnp.float32)               # (TB,128)@(128,512)
    h = jnp.maximum(h + b1_ref[...], 0.0)                                 # relu(fc1)

    out = jnp.dot(h.astype(jnp.bfloat16), w2_ref[...],
                  preferred_element_type=jnp.float32) + b2_ref[...]       # (TB, 14)
    out_ref[...] = out.astype(out_ref.dtype)


def _patchify(x):
    """(B, C, H, W) NCHW -> (B, GRID*GRID, C*PATCH*PATCH), patch-row-major."""
    B = x.shape[0]
    p = x.reshape(B, C_IN, GRID, PATCH, GRID, PATCH)
    p = p.transpose(0, 2, 4, 1, 3, 5)
    return p.reshape(B, GRID * GRID, C_IN * PATCH * PATCH)


def _pool_matrix():
    """(16, 256) matrix implementing 4x4 average pooling over the 16x16 patch grid."""
    idx = jnp.arange(GRID)
    q_of = (idx[:, None] // POOL) * (GRID // POOL) + (idx[None, :] // POOL)   # (16,16)
    p_to_q = q_of.reshape(-1)                                                 # (256,)
    pool = (jnp.arange(N_POOLED)[:, None] == p_to_q[None, :]).astype(jnp.float32)
    return pool / float(POOL * POOL)


def prepare_params(params):
    """One-time conversion of torch-convention f32 params into kernel layout / dtypes."""
    # torch fc1 weight (512, 2048) = (out, c*16+q)  ->  (q, c, out) = (16, 128, 512),
    # so the per-q accumulation reproduces torch's NCHW flatten index c*16 + q exactly.
    w1_k = params['w1'].T.reshape(EMB, N_POOLED, FC1_OUT).transpose(1, 0, 2)
    return {
        'wproj': params['wproj'].astype(jnp.bfloat16),   # (48, 128)
        'bproj': params['bproj'].astype(jnp.float32),    # (1, 128)
        'pool': _pool_matrix().astype(jnp.bfloat16),     # (16, 256); 1/16 exact in bf16
        'w1': w1_k.astype(jnp.bfloat16),                 # (16, 128, 512)
        'b1': params['b1'].astype(jnp.float32),          # (1, 512)
        'w2': params['w2'].T.astype(jnp.bfloat16),       # (512, 14)
        'b2': params['b2'].astype(jnp.float32),          # (1, 14)
    }


def chexpert_forward(x, prep):
    """Pallas implementation of ChexpertClassifier.forward (with encoder stand-in)."""
    B = x.shape[0]
    patches = _patchify(x).astype(jnp.bfloat16)                            # (B, 256, 48)

    TB = B if B <= MAX_TB else MAX_TB
    grid = (pl.cdiv(B, TB),)

    def resident(shape):
        # Weights: block index pinned to 0 -> loaded once, VMEM-resident across grid steps.
        n = len(shape)
        return pl.BlockSpec(shape, lambda i: (0,) * n)

    return pl.pallas_call(
        chexpert_kernel,
        out_shape=jax.ShapeDtypeStruct((B, NUM_CLASSES), jnp.float32),
        grid=grid,
        in_specs=[
            pl.BlockSpec((TB, N_PATCHES, F_IN), lambda i: (i, 0, 0)),      # pipelined batch tile
            resident(prep['wproj'].shape),
            resident(prep['bproj'].shape),
            resident(prep['pool'].shape),
            resident(prep['w1'].shape),
            resident(prep['b1'].shape),
            resident(prep['w2'].shape),
            resident(prep['b2'].shape),
        ],
        out_specs=pl.BlockSpec((TB, NUM_CLASSES), lambda i: (i, 0)),
        compiler_params=pltpu.CompilerParams(
            dimension_semantics=("parallel",),          # megacore-splits the batch tiles
            vmem_limit_bytes=48 * 1024 * 1024),         # safe on v5e/v6e/v7x (<=64 MiB phys)
    )(patches, prep['wproj'], prep['bproj'], prep['pool'],
      prep['w1'], prep['b1'], prep['w2'], prep['b2'])


def chexpert_reference(x, params):
    """Pure-JAX f32 reference with exact torch semantics (NCHW avg_pool2d + flatten)."""
    B = x.shape[0]
    patches = _patchify(x)
    pe = patches @ params['wproj'] + params['bproj']                       # (B, 256, 128)
    pe_nchw = pe.reshape(B, GRID, GRID, EMB).transpose(0, 3, 1, 2)         # (B, 128, 16, 16)
    pooled = pe_nchw.reshape(B, EMB, GRID // POOL, POOL,
                             GRID // POOL, POOL).mean(axis=(3, 5))         # (B, 128, 4, 4)
    flat = pooled.reshape(B, -1)                                           # (B, 2048)
    h = jnp.maximum(flat @ params['w1'].T + params['b1'], 0.0)
    return h @ params['w2'].T + params['b2']


def make_params(key):
    ks = jax.random.split(key, 7)
    s = 0.05
    return {
        'wproj': s * jax.random.normal(ks[0], (F_IN, EMB), jnp.float32),
        'bproj': s * jax.random.normal(ks[1], (1, EMB), jnp.float32),
        'w1':    s * jax.random.normal(ks[2], (FC1_OUT, EMB * N_POOLED), jnp.float32),  # torch (out,in)
        'b1':    s * jax.random.normal(ks[3], (1, FC1_OUT), jnp.float32),
        'w2':    s * jax.random.normal(ks[4], (NUM_CLASSES, FC1_OUT), jnp.float32),
        'b2':    s * jax.random.normal(ks[5], (1, NUM_CLASSES), jnp.float32),
    }


if __name__ == "__main__":
    key = jax.random.PRNGKey(0)
    kx, kp = jax.random.split(key)
    x = jax.random.normal(kx, (2, C_IN, IMG, IMG), jnp.float32)            # (2, 3, 64, 64) NCHW
    params = make_params(kp)
    prep = prepare_params(params)            # one-time: permute w1, build pool matrix, bf16 cast

    fwd = jax.jit(chexpert_forward)
    out = jax.block_until_ready(fwd(x, prep))
    ref = jax.block_until_ready(chexpert_reference(x, params))

    assert out.shape == (2, NUM_CLASSES), out.shape
    # bf16 weights (f32 accumulation) -> slightly looser tolerance than the all-f32 version.
    assert jnp.allclose(out, ref, atol=5e-2, rtol=5e-2), (out, ref)
    print("KERNEL_OK")
</pallas_src>

<mosaic_0001>
module attributes {stable_mosaic.version = 11 : i64} {
  func.func @chexpert_kernel(%arg0: i32, %arg1: memref<2x256x48xbf16, #tpu.memory_space<vmem>>, %arg2: memref<48x128xbf16, #tpu.memory_space<vmem>>, %arg3: memref<1x128xf32, #tpu.memory_space<vmem>>, %arg4: memref<16x256xbf16, #tpu.memory_space<vmem>>, %arg5: memref<16x128x512xbf16, #tpu.memory_space<vmem>>, %arg6: memref<1x512xf32, #tpu.memory_space<vmem>>, %arg7: memref<512x14xbf16, #tpu.memory_space<vmem>>, %arg8: memref<1x14xf32, #tpu.memory_space<vmem>>, %arg9: memref<2x14xf32, #tpu.memory_space<vmem>>) attributes {dimension_semantics = [#tpu.dimension_semantics<parallel>], iteration_bounds = array<i64: 1>, scalar_prefetch = 0 : i64, scratch_operands = 0 : i64, tpu.core_type = #tpu.core_type<tc>, window_params = [{transform_indices = @transform_0, window_bounds = array<i64: 2, 256, 48>}, {pipeline_mode = #tpu.pipeline_mode<synchronous>, transform_indices = @transform_1, window_bounds = array<i64: 48, 128>}, {pipeline_mode = #tpu.pipeline_mode<synchronous>, transform_indices = @transform_2, window_bounds = array<i64: 1, 128>}, {pipeline_mode = #tpu.pipeline_mode<synchronous>, transform_indices = @transform_3, window_bounds = array<i64: 16, 256>}, {pipeline_mode = #tpu.pipeline_mode<synchronous>, transform_indices = @transform_4, window_bounds = array<i64: 16, 128, 512>}, {pipeline_mode = #tpu.pipeline_mode<synchronous>, transform_indices = @transform_5, window_bounds = array<i64: 1, 512>}, {pipeline_mode = #tpu.pipeline_mode<synchronous>, transform_indices = @transform_6, window_bounds = array<i64: 512, 14>}, {pipeline_mode = #tpu.pipeline_mode<synchronous>, transform_indices = @transform_7, window_bounds = array<i64: 1, 14>}, {transform_indices = @transform_8, window_bounds = array<i64: 2, 14>}]} {
    %c0 = arith.constant 0 : index
    %c0_0 = arith.constant 0 : index
    %c0_1 = arith.constant 0 : index
    %0 = vector.load %arg1[%c0, %c0_0, %c0_1] : memref<2x256x48xbf16, #tpu.memory_space<vmem>>, vector<2x256x48xbf16>
    %1 = vector.shape_cast %0 : vector<2x256x48xbf16> to vector<512x48xbf16>
    %c0_2 = arith.constant 0 : index
    %c0_3 = arith.constant 0 : index
    %2 = vector.load %arg2[%c0_2, %c0_3] : memref<48x128xbf16, #tpu.memory_space<vmem>>, vector<48x128xbf16>
    %cst = arith.constant dense<0.000000e+00> : vector<512x128xf32>
    %3 = tpu.matmul %1, %2, %cst {dimension_numbers = #tpu.dot_dimension_numbers<[1], [0], [0], [1], [0, 0, 1, 1], [], []>} : vector<512x48xbf16>, vector<48x128xbf16>, vector<512x128xf32> -> vector<512x128xf32>
    %c0_4 = arith.constant 0 : index
    %c0_5 = arith.constant 0 : index
    %4 = vector.load %arg3[%c0_4, %c0_5] : memref<1x128xf32, #tpu.memory_space<vmem>>, vector<1x128xf32>
    %5 = vector.broadcast %4 : vector<1x128xf32> to vector<512x128xf32>
    %6 = arith.addf %3, %5 : vector<512x128xf32>
    %7 = arith.truncf %6 : vector<512x128xf32> to vector<512x128xbf16>
    %8 = vector.shape_cast %7 : vector<512x128xbf16> to vector<2x256x128xbf16>
    %c0_6 = arith.constant 0 : index
    %c0_7 = arith.constant 0 : index
    %9 = vector.load %arg4[%c0_6, %c0_7] : memref<16x256xbf16, #tpu.memory_space<vmem>>, vector<16x256xbf16>
    "tpu.trace_start"() <{level = 10 : i32, message = "qp,bpe->qbe"}> : () -> ()
    %cst_8 = arith.constant dense<0.000000e+00> : vector<16x2x128xf32>
    %10 = tpu.matmul %9, %8, %cst_8 {dimension_numbers = #tpu.dot_dimension_numbers<[1], [1], [0], [0, 2], [0, 0, 1, 0, 1, 2], [], []>} : vector<16x256xbf16>, vector<2x256x128xbf16>, vector<16x2x128xf32> -> vector<16x2x128xf32>
    "tpu.trace_stop"() : () -> ()
    %11 = arith.truncf %10 : vector<16x2x128xf32> to vector<16x2x128xbf16>
    %cst_9 = arith.constant 0.000000e+00 : f32
    %12 = vector.broadcast %cst_9 : f32 to vector<2x512xf32>
    %13 = vector.extract_strided_slice %11 {offsets = [0, 0, 0], sizes = [1, 2, 128], strides = [1, 1, 1]} : vector<16x2x128xbf16> to vector<1x2x128xbf16>
    %14 = vector.shape_cast %13 : vector<1x2x128xbf16> to vector<2x128xbf16>
    %c0_10 = arith.constant 0 : index
    %c0_11 = arith.constant 0 : index
    %c0_12 = arith.constant 0 : index
    %15 = vector.load %arg5[%c0_10, %c0_11, %c0_12] : memref<16x128x512xbf16, #tpu.memory_space<vmem>>, vector<1x128x512xbf16>
    %16 = vector.shape_cast %15 : vector<1x128x512xbf16> to vector<128x512xbf16>
    %cst_13 = arith.constant dense<0.000000e+00> : vector<2x512xf32>
    %17 = tpu.matmul %14, %16, %cst_13 {dimension_numbers = #tpu.dot_dimension_numbers<[1], [0], [0], [1], [0, 0, 1, 1], [], []>} : vector<2x128xbf16>, vector<128x512xbf16>, vector<2x512xf32> -> vector<2x512xf32>
    %18 = arith.addf %12, %17 : vector<2x512xf32>
    %19 = vector.extract_strided_slice %11 {offsets = [1, 0, 0], sizes = [1, 2, 128], strides = [1, 1, 1]} : vector<16x2x128xbf16> to vector<1x2x128xbf16>
    %20 = vector.shape_cast %19 : vector<1x2x128xbf16> to vector<2x128xbf16>
    %c1 = arith.constant 1 : index
    %c0_14 = arith.constant 0 : index
    %c0_15 = arith.constant 0 : index
    %21 = vector.load %arg5[%c1, %c0_14, %c0_15] : memref<16x128x512xbf16, #tpu.memory_space<vmem>>, vector<1x128x512xbf16>
    %22 = vector.shape_cast %21 : vector<1x128x512xbf16> to vector<128x512xbf16>
    %cst_16 = arith.constant dense<0.000000e+00> : vector<2x512xf32>
    %23 = tpu.matmul %20, %22, %cst_16 {dimension_numbers = #tpu.dot_dimension_numbers<[1], [0], [0], [1], [0, 0, 1, 1], [], []>} : vector<2x128xbf16>, vector<128x512xbf16>, vector<2x512xf32> -> vector<2x512xf32>
    %24 = arith.addf %18, %23 : vector<2x512xf32>
    %25 = vector.extract_strided_slice %11 {offsets = [2, 0, 0], sizes = [1, 2, 128], strides = [1, 1, 1]} : vector<16x2x128xbf16> to vector<1x2x128xbf16>
    %26 = vector.shape_cast %25 : vector<1x2x128xbf16> to vector<2x128xbf16>
    %c2 = arith.constant 2 : index
    %c0_17 = arith.constant 0 : index
    %c0_18 = arith.constant 0 : index
    %27 = vector.load %arg5[%c2, %c0_17, %c0_18] : memref<16x128x512xbf16, #tpu.memory_space<vmem>>, vector<1x128x512xbf16>
    %28 = vector.shape_cast %27 : vector<1x128x512xbf16> to vector<128x512xbf16>
    %cst_19 = arith.constant dense<0.000000e+00> : vector<2x512xf32>
    %29 = tpu.matmul %26, %28, %cst_19 {dimension_numbers = #tpu.dot_dimension_numbers<[1], [0], [0], [1], [0, 0, 1, 1], [], []>} : vector<2x128xbf16>, vector<128x512xbf16>, vector<2x512xf32> -> vector<2x512xf32>
    %30 = arith.addf %24, %29 : vector<2x512xf32>
    %31 = vector.extract_strided_slice %11 {offsets = [3, 0, 0], sizes = [1, 2, 128], strides = [1, 1, 1]} : vector<16x2x128xbf16> to vector<1x2x128xbf16>
    %32 = vector.shape_cast %31 : vector<1x2x128xbf16> to vector<2x128xbf16>
    %c3 = arith.constant 3 : index
    %c0_20 = arith.constant 0 : index
    %c0_21 = arith.constant 0 : index
    %33 = vector.load %arg5[%c3, %c0_20, %c0_21] : memref<16x128x512xbf16, #tpu.memory_space<vmem>>, vector<1x128x512xbf16>
    %34 = vector.shape_cast %33 : vector<1x128x512xbf16> to vector<128x512xbf16>
    %cst_22 = arith.constant dense<0.000000e+00> : vector<2x512xf32>
    %35 = tpu.matmul %32, %34, %cst_22 {dimension_numbers = #tpu.dot_dimension_numbers<[1], [0], [0], [1], [0, 0, 1, 1], [], []>} : vector<2x128xbf16>, vector<128x512xbf16>, vector<2x512xf32> -> vector<2x512xf32>
    %36 = arith.addf %30, %35 : vector<2x512xf32>
    %37 = vector.extract_strided_slice %11 {offsets = [4, 0, 0], sizes = [1, 2, 128], strides = [1, 1, 1]} : vector<16x2x128xbf16> to vector<1x2x128xbf16>
    %38 = vector.shape_cast %37 : vector<1x2x128xbf16> to vector<2x128xbf16>
    %c4 = arith.constant 4 : index
    %c0_23 = arith.constant 0 : index
    %c0_24 = arith.constant 0 : index
    %39 = vector.load %arg5[%c4, %c0_23, %c0_24] : memref<16x128x512xbf16, #tpu.memory_space<vmem>>, vector<1x128x512xbf16>
    %40 = vector.shape_cast %39 : vector<1x128x512xbf16> to vector<128x512xbf16>
    %cst_25 = arith.constant dense<0.000000e+00> : vector<2x512xf32>
    %41 = tpu.matmul %38, %40, %cst_25 {dimension_numbers = #tpu.dot_dimension_numbers<[1], [0], [0], [1], [0, 0, 1, 1], [], []>} : vector<2x128xbf16>, vector<128x512xbf16>, vector<2x512xf32> -> vector<2x512xf32>
    %42 = arith.addf %36, %41 : vector<2x512xf32>
    %43 = vector.extract_strided_slice %11 {offsets = [5, 0, 0], sizes = [1, 2, 128], strides = [1, 1, 1]} : vector<16x2x128xbf16> to vector<1x2x128xbf16>
    %44 = vector.shape_cast %43 : vector<1x2x128xbf16> to vector<2x128xbf16>
    %c5 = arith.constant 5 : index
    %c0_26 = arith.constant 0 : index
    %c0_27 = arith.constant 0 : index
    %45 = vector.load %arg5[%c5, %c0_26, %c0_27] : memref<16x128x512xbf16, #tpu.memory_space<vmem>>, vector<1x128x512xbf16>
    %46 = vector.shape_cast %45 : vector<1x128x512xbf16> to vector<128x512xbf16>
    %cst_28 = arith.constant dense<0.000000e+00> : vector<2x512xf32>
    %47 = tpu.matmul %44, %46, %cst_28 {dimension_numbers = #tpu.dot_dimension_numbers<[1], [0], [0], [1], [0, 0, 1, 1], [], []>} : vector<2x128xbf16>, vector<128x512xbf16>, vector<2x512xf32> -> vector<2x512xf32>
    %48 = arith.addf %42, %47 : vector<2x512xf32>
    %49 = vector.extract_strided_slice %11 {offsets = [6, 0, 0], sizes = [1, 2, 128], strides = [1, 1, 1]} : vector<16x2x128xbf16> to vector<1x2x128xbf16>
    %50 = vector.shape_cast %49 : vector<1x2x128xbf16> to vector<2x128xbf16>
    %c6 = arith.constant 6 : index
    %c0_29 = arith.constant 0 : index
    %c0_30 = arith.constant 0 : index
    %51 = vector.load %arg5[%c6, %c0_29, %c0_30] : memref<16x128x512xbf16, #tpu.memory_space<vmem>>, vector<1x128x512xbf16>
    %52 = vector.shape_cast %51 : vector<1x128x512xbf16> to vector<128x512xbf16>
    %cst_31 = arith.constant dense<0.000000e+00> : vector<2x512xf32>
    %53 = tpu.matmul %50, %52, %cst_31 {dimension_numbers = #tpu.dot_dimension_numbers<[1], [0], [0], [1], [0, 0, 1, 1], [], []>} : vector<2x128xbf16>, vector<128x512xbf16>, vector<2x512xf32> -> vector<2x512xf32>
    %54 = arith.addf %48, %53 : vector<2x512xf32>
    %55 = vector.extract_strided_slice %11 {offsets = [7, 0, 0], sizes = [1, 2, 128], strides = [1, 1, 1]} : vector<16x2x128xbf16> to vector<1x2x128xbf16>
    %56 = vector.shape_cast %55 : vector<1x2x128xbf16> to vector<2x128xbf16>
    %c7 = arith.constant 7 : index
    %c0_32 = arith.constant 0 : index
    %c0_33 = arith.constant 0 : index
    %57 = vector.load %arg5[%c7, %c0_32, %c0_33] : memref<16x128x512xbf16, #tpu.memory_space<vmem>>, vector<1x128x512xbf16>
    %58 = vector.shape_cast %57 : vector<1x128x512xbf16> to vector<128x512xbf16>
    %cst_34 = arith.constant dense<0.000000e+00> : vector<2x512xf32>
    %59 = tpu.matmul %56, %58, %cst_34 {dimension_numbers = #tpu.dot_dimension_numbers<[1], [0], [0], [1], [0, 0, 1, 1], [], []>} : vector<2x128xbf16>, vector<128x512xbf16>, vector<2x512xf32> -> vector<2x512xf32>
    %60 = arith.addf %54, %59 : vector<2x512xf32>
    %61 = vector.extract_strided_slice %11 {offsets = [8, 0, 0], sizes = [1, 2, 128], strides = [1, 1, 1]} : vector<16x2x128xbf16> to vector<1x2x128xbf16>
    %62 = vector.shape_cast %61 : vector<1x2x128xbf16> to vector<2x128xbf16>
    %c8 = arith.constant 8 : index
    %c0_35 = arith.constant 0 : index
    %c0_36 = arith.constant 0 : index
    %63 = vector.load %arg5[%c8, %c0_35, %c0_36] : memref<16x128x512xbf16, #tpu.memory_space<vmem>>, vector<1x128x512xbf16>
    %64 = vector.shape_cast %63 : vector<1x128x512xbf16> to vector<128x512xbf16>
    %cst_37 = arith.constant dense<0.000000e+00> : vector<2x512xf32>
    %65 = tpu.matmul %62, %64, %cst_37 {dimension_numbers = #tpu.dot_dimension_numbers<[1], [0], [0], [1], [0, 0, 1, 1], [], []>} : vector<2x128xbf16>, vector<128x512xbf16>, vector<2x512xf32> -> vector<2x512xf32>
    %66 = arith.addf %60, %65 : vector<2x512xf32>
    %67 = vector.extract_strided_slice %11 {offsets = [9, 0, 0], sizes = [1, 2, 128], strides = [1, 1, 1]} : vector<16x2x128xbf16> to vector<1x2x128xbf16>
    %68 = vector.shape_cast %67 : vector<1x2x128xbf16> to vector<2x128xbf16>
    %c9 = arith.constant 9 : index
    %c0_38 = arith.constant 0 : index
    %c0_39 = arith.constant 0 : index
    %69 = vector.load %arg5[%c9, %c0_38, %c0_39] : memref<16x128x512xbf16, #tpu.memory_space<vmem>>, vector<1x128x512xbf16>
    %70 = vector.shape_cast %69 : vector<1x128x512xbf16> to vector<128x512xbf16>
    %cst_40 = arith.constant dense<0.000000e+00> : vector<2x512xf32>
    %71 = tpu.matmul %68, %70, %cst_40 {dimension_numbers = #tpu.dot_dimension_numbers<[1], [0], [0], [1], [0, 0, 1, 1], [], []>} : vector<2x128xbf16>, vector<128x512xbf16>, vector<2x512xf32> -> vector<2x512xf32>
    %72 = arith.addf %66, %71 : vector<2x512xf32>
    %73 = vector.extract_strided_slice %11 {offsets = [10, 0, 0], sizes = [1, 2, 128], strides = [1, 1, 1]} : vector<16x2x128xbf16> to vector<1x2x128xbf16>
    %74 = vector.shape_cast %73 : vector<1x2x128xbf16> to vector<2x128xbf16>
    %c10 = arith.constant 10 : index
    %c0_41 = arith.constant 0 : index
    %c0_42 = arith.constant 0 : index
    %75 = vector.load %arg5[%c10, %c0_41, %c0_42] : memref<16x128x512xbf16, #tpu.memory_space<vmem>>, vector<1x128x512xbf16>
    %76 = vector.shape_cast %75 : vector<1x128x512xbf16> to vector<128x512xbf16>
    %cst_43 = arith.constant dense<0.000000e+00> : vector<2x512xf32>
    %77 = tpu.matmul %74, %76, %cst_43 {dimension_numbers = #tpu.dot_dimension_numbers<[1], [0], [0], [1], [0, 0, 1, 1], [], []>} : vector<2x128xbf16>, vector<128x512xbf16>, vector<2x512xf32> -> vector<2x512xf32>
    %78 = arith.addf %72, %77 : vector<2x512xf32>
    %79 = vector.extract_strided_slice %11 {offsets = [11, 0, 0], sizes = [1, 2, 128], strides = [1, 1, 1]} : vector<16x2x128xbf16> to vector<1x2x128xbf16>
    %80 = vector.shape_cast %79 : vector<1x2x128xbf16> to vector<2x128xbf16>
    %c11 = arith.constant 11 : index
    %c0_44 = arith.constant 0 : index
    %c0_45 = arith.constant 0 : index
    %81 = vector.load %arg5[%c11, %c0_44, %c0_45] : memref<16x128x512xbf16, #tpu.memory_space<vmem>>, vector<1x128x512xbf16>
    %82 = vector.shape_cast %81 : vector<1x128x512xbf16> to vector<128x512xbf16>
    %cst_46 = arith.constant dense<0.000000e+00> : vector<2x512xf32>
    %83 = tpu.matmul %80, %82, %cst_46 {dimension_numbers = #tpu.dot_dimension_numbers<[1], [0], [0], [1], [0, 0, 1, 1], [], []>} : vector<2x128xbf16>, vector<128x512xbf16>, vector<2x512xf32> -> vector<2x512xf32>
    %84 = arith.addf %78, %83 : vector<2x512xf32>
    %85 = vector.extract_strided_slice %11 {offsets = [12, 0, 0], sizes = [1, 2, 128], strides = [1, 1, 1]} : vector<16x2x128xbf16> to vector<1x2x128xbf16>
    %86 = vector.shape_cast %85 : vector<1x2x128xbf16> to vector<2x128xbf16>
    %c12 = arith.constant 12 : index
    %c0_47 = arith.constant 0 : index
    %c0_48 = arith.constant 0 : index
    %87 = vector.load %arg5[%c12, %c0_47, %c0_48] : memref<16x128x512xbf16, #tpu.memory_space<vmem>>, vector<1x128x512xbf16>
    %88 = vector.shape_cast %87 : vector<1x128x512xbf16> to vector<128x512xbf16>
    %cst_49 = arith.constant dense<0.000000e+00> : vector<2x512xf32>
    %89 = tpu.matmul %86, %88, %cst_49 {dimension_numbers = #tpu.dot_dimension_numbers<[1], [0], [0], [1], [0, 0, 1, 1], [], []>} : vector<2x128xbf16>, vector<128x512xbf16>, vector<2x512xf32> -> vector<2x512xf32>
    %90 = arith.addf %84, %89 : vector<2x512xf32>
    %91 = vector.extract_strided_slice %11 {offsets = [13, 0, 0], sizes = [1, 2, 128], strides = [1, 1, 1]} : vector<16x2x128xbf16> to vector<1x2x128xbf16>
    %92 = vector.shape_cast %91 : vector<1x2x128xbf16> to vector<2x128xbf16>
    %c13 = arith.constant 13 : index
    %c0_50 = arith.constant 0 : index
    %c0_51 = arith.constant 0 : index
    %93 = vector.load %arg5[%c13, %c0_50, %c0_51] : memref<16x128x512xbf16, #tpu.memory_space<vmem>>, vector<1x128x512xbf16>
    %94 = vector.shape_cast %93 : vector<1x128x512xbf16> to vector<128x512xbf16>
    %cst_52 = arith.constant dense<0.000000e+00> : vector<2x512xf32>
    %95 = tpu.matmul %92, %94, %cst_52 {dimension_numbers = #tpu.dot_dimension_numbers<[1], [0], [0], [1], [0, 0, 1, 1], [], []>} : vector<2x128xbf16>, vector<128x512xbf16>, vector<2x512xf32> -> vector<2x512xf32>
    %96 = arith.addf %90, %95 : vector<2x512xf32>
    %97 = vector.extract_strided_slice %11 {offsets = [14, 0, 0], sizes = [1, 2, 128], strides = [1, 1, 1]} : vector<16x2x128xbf16> to vector<1x2x128xbf16>
    %98 = vector.shape_cast %97 : vector<1x2x128xbf16> to vector<2x128xbf16>
    %c14 = arith.constant 14 : index
    %c0_53 = arith.constant 0 : index
    %c0_54 = arith.constant 0 : index
    %99 = vector.load %arg5[%c14, %c0_53, %c0_54] : memref<16x128x512xbf16, #tpu.memory_space<vmem>>, vector<1x128x512xbf16>
    %100 = vector.shape_cast %99 : vector<1x128x512xbf16> to vector<128x512xbf16>
    %cst_55 = arith.constant dense<0.000000e+00> : vector<2x512xf32>
    %101 = tpu.matmul %98, %100, %cst_55 {dimension_numbers = #tpu.dot_dimension_numbers<[1], [0], [0], [1], [0, 0, 1, 1], [], []>} : vector<2x128xbf16>, vector<128x512xbf16>, vector<2x512xf32> -> vector<2x512xf32>
    %102 = arith.addf %96, %101 : vector<2x512xf32>
    %103 = vector.extract_strided_slice %11 {offsets = [15, 0, 0], sizes = [1, 2, 128], strides = [1, 1, 1]} : vector<16x2x128xbf16> to vector<1x2x128xbf16>
    %104 = vector.shape_cast %103 : vector<1x2x128xbf16> to vector<2x128xbf16>
    %c15 = arith.constant 15 : index
    %c0_56 = arith.constant 0 : index
    %c0_57 = arith.constant 0 : index
    %105 = vector.load %arg5[%c15, %c0_56, %c0_57] : memref<16x128x512xbf16, #tpu.memory_space<vmem>>, vector<1x128x512xbf16>
    %106 = vector.shape_cast %105 : vector<1x128x512xbf16> to vector<128x512xbf16>
    %cst_58 = arith.constant dense<0.000000e+00> : vector<2x512xf32>
    %107 = tpu.matmul %104, %106, %cst_58 {dimension_numbers = #tpu.dot_dimension_numbers<[1], [0], [0], [1], [0, 0, 1, 1], [], []>} : vector<2x128xbf16>, vector<128x512xbf16>, vector<2x512xf32> -> vector<2x512xf32>
    %108 = arith.addf %102, %107 : vector<2x512xf32>
    %c0_59 = arith.constant 0 : index
    %c0_60 = arith.constant 0 : index
    %109 = vector.load %arg6[%c0_59, %c0_60] : memref<1x512xf32, #tpu.memory_space<vmem>>, vector<1x512xf32>
    %110 = vector.broadcast %109 : vector<1x512xf32> to vector<2x512xf32>
    %111 = arith.addf %108, %110 : vector<2x512xf32>
    %cst_61 = arith.constant 0.000000e+00 : f32
    %112 = vector.broadcast %cst_61 : f32 to vector<2x512xf32>
    %113 = arith.maximumf %111, %112 : vector<2x512xf32>
    %114 = arith.truncf %113 : vector<2x512xf32> to vector<2x512xbf16>
    %c0_62 = arith.constant 0 : index
    %c0_63 = arith.constant 0 : index
    %115 = vector.load %arg7[%c0_62, %c0_63] : memref<512x14xbf16, #tpu.memory_space<vmem>>, vector<512x14xbf16>
    %cst_64 = arith.constant dense<0.000000e+00> : vector<2x14xf32>
    %116 = tpu.matmul %114, %115, %cst_64 {dimension_numbers = #tpu.dot_dimension_numbers<[1], [0], [0], [1], [0, 0, 1, 1], [], []>} : vector<2x512xbf16>, vector<512x14xbf16>, vector<2x14xf32> -> vector<2x14xf32>
    %c0_65 = arith.constant 0 : index
    %c0_66 = arith.constant 0 : index
    %117 = vector.load %arg8[%c0_65, %c0_66] : memref<1x14xf32, #tpu.memory_space<vmem>>, vector<1x14xf32>
    %118 = vector.broadcast %117 : vector<1x14xf32> to vector<2x14xf32>
    %119 = arith.addf %116, %118 : vector<2x14xf32>
    %c0_67 = arith.constant 0 : index
    %c0_68 = arith.constant 0 : index
    %120 = vector.load %arg9[%c0_67, %c0_68] : memref<2x14xf32, #tpu.memory_space<vmem>>, vector<2x14xf32>
    tpu.vector_store %arg9[%c0_67, %c0_68], %119 {strides = array<i32>} : memref<2x14xf32, #tpu.memory_space<vmem>>, vector<2x14xf32>,
    return
  }
  func.func @transform_0(%arg0: i32) -> (i32, i32, i32) {
    %c0_i32 = arith.constant 0 : i32
    %c0_i32_0 = arith.constant 0 : i32
    %c0_i32_1 = arith.constant 0 : i32
    return %arg0, %c0_i32, %c0_i32_0 : i32, i32, i32
  }
  func.func @transform_1(%arg0: i32) -> (i32, i32) {
    %c0_i32 = arith.constant 0 : i32
    %c0_i32_0 = arith.constant 0 : i32
    %c0_i32_1 = arith.constant 0 : i32
    return %c0_i32, %c0_i32_0 : i32, i32
  }
  func.func @transform_2(%arg0: i32) -> (i32, i32) {
    %c0_i32 = arith.constant 0 : i32
    %c0_i32_0 = arith.constant 0 : i32
    %c0_i32_1 = arith.constant 0 : i32
    return %c0_i32, %c0_i32_0 : i32, i32
  }
  func.func @transform_3(%arg0: i32) -> (i32, i32) {
    %c0_i32 = arith.constant 0 : i32
    %c0_i32_0 = arith.constant 0 : i32
    %c0_i32_1 = arith.constant 0 : i32
    return %c0_i32, %c0_i32_0 : i32, i32
  }
  func.func @transform_4(%arg0: i32) -> (i32, i32, i32) {
    %c0_i32 = arith.constant 0 : i32
    %c0_i32_0 = arith.constant 0 : i32
    %c0_i32_1 = arith.constant 0 : i32
    %c0_i32_2 = arith.constant 0 : i32
    return %c0_i32, %c0_i32_0, %c0_i32_1 : i32, i32, i32
  }
  func.func @transform_5(%arg0: i32) -> (i32, i32) {
    %c0_i32 = arith.constant 0 : i32
    %c0_i32_0 = arith.constant 0 : i32
    %c0_i32_1 = arith.constant 0 : i32
    return %c0_i32, %c0_i32_0 : i32, i32
  }
  func.func @transform_6(%arg0: i32) -> (i32, i32) {
    %c0_i32 = arith.constant 0 : i32
    %c0_i32_0 = arith.constant 0 : i32
    %c0_i32_1 = arith.constant 0 : i32
    return %c0_i32, %c0_i32_0 : i32, i32
  }
  func.func @transform_7(%arg0: i32) -> (i32, i32) {
    %c0_i32 = arith.constant 0 : i32
    %c0_i32_0 = arith.constant 0 : i32
    %c0_i32_1 = arith.constant 0 : i32
    return %c0_i32, %c0_i32_0 : i32, i32
  }
  func.func @transform_8(%arg0: i32) -> (i32, i32) {
    %c0_i32 = arith.constant 0 : i32
    %c0_i32_0 = arith.constant 0 : i32
    return %arg0, %c0_i32 : i32, i32
  }
}

</mosaic_0001>

<bundles_post_ra>
// kernel: chexpert_forward.1
= control target key start
LH: loop header
LB: loop body
LE: loop exit
PB: predicated region body
PF: predicated region fallthrough
CT: control target
= control target key end

     0   :  { %vm286_vm0 = vcmask 392192   ;;  %v14999_v35 = vmov 0   ;;  %s14990_s0 = inlined_call_operand.vmem [shape: bf16[2,256,48], index: 0, kind: input, shape index: {}]   ;;  %s14991_s1 = inlined_call_operand.vmem [shape: bf16[48,128], index: 1, kind: input, shape index: {}]   ;;  %s14992_s2 = inlined_call_operand.vmem [shape: f32[1,128], index: 2, kind: input, shape index: {}]   ;;  %s14993_s3 = inlined_call_operand.vmem [shape: bf16[16,256], index: 3, kind: input, shape index: {}]   ;;  %s14994_s4 = inlined_call_operand.vmem [shape: bf16[16,128,512], index: 4, kind: input, shape index: {}]   ;;  %s14995_s5 = inlined_call_operand.vmem [shape: f32[1,512], index: 5, kind: input, shape index: {}]   ;;  %s14996_s6 = inlined_call_operand.vmem [shape: bf16[512,14], index: 6, kind: input, shape index: {}]   ;;  %s14997_s7 = inlined_call_operand.vmem [shape: f32[1,14], index: 7, kind: input, shape index: {}]   ;;  %s14998_s8 = inlined_call_operand.hbm [shape: f32[2,14], index: 8, kind: output, shape index: {}]  }
   0x1   :  { %v10484_v0 = vld [vmem:[%s14991_s1] sm:$0xff]   ;;  %v10485_v1 = vld [vmem:[%s14991_s1 + $0x8] sm:$0xff]   ;;  %v10486_v3 = vld [vmem:[%s14991_s1 + $0x10] sm:$0xff]  }
   0x2   :  { %10409 = vmatprep.subr.bf16.mxu0 %v10484_v0  ;;  %v10487_v2 = vld [vmem:[%s14990_s0] sm:$0xff]   ;;  %v10488_v4 = vld [vmem:[%s14990_s0 + $0x8] sm:$0xff]   ;;  %v10489_v5 = vld [vmem:[%s14990_s0 + $0x10] sm:$0xff]  }
   0x3   :  { %10410 = vmatpush3.bf16.msra.mxu0 %v10484_v0  ;;  %10415 = vmatprep.mubr.msk.bf16.mxu0 %vm286_vm0, %v10487_v2  ;;  %v10490_v6 = vld [vmem:[%s14990_s0 + $0x18] sm:$0xff]   ;;  %v10491_v7 = vld [vmem:[%s14990_s0 + $0x20] sm:$0xff]   ;;  %v10492_v8 = vld [vmem:[%s14990_s0 + $0x28] sm:$0xff]  }
   0x4   :  { %10411 = vmatprep.subr.bf16.mxu0 %v10485_v1  ;;  %v10493_v9 = vld [vmem:[%s14990_s0 + $0x30] sm:$0xff]   ;;  %v10494_v10 = vld [vmem:[%s14990_s0 + $0x38] sm:$0xff]   ;;  %v10495_v11 = vld [vmem:[%s14990_s0 + $0x40] sm:$0xff]  }
   0x5   :  { %v10496_v12 = vld [vmem:[%s14990_s0 + $0x48] sm:$0xff]   ;;  %v10497_v13 = vld [vmem:[%s14990_s0 + $0x50] sm:$0xff]   ;;  %v10498_v14 = vld [vmem:[%s14990_s0 + $0x58] sm:$0xff]  }
   0x6   :  { %v10499_v15 = vld [vmem:[%s14990_s0 + $0x60] sm:$0xff]   ;;  %v10500_v16 = vld [vmem:[%s14990_s0 + $0x68] sm:$0xff]   ;;  %v10501_v17 = vld [vmem:[%s14990_s0 + $0x70] sm:$0xff]  }
   0x7   :  { %10412 = vmatpush3.bf16.msra.mxu0 %v10485_v1  ;;  %v10502_v18 = vld [vmem:[%s14990_s0 + $0x78] sm:$0xff]   ;;  %v10503_v19 = vld [vmem:[%s14990_s0 + $0x80] sm:$0xff]   ;;  %v10504_v20 = vld [vmem:[%s14990_s0 + $0x88] sm:$0xff]  }
   0x8   :  { %10413 = vmatprep.subr.bf16.mxu0 %v10486_v3  ;;  %v10505_v21 = vld [vmem:[%s14990_s0 + $0x90] sm:$0xff]   ;;  %v10506_v22 = vld [vmem:[%s14990_s0 + $0x98] sm:$0xff]   ;;  %v10507_v23 = vld [vmem:[%s14990_s0 + $0xa0] sm:$0xff]  }
   0x9   :  { %v10508_v24 = vld [vmem:[%s14990_s0 + $0xa8] sm:$0xff]   ;;  %v10509_v25 = vld [vmem:[%s14990_s0 + $0xb0] sm:$0xff]   ;;  %v10510_v26 = vld [vmem:[%s14990_s0 + $0xb8] sm:$0xff]  }
   0xa   :  { %v10511_v27 = vld [vmem:[%s14990_s0 + $0xc0] sm:$0xff]   ;;  %v10512_v28 = vld [vmem:[%s14990_s0 + $0xc8] sm:$0xff]   ;;  %v10513_v29 = vld [vmem:[%s14990_s0 + $0xd0] sm:$0xff]  }
   0xb   :  { %10414 = vmatpush3.bf16.msra.mxu0 %v10486_v3  ;;  %v10514_v30 = vld [vmem:[%s14990_s0 + $0xd8] sm:$0xff]   ;;  %v10515_v31 = vld [vmem:[%s14990_s0 + $0xe0] sm:$0xff]   ;;  %v10516_v32 = vld [vmem:[%s14990_s0 + $0xe8] sm:$0xff]  }
   0xc   :  { %v10517_v33 = vld [vmem:[%s14990_s0 + $0xf0] sm:$0xff]   ;;  %v10518_v34 = vld [vmem:[%s14990_s0 + $0xf8] sm:$0xff]   ;;  %v11538_v36 = vld [vmem:[%s14992_s2] ss:$0 sm:$0xff] }
   0xe   :  { %10416 = vmatmul.mubr.msk.bf16.vlgmr.msra.gmra.mrb[0].mxu0 %vm286_vm0, %v10488_v4 }
   0xf   :  { %10419 = vmatprep.mubr.msk.bf16.mxu0 %vm286_vm0, %v10489_v5 }
  0x16   :  { %10420 = vmatmul.mubr.msk.bf16.gmra.mrb[4].mxu0 %vm286_vm0, %v10490_v6 }
  0x17   :  { %10423 = vmatprep.mubr.msk.bf16.mxu0 %vm286_vm0, %v10491_v7 }
  0x1e   :  { %10424 = vmatmul.mubr.msk.bf16.gmra.mrb[8].mxu0 %vm286_vm0, %v10492_v8 }
  0x1f   :  { %10427 = vmatprep.mubr.msk.bf16.mxu0 %vm286_vm0, %v10493_v9 }
  0x26   :  { %10428 = vmatmul.mubr.msk.bf16.gmra.mrb[12].mxu0 %vm286_vm0, %v10494_v10 }
  0x27   :  { %10431 = vmatprep.mubr.msk.bf16.mxu0 %vm286_vm0, %v10495_v11 }
  0x2e   :  { %10432 = vmatmul.mubr.msk.bf16.gmra.mrb[16].mxu0 %vm286_vm0, %v10496_v12 }
  0x2f   :  { %10435 = vmatprep.mubr.msk.bf16.mxu0 %vm286_vm0, %v10497_v13 }
  0x36   :  { %10436 = vmatmul.mubr.msk.bf16.gmra.mrb[20].mxu0 %vm286_vm0, %v10498_v14 }
  0x37   :  { %10439 = vmatprep.mubr.msk.bf16.mxu0 %vm286_vm0, %v10499_v15 }
  0x3e   :  { %10440 = vmatmul.mubr.msk.bf16.gmra.mrb[24].mxu0 %vm286_vm0, %v10500_v16 }
  0x3f   :  { %10443 = vmatprep.mubr.msk.bf16.mxu0 %vm286_vm0, %v10501_v17 }
  0x46   :  { %10444 = vmatmul.mubr.msk.bf16.gmra.mrb[28].mxu0 %vm286_vm0, %v10502_v18 }
  0x47   :  { %10447 = vmatprep.mubr.msk.bf16.mxu0 %vm286_vm0, %v10503_v19 }
  0x4e   :  { %10448 = vmatmul.mubr.msk.bf16.gmra.mrb[32].mxu0 %vm286_vm0, %v10504_v20 }
  0x4f   :  { %10451 = vmatprep.mubr.msk.bf16.mxu0 %vm286_vm0, %v10505_v21 }
  0x56   :  { %10452 = vmatmul.mubr.msk.bf16.gmra.mrb[36].mxu0 %vm286_vm0, %v10506_v22 }
  0x57   :  { %10455 = vmatprep.mubr.msk.bf16.mxu0 %vm286_vm0, %v10507_v23 }
  0x5e   :  { %10456 = vmatmul.mubr.msk.bf16.gmra.mrb[40].mxu0 %vm286_vm0, %v10508_v24 }
  0x5f   :  { %10459 = vmatprep.mubr.msk.bf16.mxu0 %vm286_vm0, %v10509_v25 }
  0x66   :  { %10460 = vmatmul.mubr.msk.bf16.gmra.mrb[44].mxu0 %vm286_vm0, %v10510_v26 }
  0x67   :  { %10463 = vmatprep.mubr.msk.bf16.mxu0 %vm286_vm0, %v10511_v27 }
  0x6e   :  { %10464 = vmatmul.mubr.msk.bf16.gmra.mrb[48].mxu0 %vm286_vm0, %v10512_v28 }
  0x6f   :  { %10467 = vmatprep.mubr.msk.bf16.mxu0 %vm286_vm0, %v10513_v29 }
  0x76   :  { %10468 = vmatmul.mubr.msk.bf16.gmra.mrb[52].mxu0 %vm286_vm0, %v10514_v30 }
  0x77   :  { %10471 = vmatprep.mubr.msk.bf16.mxu0 %vm286_vm0, %v10515_v31 }
  0x7e   :  { %10472 = vmatmul.mubr.msk.bf16.gmra.mrb[56].mxu0 %vm286_vm0, %v10516_v32 }
  0x7f   :  { %10475 = vmatprep.mubr.msk.bf16.mxu0 %vm286_vm0, %v10517_v33 }
  0x86   :  { %10476 = vmatmul.mubr.msk.bf16.gmra.mrb[60].mxu0 %vm286_vm0, %v10518_v34 }
  0x87   :  { %4822 = vmatprep.mubr.bf16.mxu0 %v14999_v35 }
  0xe1   :  { %v10417_v37 = vpop.f32.mrb[0].mxu0 }
  0xe2   :  { %v417_v38 = vpop.f32.mrb[1].mxu0  ;;  %v426_v40 = vadd.f32 %v10417_v37, %v11538_v36 }
  0xe3   :  { %v10418_v39 = vpop.f32.mrb[2].mxu0  ;;  %v418_v43 = vadd.f32 %v11538_v36, %v417_v38 }
  0xe4   :  { %v429_v41 = vadd.f32 %v10418_v39, %v11538_v36  ;;  %v420_v42 = vpop.f32.mrb[3].mxu0 }
  0xe5   :  { %v421_v44 = vadd.f32 %v11538_v36, %v420_v42 }
  0xe6   :  { %13 = vsyncpa [#allocation3], 0  ;;  %v11544_v45 = vpack.c.bf16 %v429_v41, %v426_v40  ;;  %s11351_s9 = smov [#allocation2]   ;;  %vm9155_vm1 = vcmask 107520  }
  0xe7   :  { %v11546_v46 = vpack.c.bf16 %v421_v44, %v418_v43 }
  0xe9   :  { %v10421_v47 = vpop.f32.mrb[4].mxu0 }
  0xea   :  { %v433_v48 = vpop.f32.mrb[5].mxu0  ;;  %v442_v50 = vadd.f32 %v10421_v47, %v11538_v36 }
  0xeb   :  { %v10422_v49 = vpop.f32.mrb[6].mxu0  ;;  %v434_v53 = vadd.f32 %v11538_v36, %v433_v48 }
  0xec   :  { %v445_v51 = vadd.f32 %v10422_v49, %v11538_v36  ;;  %v436_v52 = vpop.f32.mrb[7].mxu0 }
  0xed   :  { %v437_v54 = vadd.f32 %v11538_v36, %v436_v52  ;;  %v844_v52 = vlaneseq }
  0xee   :  { %v11552_v55 = vpack.c.bf16 %v445_v51, %v442_v50  ;;  %v11348_v50 = vmov 1983009808  }
  0xef   :  { %v11554_v56 = vpack.c.bf16 %v437_v54, %v434_v53  ;;  %v842_v51 = vunpack.c.l.s4 %v11348_v50  ;;  %v11349_v53 = vmov 1934713408  }
  0xf0   :  { %v857_v54 = vunpack.c.l.s4 %v11349_v53 }
  0xf1   :  { %v10425_v57 = vpop.f32.mrb[8].mxu0 }
  0xf2   :  { %v449_v58 = vpop.f32.mrb[9].mxu0  ;;  %v458_v60 = vadd.f32 %v10425_v57, %v11538_v36 }
  0xf3   :  { %v10426_v59 = vpop.f32.mrb[10].mxu0  ;;  %v450_v63 = vadd.f32 %v11538_v36, %v449_v58 }
  0xf4   :  { %v461_v61 = vadd.f32 %v10426_v59, %v11538_v36  ;;  %v452_v62 = vpop.f32.mrb[11].mxu0 }
  0xf5   :  { %v453_v0 = vadd.f32 %v11538_v36, %v452_v62 }
  0xf6   :  { %v11560_v1 = vpack.c.bf16 %v461_v61, %v458_v60 }
  0xf7   :  { %v11562_v2 = vpack.c.bf16 %v453_v0, %v450_v63  ;;  %v843_v0 = vunpack.c.0.s8 %v842_v51 }
  0xf9   :  { %v10429_v3 = vpop.f32.mrb[12].mxu0 }
  0xfa   :  { %v465_v4 = vpop.f32.mrb[13].mxu0  ;;  %v474_v6 = vadd.f32 %v10429_v3, %v11538_v36  ;;  %v11604_v3 = vshrl.u32 %v844_v52, 7 }
  0xfb   :  { %v10430_v5 = vpop.f32.mrb[14].mxu0  ;;  %v466_v9 = vadd.f32 %v11538_v36, %v465_v4  ;;  %v858_v4 = vunpack.c.0.s8 %v857_v54 }
  0xfc   :  { %v477_v7 = vadd.f32 %v10430_v5, %v11538_v36  ;;  %v468_v8 = vpop.f32.mrb[15].mxu0  ;;  %15094 = vst [vmem:[#allocation11_spill] sm:$0xff] %v11604_v3 }
  0xfd   :  { %v469_v10 = vadd.f32 %v11538_v36, %v468_v8  ;;  %v11608_v8 = vpack.i.b16 %v14999_v35, %v14999_v35 }
  0xfe   :  { %v11568_v11 = vpack.c.bf16 %v477_v7, %v474_v6 }
  0xff   :  { %v11570_v12 = vpack.c.bf16 %v469_v10, %v466_v9  ;;  %v11611_v9 = vsub.s32 %v843_v0, %v11604_v3  ;;  %v11614_v10 = vsub.s32 %v858_v4, %v11604_v3 }
 0x101   :  { %v10433_v13 = vpop.f32.mrb[16].mxu0 }
 0x102   :  { %v481_v14 = vpop.f32.mrb[17].mxu0  ;;  %v490_v16 = vadd.f32 %v10433_v13, %v11538_v36  ;;  %v724_v13 = vshrl.u32 %v11544_v45, 16 }
 0x103   :  { %v10434_v15 = vpop.f32.mrb[18].mxu0  ;;  %v482_v19 = vadd.f32 %v11538_v36, %v481_v14  ;;  %v710_v14 = vshrl.u32 %v11546_v46, 16 }
 0x104   :  { %v493_v17 = vadd.f32 %v10434_v15, %v11538_v36  ;;  %v484_v18 = vpop.f32.mrb[19].mxu0 }
 0x105   :  { %v485_v20 = vadd.f32 %v11538_v36, %v484_v18  ;;  %v740_v18 = vshrl.u32 %v11552_v55, 16 }
 0x106   :  { %v11576_v21 = vpack.c.bf16 %v493_v17, %v490_v16 }
 0x107   :  { %v11578_v22 = vpack.c.bf16 %v485_v20, %v482_v19  ;;  %v732_v19 = vshrl.u32 %v11554_v56, 16 }
 0x109   :  { %v10437_v23 = vpop.f32.mrb[20].mxu0 }
 0x10a   :  { %v497_v24 = vpop.f32.mrb[21].mxu0  ;;  %v506_v26 = vadd.f32 %v10437_v23, %v11538_v36 }
 0x10b   :  { %v10438_v25 = vpop.f32.mrb[22].mxu0  ;;  %v498_v29 = vadd.f32 %v11538_v36, %v497_v24 }
 0x10c   :  { %v509_v27 = vadd.f32 %v10438_v25, %v11538_v36  ;;  %v500_v28 = vpop.f32.mrb[23].mxu0 }
 0x10d   :  { %v501_v30 = vadd.f32 %v11538_v36, %v500_v28 }
 0x10e   :  { %v11584_v31 = vpack.c.bf16 %v509_v27, %v506_v26 }
 0x10f   :  { %v11586_v32 = vpack.c.bf16 %v501_v30, %v498_v29 }
 0x110   :  { %15088 = vst [vmem:[#allocation5_spill] sm:$0xff] %v11584_v31 }
 0x111   :  { %15089 = vst [vmem:[#allocation6_spill] sm:$0xff] %v11586_v32  ;;  %v10441_v33 = vpop.f32.mrb[24].mxu0 }
 0x112   :  { %v513_v34 = vpop.f32.mrb[25].mxu0  ;;  %v522_v38 = vadd.f32 %v10441_v33, %v11538_v36 }
 0x113   :  { %v10442_v37 = vpop.f32.mrb[26].mxu0  ;;  %v514_v41 = vadd.f32 %v11538_v36, %v513_v34 }
 0x114   :  { %v525_v39 = vadd.f32 %v10442_v37, %v11538_v36  ;;  %v516_v40 = vpop.f32.mrb[27].mxu0 }
 0x115   :  { %v517_v42 = vadd.f32 %v11538_v36, %v516_v40 }
 0x116   :  { %v11592_v43 = vpack.c.bf16 %v525_v39, %v522_v38 }
 0x117   :  { %v11594_v44 = vpack.c.bf16 %v517_v42, %v514_v41 }
 0x118   :  { %15090 = vst [vmem:[#allocation7_spill] sm:$0xff] %v11592_v43 }
 0x119   :  { %15091 = vst [vmem:[#allocation8_spill] sm:$0xff] %v11594_v44  ;;  %v10445_v47 = vpop.f32.mrb[28].mxu0  ;;  %v15103_v44 = vmov 0  }
 0x11a   :  { %v529_v48 = vpop.f32.mrb[29].mxu0  ;;  %v538_v57 = vadd.f32 %v10445_v47, %v11538_v36 }
 0x11b   :  { %v10446_v49 = vpop.f32.mrb[30].mxu0  ;;  %v530_v60 = vadd.f32 %v11538_v36, %v529_v48 }
 0x11c   :  { %v541_v58 = vadd.f32 %v10446_v49, %v11538_v36  ;;  %v532_v59 = vpop.f32.mrb[31].mxu0 }
 0x11d   :  { %v533_v61 = vadd.f32 %v11538_v36, %v532_v59 }
 0x11e   :  { %v11600_v62 = vpack.c.bf16 %v541_v58, %v538_v57 }
 0x11f   :  { %v11602_v63 = vpack.c.bf16 %v533_v61, %v530_v60 }
 0x120   :  { %15092 = vst [vmem:[#allocation9_spill] sm:$0xff] %v11600_v62 }
 0x121   :  { %15093 = vst [vmem:[#allocation10_spill] sm:$0xff] %v11602_v63  ;;  %v10449_v5 = vpop.f32.mrb[32].mxu0 }
 0x122   :  { %v545_v6 = vpop.f32.mrb[33].mxu0  ;;  %v554_v15 = vadd.f32 %v10449_v5, %v11538_v36 }
 0x123   :  { %v10450_v7 = vpop.f32.mrb[34].mxu0  ;;  %v546_v20 = vadd.f32 %v11538_v36, %v545_v6 }
 0x124   :  { %v557_v16 = vadd.f32 %v10450_v7, %v11538_v36  ;;  %v548_v17 = vpop.f32.mrb[35].mxu0 }
 0x125   :  { %v549_v23 = vadd.f32 %v11538_v36, %v548_v17 }
 0x126   :  { %v689_v27 = vpack.c.bf16 %v557_v16, %v554_v15 }
 0x127   :  { %v688_v33 = vpack.c.bf16 %v549_v23, %v546_v20 }
 0x128   :  { %v722_v38 = vpack.i.b16 %v689_v27, %v11544_v45  ;;  %v725_v39 = vshrl.u32 %v689_v27, 16 }
 0x129   :  { %v708_v42 = vpack.i.b16 %v688_v33, %v11546_v46  ;;  %v711_v47 = vshrl.u32 %v688_v33, 16  ;;  %v10453_v48 = vpop.f32.mrb[36].mxu0 }
 0x12a   :  { %v726_v50 = vpack.i.b16 %v725_v39, %v724_v13  ;;  %v938_v51 = vcombine.high %v722_v38, %v11608_v8  ;;  %v945_v52 = vrot.slane %v722_v38, %v11611_v9  ;;  %v561_v53 = vpop.f32.mrb[37].mxu0  ;;  %v570_v0 = vadd.f32 %v10453_v48, %v11538_v36 }
 0x12b   :  { %v712_v45 = vpack.i.b16 %v711_v47, %v710_v14  ;;  %v840_v57 = vcombine.high %v708_v42, %v11608_v8  ;;  %v847_v58 = vrot.slane %v708_v42, %v11611_v9  ;;  %v10454_v59 = vpop.f32.mrb[38].mxu0  ;;  %v562_v13 = vadd.f32 %v11538_v36, %v561_v53 }
 0x12c   :  { %v952_v46 = vrot.slane %v938_v51, %v11611_v9  ;;  %v953_v60 = vcombine.high %v945_v52, %v14999_v35  ;;  %v987_v61 = vcombine.high %v726_v50, %v11608_v8  ;;  %v564_v4 = vpop.f32.mrb[39].mxu0  ;;  %v994_v5 = vrot.slane %v726_v50, %v11611_v9 }
 0x12d   :  { %v854_v6 = vrot.slane %v840_v57, %v11611_v9  ;;  %v855_v7 = vcombine.high %v847_v58, %v14999_v35  ;;  %v960_v14 = vrot.slane %v945_v52, %v11614_v10  ;;  %v11659_v27 = vrot.slane %v847_v58, %v11614_v10 }
 0x12e   :  { %v967_v15 = vrot.slane %v953_v60, %v11614_v10  ;;  %v968_v16 = vcombine.high %v952_v46, %v14999_v35  ;;  %v1001_v17 = vrot.slane %v987_v61, %v11611_v9  ;;  %v11655_v20 = vrot.slane %v952_v46, %v11614_v10 }
 0x12f   :  { %v1002_v23 = vcombine.high %v994_v5, %v14999_v35  ;;  %v870_v33 = vcombine.high %v854_v6, %v14999_v35  ;;  %v11666_v39 = vrot.slane %v994_v5, %v11614_v10  ;;  %v11676_v52 = vrot.slane %v855_v7, %v11614_v10 }
 0x130   :  { %v11663_v38 = vrot.slane %v968_v16, %v11614_v10  ;;  %v1017_v42 = vcombine.high %v1001_v17, %v14999_v35  ;;  %v2506_v47 = vcombine.low %v960_v14, %v967_v15  ;;  %v11673_v50 = vrot.slane %v1001_v17, %v11614_v10 }
 0x131   :  { %v11670_v48 = vrot.slane %v1002_v23, %v11614_v10  ;;  %v9243_v51 = vcombine.high %v960_v14, %v967_v15  ;;  %v10457_v53 = vpop.f32.mrb[40].mxu0  ;;  %v11685_v46 = vrot.slane %v854_v6, %v11614_v10  ;;  %v11688_v60 = vrot.slane %v870_v33, %v11614_v10 }
 0x132   :  { %v11679_v57 = vrot.slane %v1017_v42, %v11614_v10  ;;  %v11682_v58 = vrot.slane %v2506_v47, %v11611_v9  ;;  %v577_v61 = vpop.f32.mrb[41].mxu0  ;;  %v889_v15 = vcombine.high %v712_v45, %v11608_v8  ;;  %v896_v33 = vrot.slane %v712_v45, %v11611_v9 }
 0x133   :  { %v11691_v5 = vrot.slane %v9243_v51, %v11611_v9  ;;  %v10458_v16 = vpop.f32.mrb[42].mxu0  ;;  %v573_v54 = vadd.f32 %v10454_v59, %v11538_v36  ;;  %v565_v49 = vadd.f32 %v11538_v36, %v564_v4  ;;  %v2408_v37 = vcombine.low %v11659_v27, %v11676_v52 }
 0x134   :  { %v580_v42 = vpop.f32.mrb[43].mxu0  ;;  %v903_v51 = vrot.slane %v889_v15, %v11611_v9  ;;  %v904_v41 = vcombine.high %v896_v33, %v14999_v35  ;;  %v11712_v40 = vrot.slane %v896_v33, %v11614_v10  ;;  %v586_v47 = vadd.f32 %v10457_v53, %v11538_v36 }
 0x135   :  { %v691_v34 = vpack.c.bf16 %v573_v54, %v570_v0  ;;  %v690_v30 = vpack.c.bf16 %v565_v49, %v562_v13  ;;  %v578_v15 = vadd.f32 %v11538_v36, %v577_v61  ;;  %v589_v33 = vadd.f32 %v10458_v16, %v11538_v36 }
 0x136   :  { %v919_v59 = vcombine.high %v903_v51, %v14999_v35  ;;  %v11722_v4 = vrot.slane %v903_v51, %v11614_v10  ;;  %v581_v23 = vadd.f32 %v11538_v36, %v580_v42  ;;  %v11729_v0 = vrot.slane %v904_v41, %v11614_v10 }
 0x137   :  { %v738_v17 = vpack.i.b16 %v691_v34, %v11552_v55  ;;  %v741_v6 = vshrl.u32 %v691_v34, 16  ;;  %v730_v14 = vpack.i.b16 %v690_v30, %v11554_v56  ;;  %v733_v54 = vshrl.u32 %v690_v30, 16 }
 0x138   :  { %v693_v13 = vpack.c.bf16 %v589_v33, %v586_v47  ;;  %v11731_v53 = vpack.c.bf16 %v581_v23, %v578_v15  ;;  %v11736_v51 = vrot.slane %v2408_v37, %v11611_v9 }
 0x139   :  { %v10461_v49 = vpop.f32.mrb[44].mxu0  ;;  %v742_v16 = vpack.i.b16 %v741_v6, %v740_v18  ;;  %v1134_v34 = vcombine.high %v738_v17, %v11608_v8  ;;  %v1141_v42 = vrot.slane %v738_v17, %v11611_v9  ;;  %v734_v30 = vpack.i.b16 %v733_v54, %v732_v19 }
 0x13a   :  { %v11733_v61 = vpop.f32.mrb[45].mxu0  ;;  %v1036_v23 = vcombine.high %v730_v14, %v11608_v8  ;;  %v1043_v47 = vrot.slane %v730_v14, %v11611_v9  ;;  %v754_v15 = vpack.i.b16 %v693_v13, %v11560_v1  ;;  %v11750_v37 = vadd.f32 %v10461_v49, %v11538_v36 }
 0x13b   :  { %v11744_v41 = vpop.f32.mrb[46].mxu0  ;;  %v1148_v18 = vrot.slane %v1134_v34, %v11611_v9  ;;  %v1149_v6 = vcombine.high %v1141_v42, %v14999_v35  ;;  %v1183_v56 = vcombine.high %v742_v16, %v11608_v8  ;;  %v11758_v19 = vrot.slane %v919_v59, %v11614_v10 }
 0x13c   :  { %v11752_v55 = vpop.f32.mrb[47].mxu0  ;;  %v1190_v17 = vrot.slane %v742_v16, %v11611_v9  ;;  %v1050_v14 = vrot.slane %v1036_v23, %v11611_v9  ;;  %v1051_v33 = vcombine.high %v1043_v47, %v14999_v35  ;;  %v757_v54 = vshrl.u32 %v693_v13, 16 }
 0x13d   :  { %v1156_v49 = vrot.slane %v1141_v42, %v11614_v10  ;;  %v1163_v7 = vrot.slane %v1149_v6, %v11614_v10  ;;  %v1164_v34 = vcombine.high %v1148_v18, %v14999_v35  ;;  %v1197_v29 = vrot.slane %v1183_v56, %v11611_v9 }
 0x13e   :  { %v11768_v45 = vrot.slane %v1148_v18, %v11614_v10  ;;  %v1198_v59 = vcombine.high %v1190_v17, %v14999_v35  ;;  %v1058_v16 = vrot.slane %v1043_v47, %v11614_v10  ;;  %v1066_v23 = vcombine.high %v1050_v14, %v14999_v35 }
 0x13f   :  { %v11774_v28 = vrot.slane %v1164_v34, %v11614_v10  ;;  %v11777_v13 = vrot.slane %v1190_v17, %v11614_v10  ;;  %v1213_v42 = vcombine.high %v1197_v29, %v14999_v35  ;;  %v2702_v6 = vcombine.low %v1156_v49, %v1163_v7 }
 0x140   :  { %15095 = vst [vmem:[#allocation12_spill] sm:$0xff] %v11768_v45  ;;  %v11783_v18 = vrot.slane %v1198_v59, %v11614_v10  ;;  %v11786_v56 = vrot.slane %v1197_v29, %v11614_v10  ;;  %v9251_v47 = vcombine.high %v1156_v49, %v1163_v7  ;;  %v1065_v25 = vrot.slane %v1051_v33, %v11614_v10 }
 0x141   :  { %15096 = vst [vmem:[#allocation13_spill] sm:$0xff] %v11774_v28  ;;  %15097 = vst [vmem:[#allocation14_spill] sm:$0xff] %v11777_v13  ;;  %v11780_v26 = vpop.f32.mrb[48].mxu0  ;;  %v11792_v34 = vrot.slane %v1213_v42, %v11614_v10  ;;  %v11795_v17 = vrot.slane %v2702_v6, %v11611_v9  ;;  %v11798_v35 = vrot.slane %v1050_v14, %v11614_v10 }
 0x142   :  { %15098 = vst [vmem:[#allocation15_spill] sm:$0xff] %v11783_v18  ;;  %15099 = vst [vmem:[#allocation16_spill] sm:$0xff] %v11786_v56  ;;  %v11789_v24 = vpop.f32.mrb[49].mxu0  ;;  %v11801_v59 = vrot.slane %v1066_v23, %v11614_v10  ;;  %v11806_v29 = vrot.slane %v9251_v47, %v11611_v9  ;;  %v1085_v49 = vcombine.high %v734_v30, %v11608_v8  ;;  %v15104_v18 = vshrl.u32 %v11560_v1, 16 }
 0x143   :  { %15100 = vst [vmem:[#allocation17_spill] sm:$0xff] %v11792_v34  ;;  %15101 = vst [vmem:[#allocation18_spill] sm:$0xff] %v11795_v17  ;;  %v11803_v3 = vpop.f32.mrb[50].mxu0  ;;  %v1092_v47 = vrot.slane %v734_v30, %v11611_v9  ;;  %v2604_v63 = vcombine.low %v1058_v16, %v1065_v25  ;;  %v9247_v62 = vcombine.high %v1058_v16, %v1065_v25  ;;  %v749_v34 = vshrl.u32 %v11731_v53, 16 }
 0x144   :  { %15102 = vst [vmem:[#allocation19_spill] sm:$0xff] %v11806_v29  ;;  %v11813_v42 = vpop.f32.mrb[51].mxu0  ;;  %v1099_v33 = vrot.slane %v1085_v49, %v11611_v9  ;;  %v758_v6 = vpack.i.b16 %v757_v54, %v15104_v18  ;;  %v1330_v25 = vcombine.high %v754_v15, %v11608_v8  ;;  %v1337_v14 = vrot.slane %v754_v15, %v11611_v9 }
 0x145   :  { %v1100_v43 = vcombine.high %v1092_v47, %v15103_v44  ;;  %v11833_v30 = vrot.slane %v1092_v47, %v11614_v10  ;;  %v11858_v15 = vrot.slane %v2604_v63, %v11611_v9  ;;  %v11861_v56 = vrot.slane %v9247_v62, %v11611_v9 }
 0x146   :  { %v1115_v7 = vcombine.high %v1099_v33, %v15103_v44  ;;  %v11837_v49 = vrot.slane %v1099_v33, %v11614_v10  ;;  %v1379_v23 = vcombine.high %v758_v6, %v11608_v8  ;;  %v1386_v1 = vrot.slane %v758_v6, %v11611_v9 }
 0x147   :  { %v11841_v16 = vrot.slane %v1100_v43, %v11614_v10  ;;  %v1344_v47 = vrot.slane %v1330_v25, %v11611_v9  ;;  %v746_v33 = vpack.i.b16 %v11731_v53, %v11562_v2  ;;  %v1352_v17 = vrot.slane %v1337_v14, %v11614_v10 }
 0x148   :  { %v11849_v18 = vrot.slane %v1115_v7, %v11614_v10  ;;  %v1345_v7 = vcombine.high %v1337_v14, %v15103_v44  ;;  %v1393_v28 = vrot.slane %v1379_v23, %v11611_v9  ;;  %v1394_v45 = vcombine.high %v1386_v1, %v15103_v44 }
 0x149   :  { %v11846_v54 = vpop.f32.mrb[52].mxu0  ;;  %v1360_v63 = vcombine.high %v1344_v47, %v15103_v44  ;;  %v15108_v53 = vshrl.u32 %v11562_v2, 16  ;;  %v1232_v14 = vcombine.high %v746_v33, %v11608_v8  ;;  %v1239_v31 = vrot.slane %v746_v33, %v11611_v9 }
 0x14a   :  { %15105 = vst [vmem:[#allocation20_spill] sm:$0xff] %v11849_v18  ;;  %v11855_v43 = vpop.f32.mrb[53].mxu0  ;;  %v1359_v6 = vrot.slane %v1345_v7, %v11614_v10  ;;  %v11892_v62 = vrot.slane %v1394_v45, %v11614_v10  ;;  %v1409_v23 = vcombine.high %v1393_v28, %v15103_v44  ;;  %v11896_v18 = vrot.slane %v1386_v1, %v11614_v10 }
 0x14b   :  { %v11866_v13 = vpop.f32.mrb[54].mxu0  ;;  %v11882_v25 = vrot.slane %v1360_v63, %v11614_v10  ;;  %v750_v32 = vpack.i.b16 %v749_v34, %v15108_v53  ;;  %v11899_v63 = vrot.slane %v1393_v28, %v11614_v10  ;;  %v1246_v34 = vrot.slane %v1232_v14, %v11611_v9 }
 0x14c   :  { %v11874_v29 = vpop.f32.mrb[55].mxu0  ;;  %15110 = vst [vmem:[#allocation24_spill] sm:$0xff] %v11892_v62  ;;  %v2898_v7 = vcombine.low %v1352_v17, %v1359_v6  ;;  %15111 = vst [vmem:[#allocation25_spill] sm:$0xff] %v11896_v18  ;;  %v9259_v2 = vcombine.high %v1352_v17, %v1359_v6  ;;  %v11903_v33 = vrot.slane %v1409_v23, %v11614_v10 }
 0x14d   :  { %15106 = vst [vmem:[#allocation21_spill] sm:$0xff] %v11874_v29  ;;  %15107 = vst [vmem:[#allocation22_spill] sm:$0xff] %v11882_v25  ;;  %v11889_v29 = vrot.slane %v1344_v47, %v11614_v10  ;;  %v1247_v6 = vcombine.high %v1239_v31, %v15103_v44  ;;  %v1262_v14 = vcombine.high %v1246_v34, %v15103_v44 }
 0x14e   :  { %15112 = vst [vmem:[#allocation26_spill] sm:$0xff] %v11899_v63  ;;  %15113 = vst [vmem:[#allocation27_spill] sm:$0xff] %v11903_v33  ;;  %v11906_v47 = vrot.slane %v2898_v7, %v11611_v9  ;;  %v11923_v7 = vrot.slane %v9259_v2, %v11611_v9  ;;  %v1254_v45 = vrot.slane %v1239_v31, %v11614_v10 }
 0x14f   :  { %15109 = vst [vmem:[#allocation23_spill] sm:$0xff] %v11889_v29  ;;  %v1261_v62 = vrot.slane %v1247_v6, %v11614_v10  ;;  %v11935_v18 = vrot.slane %v1262_v14, %v11614_v10  ;;  %v1288_v2 = vrot.slane %v750_v32, %v11611_v9  ;;  %v11941_v53 = vrot.slane %v1246_v34, %v11614_v10 }
 0x150   :  { %15114 = vst [vmem:[#allocation28_spill] sm:$0xff] %v11906_v47  ;;  %15116 = vst [vmem:[#allocation30_spill] sm:$0xff] %v11923_v7  ;;  %v1281_v47 = vcombine.high %v750_v32, %v11608_v8  ;;  %v605_v25 = vadd.f32 %v11744_v41, %v11538_v36  ;;  %v597_v17 = vadd.f32 %v11538_v36, %v11752_v55 }
 0x151   :  { %v11912_v1 = vpop.f32.mrb[56].mxu0  ;;  %v1296_v6 = vcombine.high %v1288_v2, %v15103_v44  ;;  %v2800_v33 = vcombine.low %v1254_v45, %v1261_v62  ;;  %v9255_v14 = vcombine.high %v1254_v45, %v1261_v62  ;;  %v594_v32 = vadd.f32 %v11538_v36, %v11733_v61 }
 0x152   :  { %v11920_v23 = vpop.f32.mrb[57].mxu0  ;;  %v1295_v31 = vrot.slane %v1281_v47, %v11611_v9  ;;  %v11952_v63 = vrot.slane %v1288_v2, %v11614_v10  ;;  %v618_v41 = vadd.f32 %v11780_v26, %v11538_v36  ;;  %v695_v45 = vpack.c.bf16 %v605_v25, %v11750_v37 }
 0x153   :  { %15115 = vst [vmem:[#allocation29_spill] sm:$0xff] %v11920_v23  ;;  %v11929_v28 = vpop.f32.mrb[58].mxu0  ;;  %v11961_v55 = vrot.slane %v1296_v6, %v11614_v10  ;;  %v694_v29 = vpack.c.bf16 %v597_v17, %v594_v32  ;;  %v621_v26 = vadd.f32 %v11803_v3, %v11538_v36  ;;  %v11984_v37 = vadd.f32 %v11538_v36, %v11789_v24 }
 0x154   :  { %v11938_v7 = vpop.f32.mrb[59].mxu0  ;;  %15118 = vst [vmem:[#allocation32_spill] sm:$0xff] %v11952_v63  ;;  %v1311_v34 = vcombine.high %v1295_v31, %v15103_v44  ;;  %v11956_v47 = vrot.slane %v1295_v31, %v11614_v10  ;;  %v11972_v31 = vrot.slane %v2800_v33, %v11611_v9  ;;  %v770_v62 = vpack.i.b16 %v695_v45, %v11568_v11 }
 0x155   :  { %15117 = vst [vmem:[#allocation31_spill] sm:$0xff] %v11938_v7  ;;  %15120 = vst [vmem:[#allocation34_spill] sm:$0xff] %v11961_v55  ;;  %v11979_v7 = vrot.slane %v9255_v14, %v11611_v9  ;;  %v773_v61 = vshrl.u32 %v695_v45, 16  ;;  %v762_v17 = vpack.i.b16 %v694_v29, %v11570_v12  ;;  %v765_v32 = vshrl.u32 %v694_v29, 16 }
 0x156   :  { %15119 = vst [vmem:[#allocation33_spill] sm:$0xff] %v11956_v47  ;;  %v11969_v2 = vrot.slane %v1311_v34, %v11614_v10  ;;  %v15125_v34 = vshrl.u32 %v11568_v11, 16  ;;  %v1533_v24 = vrot.slane %v770_v62, %v11611_v9  ;;  %v697_v23 = vpack.c.bf16 %v621_v26, %v618_v41 }
 0x157   :  { %v15127_v3 = vshrl.u32 %v11570_v12, 16  ;;  %v1428_v29 = vcombine.high %v762_v17, %v11608_v8 }
 0x158   :  { %15121 = vst [vmem:[#allocation35_spill] sm:$0xff] %v11969_v2  ;;  %v774_v45 = vpack.i.b16 %v773_v61, %v15125_v34 }
 0x159   :  { %v11976_v6 = vpop.f32.mrb[60].mxu0  ;;  %v766_v55 = vpack.i.b16 %v765_v32, %v15127_v3  ;;  %v1442_v34 = vrot.slane %v1428_v29, %v11611_v9  ;;  %v15128_v3 = vcombine.high %v11659_v27, %v11676_v52  ;;  %v1548_v32 = vrot.slane %v1533_v24, %v11614_v10 }
 0x15a   :  { %15122 = vst [vmem:[#allocation36_spill] sm:$0xff] %v11976_v6  ;;  %v11986_v25 = vpop.f32.mrb[61].mxu0  ;;  %v1526_v6 = vcombine.high %v770_v62, %v11608_v8  ;;  %v1541_v62 = vcombine.high %v1533_v24, %v15103_v44  ;;  %v1575_v41 = vcombine.high %v774_v45, %v11608_v8  ;;  %v1582_v26 = vrot.slane %v774_v45, %v11611_v9 }
 0x15b   :  { %15123 = vst [vmem:[#allocation37_spill] sm:$0xff] %v11986_v25  ;;  %v11993_v14 = vpop.f32.mrb[62].mxu0  ;;  %v1458_v2 = vcombine.high %v1442_v34, %v15103_v44  ;;  %v12052_v63 = vrot.slane %v1442_v34, %v11614_v10 }
 0x15c   :  { %15124 = vst [vmem:[#allocation38_spill] sm:$0xff] %v11993_v14  ;;  %v11999_v25 = vpop.f32.mrb[63].mxu0  ;;  %v1435_v14 = vrot.slane %v762_v17, %v11611_v9  ;;  %v1540_v61 = vrot.slane %v1526_v6, %v11611_v9  ;;  %v12019_v17 = vrot.slane %v15128_v3, %v11611_v9  ;;  %v1555_v6 = vrot.slane %v1541_v62, %v11614_v10 }
 0x15d   :  { %15126 = vst [vmem:[#allocation39_spill] sm:$0xff] %v11999_v25  ;;  %v1589_v33 = vrot.slane %v1575_v41, %v11611_v9  ;;  %v1590_v29 = vcombine.high %v1582_v26, %v15103_v44  ;;  %v12037_v3 = vrot.slane %v1582_v26, %v11614_v10 }
 0x15e   :  { %v1443_v12 = vcombine.high %v1435_v14, %v15103_v44  ;;  %v1556_v11 = vcombine.high %v1540_v61, %v15103_v44  ;;  %v12026_v45 = vrot.slane %v1540_v61, %v11614_v10  ;;  %v1450_v25 = vrot.slane %v1435_v14, %v11614_v10 }
 0x15f   :  { %v1605_v52 = vcombine.high %v1589_v33, %v15103_v44  ;;  %v3094_v24 = vcombine.low %v1548_v32, %v1555_v6  ;;  %15131 = vst [vmem:[#allocation42_spill] sm:$0xff] %v12037_v3  ;;  %v12040_v61 = vrot.slane %v1590_v29, %v11614_v10  ;;  %v12043_v41 = vrot.slane %v1589_v33, %v11614_v10 }
 0x160   :  { %15129 = vst [vmem:[#allocation40_spill] sm:$0xff] %v12026_v45  ;;  %v12032_v27 = vrot.slane %v1556_v11, %v11614_v10  ;;  %v1457_v62 = vrot.slane %v1443_v12, %v11614_v10  ;;  %v9267_v14 = vcombine.high %v1548_v32, %v1555_v6  ;;  %v12055_v12 = vrot.slane %v1458_v2, %v11614_v10 }
 0x161   :  { %15132 = vst [vmem:[#allocation43_spill] sm:$0xff] %v12040_v61  ;;  %15133 = vst [vmem:[#allocation44_spill] sm:$0xff] %v12043_v41  ;;  %v12046_v47 = vrot.slane %v1605_v52, %v11614_v10  ;;  %v12049_v11 = vrot.slane %v3094_v24, %v11611_v9  ;;  %v1477_v6 = vcombine.high %v766_v55, %v11608_v8 }
 0x162   :  { %15130 = vst [vmem:[#allocation41_spill] sm:$0xff] %v12032_v27  ;;  %v12058_v26 = vrot.slane %v9267_v14, %v11611_v9  ;;  %v1484_v2 = vrot.slane %v766_v55, %v11611_v9  ;;  %v2996_v52 = vcombine.low %v1450_v25, %v1457_v62  ;;  %v9263_v32 = vcombine.high %v1450_v25, %v1457_v62 }
 0x163   :  { %15134 = vst [vmem:[#allocation45_spill] sm:$0xff] %v12046_v47  ;;  %15135 = vst [vmem:[#allocation46_spill] sm:$0xff] %v12049_v11  ;;  %v1491_v33 = vrot.slane %v1477_v6, %v11611_v9  ;;  %v786_v55 = vpack.i.b16 %v697_v23, %v11576_v21  ;;  %v789_v6 = vshrl.u32 %v697_v23, 16  ;;  %v9240_v23 = vcombine.high %v11685_v46, %v11688_v60 }
 0x164   :  { %15136 = vst [vmem:[#allocation47_spill] sm:$0xff] %v12058_v26  ;;  %v1492_v11 = vcombine.high %v1484_v2, %v15103_v44  ;;  %v12082_v61 = vrot.slane %v1484_v2, %v11614_v10  ;;  %v12086_v14 = vrot.slane %v2996_v52, %v11611_v9  ;;  %v15137_v2 = vshrl.u32 %v11576_v21, 16 }
 0x165   :  { %v1507_v24 = vcombine.high %v1491_v33, %v15103_v44  ;;  %v12092_v62 = vrot.slane %v1491_v33, %v11614_v10  ;;  %v1722_v29 = vcombine.high %v786_v55, %v11608_v8  ;;  %v1729_v34 = vrot.slane %v786_v55, %v11611_v9 }
 0x166   :  { %v12089_v25 = vrot.slane %v1492_v11, %v11614_v10  ;;  %v790_v41 = vpack.i.b16 %v789_v6, %v15137_v2  ;;  %v2424_v52 = vcombine.low %v11685_v46, %v11688_v60  ;;  %v12106_v11 = vrot.slane %v9263_v32, %v11611_v9 }
 0x167   :  { %v12097_v47 = vrot.slane %v1507_v24, %v11614_v10  ;;  %v1736_v33 = vrot.slane %v1722_v29, %v11611_v9  ;;  %v1737_v3 = vcombine.high %v1729_v34, %v15103_v44  ;;  %v2440_v24 = vcombine.low %v11736_v51, %v12019_v17 }
 0x168   :  { %v1771_v46 = vcombine.high %v790_v41, %v11608_v8  ;;  %v1744_v60 = vrot.slane %v1729_v34, %v11614_v10  ;;  %v1778_v2 = vrot.slane %v790_v41, %v11611_v9  ;;  %v2431_v55 = vrot.slane %v2424_v52, %v11611_v9 }
 0x169   :  { %v1751_v32 = vrot.slane %v1737_v3, %v11614_v10  ;;  %v1752_v29 = vcombine.high %v1736_v33, %v15103_v44  ;;  %v2439_v21 = vrot.slane %v9240_v23, %v11611_v9  ;;  %v12129_v6 = vrot.slane %v1736_v33, %v11614_v10 }
 0x16a   :  { %v1785_v17 = vrot.slane %v1771_v46, %v11611_v9  ;;  %v1786_v3 = vcombine.high %v1778_v2, %v15103_v44  ;;  %v2447_v51 = vrot.slane %v2440_v24, %v11614_v10  ;;  %v12138_v46 = vrot.slane %v1778_v2, %v11614_v10 }
 0x16b   :  { %v12132_v34 = vrot.slane %v1752_v29, %v11614_v10  ;;  %v3290_v26 = vcombine.low %v1744_v60, %v1751_v32  ;;  %v9275_v27 = vcombine.high %v1744_v60, %v1751_v32  ;;  %v2448_v45 = vcombine.low %v2431_v55, %v2439_v21 }
 0x16c   :  { %v1801_v41 = vcombine.high %v1785_v17, %v15103_v44  ;;  %v12141_v52 = vrot.slane %v1786_v3, %v11614_v10  ;;  %v12144_v23 = vrot.slane %v1785_v17, %v11614_v10  ;;  %v2457_v21 = vcombine.low %v11712_v40, %v11729_v0 }
 0x16d   :  { %v12147_v33 = vrot.slane %v3290_v26, %v11611_v9  ;;  %v12159_v55 = vrot.slane %v9275_v27, %v11611_v9  ;;  %v2455_v32 = vrot.slane %v2448_v45, %v11614_v10  ;;  %v9241_v26 = vcombine.high %v11712_v40, %v11729_v0 }
 0x16e   :  { %v12150_v29 = vrot.slane %v1801_v41, %v11614_v10  ;;  %v2473_v2 = vcombine.low %v11722_v4, %v11758_v19  ;;  %v2464_v27 = vrot.slane %v2457_v21, %v11611_v9  ;;  %v9242_v40 = vcombine.high %v11722_v4, %v11758_v19 }
 0x16f   :  { %v2472_v24 = vrot.slane %v9241_v26, %v11611_v9  ;;  %v613_v0 = vadd.f32 %v11538_v36, %v11813_v42  ;;  %v15139_v3 = vcombine.low %v11655_v20, %v11663_v38  ;;  %v15140_v21 = vcombine.high %v11655_v20, %v11663_v38 }
 0x170   :  { %15138 = vst [vmem:[#allocation48_spill] sm:$0xff] %v12150_v29  ;;  %v2480_v45 = vrot.slane %v2473_v2, %v11611_v9  ;;  %v2538_v2 = vcombine.low %v11682_v58, %v11691_v5  ;;  %v2488_v4 = vrot.slane %v9242_v40, %v11611_v9  ;;  %v15141_v17 = vcombine.low %v11666_v39, %v11670_v48 }
 0x171   :  { %v2529_v41 = vrot.slane %v15139_v3, %v11611_v9  ;;  %v2537_v26 = vrot.slane %v15140_v21, %v11611_v9  ;;  %v2489_v19 = vcombine.low %v2464_v27, %v2472_v24  ;;  %v696_v42 = vpack.c.bf16 %v613_v0, %v11984_v37 }
 0x172   :  { %v2562_v60 = vrot.slane %v15141_v17, %v11611_v9  ;;  %v2456_v29 = vcombine.low %v2447_v51, %v2455_v32  ;;  %v15142_v20 = vcombine.high %v11666_v39, %v11670_v48  ;;  %v15143_v58 = vcombine.low %v11673_v50, %v11679_v57 }
 0x173   :  { %v2546_v3 = vcombine.low %v2529_v41, %v2537_v26  ;;  %v2497_v24 = vcombine.low %v2480_v45, %v2488_v4  ;;  %v778_v37 = vpack.i.b16 %v696_v42, %v11578_v22  ;;  %v781_v27 = vshrl.u32 %v696_v42, 16 }
 0x174   :  { %v2570_v38 = vrot.slane %v15142_v20, %v11611_v9  ;;  %v2578_v5 = vrot.slane %v15143_v58, %v11611_v9  ;;  %v2545_v40 = vrot.slane %v2538_v2, %v11614_v10  ;;  %v2496_v17 = vrot.slane %v2489_v19, %v11614_v10 }
 0x175   :  { %v2553_v51 = vrot.slane %v2546_v3, %v11614_v10  ;;  %v15144_v39 = vcombine.high %v11673_v50, %v11679_v57  ;;  %v2504_v41 = vrot.slane %v2497_v24, %v11614_v10  ;;  %v15145_v0 = vshrl.u32 %v11578_v22, 16 }
 0x176   :  { %v2587_v32 = vcombine.low %v2562_v60, %v2570_v38  ;;  %v1624_v21 = vcombine.high %v778_v37, %v11608_v8  ;;  %v1631_v26 = vrot.slane %v778_v37, %v11611_v9  ;;  %v3980_v2 = vshrl.u32 %v2456_v29, 16 }
 0x177   :  { %v2586_v48 = vrot.slane %v15144_v39, %v11611_v9  ;;  %v782_v45 = vpack.i.b16 %v781_v27, %v15145_v0  ;;  %v2554_v4 = vcombine.low %v2545_v40, %v2553_v51  ;;  %v634_v42 = vadd.f32 %v11846_v54, %v11538_v36 }
 0x178   :  { %v2505_v3 = vcombine.low %v2496_v17, %v2504_v41  ;;  %v1638_v50 = vrot.slane %v1624_v21, %v11611_v9  ;;  %v1639_v57 = vcombine.high %v1631_v26, %v15103_v44  ;;  %v2594_v60 = vrot.slane %v2587_v32, %v11614_v10 }
 0x179   :  { %v2595_v19 = vcombine.low %v2578_v5, %v2586_v48  ;;  %v1673_v22 = vcombine.high %v782_v45, %v11608_v8  ;;  %v1680_v20 = vrot.slane %v782_v45, %v11611_v9  ;;  %v626_v58 = vadd.f32 %v11538_v36, %v11855_v43 }
 0x17a   :  { %v3981_v5 = vshrl.u32 %v2505_v3, 16  ;;  %v1646_v24 = vrot.slane %v1631_v26, %v11614_v10  ;;  %v1653_v54 = vrot.slane %v1639_v57, %v11614_v10  ;;  %v1654_v37 = vcombine.high %v1638_v50, %v15103_v44 }
 0x17b   :  { %v2602_v38 = vrot.slane %v2595_v19, %v11614_v10  ;;  %v1687_v27 = vrot.slane %v1673_v22, %v11611_v9  ;;  %v1688_v40 = vcombine.high %v1680_v20, %v15103_v44  ;;  %v3978_v17 = vpack.i.b16 %v2505_v3, %v2456_v29  ;;  %v12265_v22 = vld [vmem:[%s14992_s2] ss:$0 sm:$0xff] }
 0x17c   :  { %v3988_v51 = vshrl.u32 %v2554_v4, 16  ;;  %v3982_v39 = vpack.i.b16 %v3981_v5, %v3980_v2  ;;  %v12234_v48 = vrot.slane %v1654_v37, %v11614_v10  ;;  %v3192_v32 = vcombine.low %v1646_v24, %v1653_v54 }
 0x17d   :  { %v9271_v41 = vcombine.high %v1646_v24, %v1653_v54  ;;  %v12237_v36 = vrot.slane %v1638_v50, %v11614_v10  ;;  %v12240_v43 = vrot.slane %v1688_v40, %v11614_v10  ;;  %v1703_v0 = vcombine.high %v1687_v27, %v15103_v44 }
 0x17e   :  { %v2603_v45 = vcombine.low %v2594_v60, %v2602_v38  ;;  %4132 = vmatprep.subr.bf16.mxu1 %v3982_v39  ;;  %v12244_v21 = vrot.slane %v1680_v20, %v11614_v10  ;;  %v12247_v29 = vrot.slane %v1687_v27, %v11614_v10  ;;  %v12250_v26 = vrot.slane %v3192_v32, %v11611_v9 }
 0x17f   :  { %v12253_v2 = vrot.slane %v9271_v41, %v11611_v9  ;;  %v12256_v19 = vrot.slane %v1703_v0, %v11614_v10  ;;  %4133 = vmatpush1.bf16.msra.mxu1 %v3978_v17  ;;  %v637_v20 = vadd.f32 %v12265_v22, %v11866_v13  ;;  %v15146_v38 = vcombine.low %v11798_v35, %v11801_v59  ;;  %v10521_v41 = vld [vmem:[%s14993_s3 + $0x4] ss:$8 sps:$4 sm:$0xff]  }
 0x180   :  { %v3989_v57 = vshrl.u32 %v2603_v45, 16  ;;  %v3986_v60 = vpack.i.b16 %v2603_v45, %v2554_v4  ;;  %v15147_v24 = vcombine.high %v11798_v35, %v11801_v59  ;;  %v2636_v13 = vcombine.low %v11858_v15, %v11861_v56  ;;  %v15150_v56 = vld [vmem:[#allocation20_spill] sm:$0xff]  ;;  %4164 = vmatprep.mubr.bf16.mxu1 %v10521_v41 }
 0x181   :  { %v2627_v5 = vrot.slane %v15146_v38, %v11611_v9  ;;  %v699_v40 = vpack.c.bf16 %v637_v20, %v634_v42  ;;  %v15148_v39 = vcombine.low %v11833_v30, %v11841_v16  ;;  %v15149_v35 = vcombine.high %v11833_v30, %v11841_v16  ;;  %v15154_v16 = vld [vmem:[#allocation5_spill] sm:$0xff] }
 0x182   :  { %v2635_v54 = vrot.slane %v15147_v24, %v11611_v9  ;;  %v3990_v27 = vpack.i.b16 %v3989_v57, %v3988_v51  ;;  %v2643_v51 = vrot.slane %v2636_v13, %v11614_v10  ;;  %v15151_v15 = vcombine.low %v11837_v49, %v15150_v56  ;;  %v15153_v57 = vld [vmem:[#allocation21_spill] sm:$0xff] }
 0x183   :  { %v2660_v32 = vrot.slane %v15148_v39, %v11611_v9  ;;  %v2668_v59 = vrot.slane %v15149_v35, %v11611_v9  ;;  %v15152_v0 = vcombine.high %v11837_v49, %v15150_v56  ;;  %v629_v30 = vadd.f32 %v12265_v22, %v15153_v57  ;;  %v10522_v39 = vld [vmem:[%s14994_s4] ss:$16 sps:$4 sm:$0xff]  }
 0x184   :  { %v2644_v17 = vcombine.low %v2627_v5, %v2635_v54  ;;  %4134 = vmatprep.subr.bf16.mxu1 %v3990_v27  ;;  %v2676_v42 = vrot.slane %v15151_v15, %v11611_v9  ;;  %v802_v20 = vpack.i.b16 %v699_v40, %v15154_v16  ;;  %v805_v38 = vshrl.u32 %v699_v40, 16  ;;  %v15156_v15 = vld [vmem:[#allocation6_spill] sm:$0xff] }
 0x185   :  { %v2684_v45 = vrot.slane %v15152_v0, %v11611_v9  ;;  %4135 = vmatpush1.bf16.msra.mxu1 %v3986_v60  ;;  %v2685_v24 = vcombine.low %v2660_v32, %v2668_v59  ;;  %v698_v49 = vpack.c.bf16 %v629_v30, %v626_v58  ;;  %v10524_v60 = vld [vmem:[%s14994_s4 + $0x4] ss:$16 sps:$4 sm:$0xff]   ;;  %v15155_v40 = vshrl.u32 %v15154_v16, 16 }
 0x186   :  { %v2651_v5 = vrot.slane %v2644_v17, %v11614_v10  ;;  %v1918_v32 = vcombine.high %v802_v20, %v11608_v8  ;;  %v1925_v35 = vrot.slane %v802_v20, %v11611_v9  ;;  %v10527_v58 = vld [vmem:[%s14994_s4 + $0x24] ss:$16 sps:$4 sm:$0xff]   ;;  %4790 = vmatprep.subr.bf16.mxu0 %v10524_v60 }
 0x187   :  { %v2693_v13 = vcombine.low %v2676_v42, %v2684_v45  ;;  %v806_v17 = vpack.i.b16 %v805_v38, %v15155_v40  ;;  %v2692_v41 = vrot.slane %v2685_v24, %v11614_v10  ;;  %v794_v42 = vpack.i.b16 %v698_v49, %v15156_v15  ;;  %v15158_v16 = vld [vmem:[#allocation13_spill] sm:$0xff]  ;;  %4791 = vmatpush1.bf16.msra.mxu0 %v10522_v39 }
 0x188   :  { %v12321_v59 = vcombine.low %v2643_v51, %v2651_v5  ;;  %v797_v0 = vshrl.u32 %v698_v49, 16  ;;  %v1932_v45 = vrot.slane %v1918_v32, %v11611_v9  ;;  %v1933_v57 = vcombine.high %v1925_v35, %v15103_v44  ;;  %v15157_v51 = vld [vmem:[#allocation12_spill] sm:$0xff]  ;;  %4792 = vmatprep.subr.bf16.mxu0 %v10527_v58  ;;  %v10530_v39 = vld [vmem:[%s14994_s4 + $0x44] ss:$16 sps:$4 sm:$0xff]  }
 0x189   :  { %v2700_v56 = vrot.slane %v2693_v13, %v11614_v10  ;;  %v1967_v30 = vcombine.high %v806_v17, %v11608_v8  ;;  %v15159_v20 = vcombine.low %v15157_v51, %v15158_v16  ;;  %v10525_v5 = vld [vmem:[%s14994_s4 + $0x20] ss:$16 sps:$4 sm:$0xff]   ;;  %v1974_v24 = vrot.slane %v806_v17, %v11611_v9 }
 0x18a   :  { %v15160_v49 = vshrl.u32 %v15156_v15, 16  ;;  %v15161_v40 = vcombine.high %v15157_v51, %v15158_v16  ;;  %v1947_v27 = vrot.slane %v1933_v57, %v11614_v10  ;;  %v1948_v17 = vcombine.high %v1932_v45, %v15103_v44 }
 0x18b   :  { %v12336_v38 = vrot.slane %v15159_v20, %v11611_v9  ;;  %v2701_v13 = vcombine.low %v2692_v41, %v2700_v56  ;;  %v1940_v20 = vrot.slane %v1925_v35, %v11614_v10  ;;  %v1981_v41 = vrot.slane %v1967_v30, %v11611_v9  ;;  %4793 = vmatpush1.bf16.msra.mxu0 %v10525_v5  ;;  %v10528_v30 = vld [vmem:[%s14994_s4 + $0x40] ss:$16 sps:$4 sm:$0xff]  }
 0x18c   :  { %v798_v60 = vpack.i.b16 %v797_v0, %v15160_v49  ;;  %v2733_v32 = vrot.slane %v15161_v40, %v11611_v9  ;;  %v1982_v56 = vcombine.high %v1974_v24, %v15103_v44  ;;  %v3996_v15 = vshrl.u32 %v12321_v59, 16  ;;  %4794 = vmatprep.subr.bf16.mxu0 %v10530_v39 }
 0x18d   :  { %v3997_v0 = vshrl.u32 %v2701_v13, 16  ;;  %v1820_v51 = vcombine.high %v794_v42, %v11608_v8  ;;  %v12359_v58 = vrot.slane %v1932_v45, %v11614_v10  ;;  %v12362_v16 = vrot.slane %v1948_v17, %v11614_v10 }
 0x18e   :  { %v1997_v35 = vcombine.high %v1981_v41, %v15103_v44  ;;  %v3486_v57 = vcombine.low %v1940_v20, %v1947_v27  ;;  %v12369_v49 = vrot.slane %v1982_v56, %v11614_v10  ;;  %v9283_v40 = vcombine.high %v1940_v20, %v1947_v27  ;;  %v10542_v27 = vld [vmem:[%s14994_s4 + $0x64] ss:$16 sps:$4 sm:$0xff]  }
 0x18f   :  { %15162 = vst [vmem:[#allocation20_spill] sm:$0xff] %v12359_v58  ;;  %15163 = vst [vmem:[#allocation21_spill] sm:$0xff] %v12362_v16  ;;  %v3998_v54 = vpack.i.b16 %v3997_v0, %v3996_v15  ;;  %v1827_v37 = vrot.slane %v794_v42, %v11611_v9  ;;  %v12373_v45 = vrot.slane %v1974_v24, %v11614_v10  ;;  %4795 = vmatpush1.bf16.msra.mxu0 %v10528_v30  ;;  %v15171_v24 = vld [vmem:[#allocation18_spill] sm:$0xff]  ;;  %v10548_v42 = vld [vmem:[%s14994_s4 + $0x84] ss:$16 sps:$4 sm:$0xff]  }
 0x190   :  { %15164 = vst [vmem:[#allocation5_spill] sm:$0xff] %v12369_v49  ;;  %v12376_v17 = vrot.slane %v1981_v41, %v11614_v10  ;;  %v12379_v5 = vrot.slane %v1997_v35, %v11614_v10  ;;  %v12382_v4 = vrot.slane %v3486_v57, %v11611_v9  ;;  %v12388_v20 = vrot.slane %v9283_v40, %v11611_v9  ;;  %v10540_v40 = vld [vmem:[%s14994_s4 + $0x60] ss:$16 sps:$4 sm:$0xff]  }
 0x191   :  { %15165 = vst [vmem:[#allocation6_spill] sm:$0xff] %v12373_v45  ;;  %4136 = vmatprep.subr.bf16.mxu1 %v3998_v54  ;;  %v1834_v39 = vrot.slane %v1820_v51, %v11611_v9  ;;  %v1835_v0 = vcombine.high %v1827_v37, %v15103_v44  ;;  %v1842_v35 = vrot.slane %v1827_v37, %v11614_v10  ;;  %v15170_v41 = vld [vmem:[#allocation19_spill] sm:$0xff] }
 0x192   :  { %15166 = vst [vmem:[#allocation12_spill] sm:$0xff] %v12376_v17  ;;  %15167 = vst [vmem:[#allocation13_spill] sm:$0xff] %v12379_v5  ;;  %v1869_v54 = vcombine.high %v798_v60, %v11608_v8  ;;  %v1876_v51 = vrot.slane %v798_v60, %v11611_v9  ;;  %4796 = vmatprep.subr.bf16.mxu0 %v10542_v27  ;;  %v3994_v15 = vpack.i.b16 %v2701_v13, %v12321_v59 }
 0x193   :  { %15168 = vst [vmem:[#allocation49_spill] sm:$0xff] %v12382_v4  ;;  %15169 = vst [vmem:[#allocation50_spill] sm:$0xff] %v12388_v20  ;;  %v1850_v57 = vcombine.high %v1834_v39, %v15103_v44  ;;  %v1849_v56 = vrot.slane %v1835_v0, %v11614_v10  ;;  %v2734_v30 = vcombine.low %v15171_v24, %v15170_v41  ;;  %4797 = vmatpush1.bf16.msra.mxu0 %v10540_v40  ;;  %v10554_v40 = vld [vmem:[%s14994_s4 + $0xa4] ss:$16 sps:$4 sm:$0xff]  }
 0x194   :  { %v2742_v37 = vcombine.low %v12336_v38, %v2733_v32  ;;  %v12418_v60 = vrot.slane %v1834_v39, %v11614_v10  ;;  %v1883_v27 = vrot.slane %v1869_v54, %v11611_v9  ;;  %v1884_v0 = vcombine.high %v1876_v51, %v15103_v44  ;;  %4137 = vmatpush1.bf16.msra.mxu1 %v3994_v15  ;;  %v15176_v54 = vld [vmem:[#allocation16_spill] sm:$0xff] }
 0x195   :  { %v12421_v50 = vrot.slane %v1850_v57, %v11614_v10  ;;  %v3388_v59 = vcombine.low %v1842_v35, %v1849_v56  ;;  %v9279_v13 = vcombine.high %v1842_v35, %v1849_v56  ;;  %v2741_v24 = vrot.slane %v2734_v30, %v11614_v10  ;;  %v10546_v56 = vld [vmem:[%s14994_s4 + $0x80] ss:$16 sps:$4 sm:$0xff]   ;;  %4798 = vmatprep.subr.bf16.mxu0 %v10548_v42 }
 0x196   :  { %v2749_v38 = vrot.slane %v2742_v37, %v11614_v10  ;;  %v12430_v39 = vrot.slane %v1876_v51, %v11614_v10  ;;  %v12433_v41 = vrot.slane %v1884_v0, %v11614_v10  ;;  %v1899_v57 = vcombine.high %v1883_v27, %v15103_v44  ;;  %v15172_v0 = vld [vmem:[#allocation14_spill] sm:$0xff] }
 0x197   :  { %v12440_v15 = vrot.slane %v1883_v27, %v11614_v10  ;;  %v12443_v35 = vrot.slane %v3388_v59, %v11611_v9  ;;  %v12456_v37 = vrot.slane %v9279_v13, %v11611_v9  ;;  %v15173_v59 = vld [vmem:[#allocation15_spill] sm:$0xff]  ;;  %v15177_v13 = vld [vmem:[#allocation17_spill] sm:$0xff]  ;;  %4799 = vmatpush1.bf16.msra.mxu0 %v10546_v56  ;;  %v2832_v42 = vcombine.low %v11972_v31, %v11979_v7 }
 0x198   :  { %v12447_v51 = vcombine.low %v2741_v24, %v2749_v38  ;;  %v12453_v30 = vrot.slane %v1899_v57, %v11614_v10  ;;  %v15174_v32 = vcombine.low %v15172_v0, %v15173_v59  ;;  %v15175_v38 = vcombine.high %v15172_v0, %v15173_v59  ;;  %4800 = vmatprep.subr.bf16.mxu0 %v10554_v40  ;;  %v15189_v31 = vld [vmem:[#allocation29_spill] sm:$0xff] }
 0x199   :  { %v15178_v3 = vcombine.low %v15176_v54, %v15177_v13  ;;  %v15179_v27 = vcombine.high %v15176_v54, %v15177_v13  ;;  %v650_v0 = vadd.f32 %v12265_v22, %v11912_v1  ;;  %v653_v54 = vadd.f32 %v12265_v22, %v11929_v28 }
 0x19a   :  { %v2758_v24 = vrot.slane %v15174_v32, %v11611_v9  ;;  %v2766_v57 = vrot.slane %v15175_v38, %v11611_v9  ;;  %v4004_v49 = vshrl.u32 %v12447_v51, 16  ;;  %v15181_v1 = vcombine.high %v11941_v53, %v11935_v18 }
 0x19b   :  { %v2774_v5 = vrot.slane %v15178_v3, %v11611_v9  ;;  %v2782_v17 = vrot.slane %v15179_v27, %v11611_v9  ;;  %v10552_v3 = vld [vmem:[%s14994_s4 + $0xa0] ss:$16 sps:$4 sm:$0xff]   ;;  %v15180_v27 = vcombine.low %v11941_v53, %v11935_v18  ;;  %v701_v45 = vpack.c.bf16 %v653_v54, %v650_v0 }
 0x19c   :  { %v2783_v59 = vcombine.low %v2758_v24, %v2766_v57  ;;  %v2831_v56 = vrot.slane %v15181_v1, %v11611_v9  ;;  %v15182_v24 = vld [vmem:[#allocation32_spill] sm:$0xff]  ;;  %v15186_v18 = vld [vmem:[#allocation33_spill] sm:$0xff]  ;;  %v15187_v53 = vld [vmem:[#allocation35_spill] sm:$0xff]  ;;  %v642_v4 = vadd.f32 %v12265_v22, %v15189_v31  ;;  %4801 = vmatpush1.bf16.msra.mxu0 %v10552_v3 }
 0x19d   :  { %v2791_v38 = vcombine.low %v2774_v5, %v2782_v17  ;;  %v2823_v13 = vrot.slane %v15180_v27, %v11611_v9  ;;  %v15183_v17 = vld [vmem:[#allocation34_spill] sm:$0xff]  ;;  %v15188_v1 = vcombine.low %v15186_v18, %v15187_v53  ;;  %v821_v0 = vshrl.u32 %v701_v45, 16  ;;  %v15192_v54 = vld [vmem:[#allocation31_spill] sm:$0xff] }
 0x19e   :  { %v15184_v5 = vcombine.low %v15182_v24, %v15183_v17  ;;  %v15185_v28 = vcombine.high %v15182_v24, %v15183_v17  ;;  %v2790_v40 = vrot.slane %v2783_v59, %v11614_v10  ;;  %v645_v16 = vadd.f32 %v12265_v22, %v15192_v54  ;;  %v15194_v54 = vld [vmem:[#allocation8_spill] sm:$0xff] }
 0x19f   :  { %v2798_v27 = vrot.slane %v2791_v38, %v11614_v10  ;;  %v2872_v7 = vrot.slane %v15188_v1, %v11611_v9  ;;  %v2840_v20 = vcombine.low %v2823_v13, %v2831_v56  ;;  %v2839_v1 = vrot.slane %v2832_v42, %v11614_v10 }
 0x1a0   :  { %v2856_v57 = vrot.slane %v15184_v5, %v11611_v9  ;;  %v2864_v32 = vrot.slane %v15185_v28, %v11611_v9  ;;  %v15190_v5 = vcombine.high %v15186_v18, %v15187_v53  ;;  %v15191_v28 = vld [vmem:[#allocation7_spill] sm:$0xff]  ;;  %v700_v53 = vpack.c.bf16 %v645_v16, %v642_v4 }
 0x1a1   :  { %v2799_v59 = vcombine.low %v2790_v40, %v2798_v27  ;;  %v818_v38 = vpack.i.b16 %v701_v45, %v15191_v28  ;;  %v2847_v58 = vrot.slane %v2840_v20, %v11614_v10 }
 0x1a2   :  { %v2880_v24 = vrot.slane %v15190_v5, %v11611_v9  ;;  %v2881_v17 = vcombine.low %v2856_v57, %v2864_v32  ;;  %v15193_v32 = vshrl.u32 %v15191_v28, 16 }
 0x1a3   :  { %v4005_v31 = vshrl.u32 %v2799_v59, 16  ;;  %v4002_v18 = vpack.i.b16 %v2799_v59, %v12447_v51  ;;  %v2114_v57 = vcombine.high %v818_v38, %v11608_v8  ;;  %v2121_v45 = vrot.slane %v818_v38, %v11611_v9 }
 0x1a4   :  { %v2888_v13 = vrot.slane %v2881_v17, %v11614_v10  ;;  %v2889_v56 = vcombine.low %v2872_v7, %v2880_v24  ;;  %v822_v3 = vpack.i.b16 %v821_v0, %v15193_v32  ;;  %v2848_v40 = vcombine.low %v2839_v1, %v2847_v58 }
 0x1a5   :  { %v4006_v42 = vpack.i.b16 %v4005_v31, %v4004_v49  ;;  %v2128_v20 = vrot.slane %v2114_v57, %v11611_v9  ;;  %v2129_v24 = vcombine.high %v2121_v45, %v15103_v44  ;;  %v2136_v17 = vrot.slane %v2121_v45, %v11614_v10 }
 0x1a6   :  { %v2896_v27 = vrot.slane %v2889_v56, %v11614_v10  ;;  %v2163_v5 = vcombine.high %v822_v3, %v11608_v8  ;;  %v2170_v7 = vrot.slane %v822_v3, %v11611_v9  ;;  %v4012_v49 = vshrl.u32 %v2848_v40, 16 }
 0x1a7   :  { %4138 = vmatprep.subr.bf16.mxu1 %v4006_v42  ;;  %v2144_v58 = vcombine.high %v2128_v20, %v15103_v44  ;;  %v2143_v28 = vrot.slane %v2129_v24, %v11614_v10  ;;  %v12544_v38 = vrot.slane %v2128_v20, %v11614_v10  ;;  %v810_v1 = vpack.i.b16 %v700_v53, %v15194_v54 }
 0x1a8   :  { %v2897_v59 = vcombine.low %v2888_v13, %v2896_v27  ;;  %v2177_v4 = vrot.slane %v2163_v5, %v11611_v9  ;;  %v2178_v16 = vcombine.high %v2170_v7, %v15103_v44  ;;  %4139 = vmatpush1.bf16.msra.mxu1 %v4002_v18  ;;  %v12551_v13 = vrot.slane %v2170_v7, %v11614_v10  ;;  %v15200_v5 = vld [vmem:[#allocation23_spill] sm:$0xff]  ;;  %v15201_v7 = vld [vmem:[#allocation22_spill] sm:$0xff] }
 0x1a9   :  { %v12548_v56 = vrot.slane %v2144_v58, %v11614_v10  ;;  %v3682_v18 = vcombine.low %v2136_v17, %v2143_v28  ;;  %v9291_v3 = vcombine.high %v2136_v17, %v2143_v28  ;;  %v813_v45 = vshrl.u32 %v700_v53, 16  ;;  %v15208_v17 = vld [vmem:[#allocation28_spill] sm:$0xff] }
 0x1aa   :  { %v4013_v0 = vshrl.u32 %v2897_v59, 16  ;;  %15196 = vst [vmem:[#allocation18_spill] sm:$0xff] %v12551_v13  ;;  %v12554_v31 = vrot.slane %v2178_v16, %v11614_v10  ;;  %v2193_v32 = vcombine.high %v2177_v4, %v15103_v44  ;;  %v12558_v27 = vrot.slane %v2177_v4, %v11614_v10 }
 0x1ab   :  { %15195 = vst [vmem:[#allocation19_spill] sm:$0xff] %v12548_v56  ;;  %v15202_v24 = vcombine.low %v15200_v5, %v15201_v7  ;;  %v12570_v16 = vrot.slane %v3682_v18, %v11611_v9  ;;  %v15204_v4 = vshrl.u32 %v15194_v54, 16  ;;  %v12579_v28 = vrot.slane %v9291_v3, %v11611_v9  ;;  %v15210_v3 = vld [vmem:[#allocation24_spill] sm:$0xff] }
 0x1ac   :  { %15197 = vst [vmem:[#allocation14_spill] sm:$0xff] %v12554_v31  ;;  %v4014_v57 = vpack.i.b16 %v4013_v0, %v4012_v49  ;;  %15198 = vst [vmem:[#allocation15_spill] sm:$0xff] %v12558_v27  ;;  %v12561_v42 = vrot.slane %v2193_v32, %v11614_v10  ;;  %v2016_v32 = vcombine.high %v810_v1, %v11608_v8  ;;  %v15207_v0 = vld [vmem:[#allocation30_spill] sm:$0xff]  ;;  %v15217_v31 = vld [vmem:[#allocation36_spill] sm:$0xff] }
 0x1ad   :  { %v2921_v58 = vrot.slane %v15202_v24, %v11611_v9  ;;  %15203 = vst [vmem:[#allocation17_spill] sm:$0xff] %v12570_v16  ;;  %v814_v49 = vpack.i.b16 %v813_v45, %v15204_v4  ;;  %15205 = vst [vmem:[#allocation32_spill] sm:$0xff] %v12579_v28  ;;  %v2023_v18 = vrot.slane %v810_v1, %v11611_v9 }
 0x1ae   :  { %15199 = vst [vmem:[#allocation16_spill] sm:$0xff] %v12561_v42  ;;  %4140 = vmatprep.subr.bf16.mxu1 %v4014_v57  ;;  %v4010_v20 = vpack.i.b16 %v2897_v59, %v2848_v40  ;;  %v15206_v54 = vcombine.high %v15200_v5, %v15201_v7  ;;  %v2030_v45 = vrot.slane %v2016_v32, %v11611_v9 }
 0x1af   :  { %v2065_v24 = vcombine.high %v814_v49, %v11608_v8  ;;  %v2072_v53 = vrot.slane %v814_v49, %v11611_v9  ;;  %v2031_v4 = vcombine.high %v2023_v18, %v15103_v44  ;;  %v2930_v1 = vcombine.low %v15208_v17, %v15207_v0 }
 0x1b0   :  { %v2929_v57 = vrot.slane %v15206_v54, %v11611_v9  ;;  %4141 = vmatpush1.bf16.msra.mxu1 %v4010_v20  ;;  %v2038_v7 = vrot.slane %v2023_v18, %v11614_v10  ;;  %v2046_v32 = vcombine.high %v2030_v45, %v15103_v44  ;;  %v12614_v20 = vrot.slane %v2030_v45, %v11614_v10 }
 0x1b1   :  { %v2079_v40 = vrot.slane %v2065_v24, %v11611_v9  ;;  %v2080_v59 = vcombine.high %v2072_v53, %v15103_v44  ;;  %v2045_v49 = vrot.slane %v2031_v4, %v11614_v10  ;;  %v12605_v54 = vrot.slane %v2072_v53, %v11614_v10 }
 0x1b2   :  { %v2938_v5 = vcombine.low %v2921_v58, %v2929_v57  ;;  %v2937_v24 = vrot.slane %v2930_v1, %v11614_v10  ;;  %v12617_v58 = vrot.slane %v2046_v32, %v11614_v10  ;;  %v15209_v1 = vld [vmem:[#allocation25_spill] sm:$0xff]  ;;  %v666_v13 = vadd.f32 %v12265_v22, %v15217_v31 }
 0x1b3   :  { %v12608_v17 = vrot.slane %v2080_v59, %v11614_v10  ;;  %v2095_v0 = vcombine.high %v2079_v40, %v15103_v44  ;;  %v3584_v18 = vcombine.low %v2038_v7, %v2045_v49  ;;  %v9287_v57 = vcombine.high %v2038_v7, %v2045_v49 }
 0x1b4   :  { %v2945_v51 = vrot.slane %v2938_v5, %v11614_v10  ;;  %v12620_v53 = vrot.slane %v2079_v40, %v11614_v10  ;;  %v15211_v5 = vcombine.low %v15209_v1, %v15210_v3  ;;  %v15220_v40 = vcombine.high %v12052_v63, %v12055_v12 }
 0x1b5   :  { %v12623_v4 = vrot.slane %v2095_v0, %v11614_v10  ;;  %v12632_v45 = vrot.slane %v3584_v18, %v11611_v9  ;;  %v12635_v32 = vrot.slane %v9287_v57, %v11611_v9  ;;  %v15212_v0 = vcombine.high %v15209_v1, %v15210_v3  ;;  %v15213_v18 = vld [vmem:[#allocation26_spill] sm:$0xff]  ;;  %v15214_v57 = vld [vmem:[#allocation27_spill] sm:$0xff] }
 0x1b6   :  { %v12625_v59 = vcombine.low %v2937_v24, %v2945_v51  ;;  %v2954_v42 = vrot.slane %v15211_v5, %v11611_v9  ;;  %v15215_v5 = vcombine.low %v15213_v18, %v15214_v57  ;;  %v15216_v7 = vcombine.high %v15213_v18, %v15214_v57  ;;  %v15218_v1 = vld [vmem:[#allocation38_spill] sm:$0xff] }
 0x1b7   :  { %v2962_v24 = vrot.slane %v15212_v0, %v11611_v9  ;;  %v669_v0 = vadd.f32 %v12265_v22, %v15218_v1  ;;  %v3027_v18 = vrot.slane %v15220_v40, %v11611_v9  ;;  %v3028_v57 = vcombine.low %v12086_v14, %v12106_v11 }
 0x1b8   :  { %v2970_v27 = vrot.slane %v15215_v5, %v11611_v9  ;;  %v2978_v51 = vrot.slane %v15216_v7, %v11611_v9  ;;  %v4020_v49 = vshrl.u32 %v12625_v59, 16  ;;  %v15219_v5 = vcombine.low %v12052_v63, %v12055_v12 }
 0x1b9   :  { %v2979_v3 = vcombine.low %v2954_v42, %v2962_v24  ;;  %v15221_v31 = vcombine.low %v12082_v61, %v12089_v25  ;;  %v15222_v24 = vcombine.high %v12082_v61, %v12089_v25  ;;  %v703_v28 = vpack.c.bf16 %v669_v0, %v666_v13  ;;  %v15225_v25 = vld [vmem:[#allocation9_spill] sm:$0xff] }
 0x1ba   :  { %v3019_v16 = vrot.slane %v15219_v5, %v11611_v9  ;;  %v2987_v7 = vcombine.low %v2970_v27, %v2978_v51  ;;  %v15223_v63 = vcombine.low %v12092_v62, %v12097_v47  ;;  %v3035_v11 = vrot.slane %v3028_v57, %v11614_v10 }
 0x1bb   :  { %v3052_v42 = vrot.slane %v15221_v31, %v11611_v9  ;;  %v3060_v1 = vrot.slane %v15222_v24, %v11611_v9  ;;  %v2986_v5 = vrot.slane %v2979_v3, %v11614_v10  ;;  %v15224_v27 = vcombine.high %v12092_v62, %v12097_v47  ;;  %v15227_v31 = vld [vmem:[#allocation37_spill] sm:$0xff] }
 0x1bc   :  { %v3036_v56 = vcombine.low %v3019_v16, %v3027_v18  ;;  %v3068_v12 = vrot.slane %v15223_v63, %v11611_v9  ;;  %v2994_v14 = vrot.slane %v2987_v7, %v11614_v10  ;;  %v834_v51 = vpack.i.b16 %v703_v28, %v15225_v25  ;;  %v15226_v16 = vld [vmem:[#allocation39_spill] sm:$0xff] }
 0x1bd   :  { %v3076_v40 = vrot.slane %v15224_v27, %v11611_v9  ;;  %v3077_v61 = vcombine.low %v3052_v42, %v3060_v1  ;;  %v837_v3 = vshrl.u32 %v703_v28, 16  ;;  %v661_v0 = vadd.f32 %v12265_v22, %v15226_v16 }
 0x1be   :  { %v3043_v13 = vrot.slane %v3036_v56, %v11614_v10  ;;  %v2995_v18 = vcombine.low %v2986_v5, %v2994_v14  ;;  %v658_v7 = vadd.f32 %v12265_v22, %v15227_v31  ;;  %v15228_v63 = vshrl.u32 %v15225_v25, 16 }
 0x1bf   :  { %v3084_v57 = vrot.slane %v3077_v61, %v11614_v10  ;;  %v3085_v24 = vcombine.low %v3068_v12, %v3076_v40  ;;  %v2310_v62 = vcombine.high %v834_v51, %v11608_v8  ;;  %v2317_v42 = vrot.slane %v834_v51, %v11611_v9 }
 0x1c0   :  { %v838_v47 = vpack.i.b16 %v837_v3, %v15228_v63  ;;  %v3044_v28 = vcombine.low %v3035_v11, %v3043_v13  ;;  %v4021_v1 = vshrl.u32 %v2995_v18, 16  ;;  %v4018_v56 = vpack.i.b16 %v2995_v18, %v12625_v59  ;;  %v15229_v11 = vld [vmem:[#allocation40_spill] sm:$0xff]  ;;  %v15230_v3 = vld [vmem:[#allocation41_spill] sm:$0xff]  ;;  %v15232_v63 = vld [vmem:[#allocation10_spill] sm:$0xff] }
 0x1c1   :  { %v3092_v27 = vrot.slane %v3085_v24, %v11614_v10  ;;  %v702_v5 = vpack.c.bf16 %v661_v0, %v658_v7  ;;  %v2324_v14 = vrot.slane %v2310_v62, %v11611_v9  ;;  %v2325_v12 = vcombine.high %v2317_v42, %v15103_v44 }
 0x1c2   :  { %v2359_v40 = vcombine.high %v838_v47, %v11608_v8  ;;  %v4022_v61 = vpack.i.b16 %v4021_v1, %v4020_v49  ;;  %v2366_v25 = vrot.slane %v838_v47, %v11611_v9  ;;  %v15231_v59 = vcombine.low %v15229_v11, %v15230_v3 }
 0x1c3   :  { %v3093_v51 = vcombine.low %v3084_v57, %v3092_v27  ;;  %v2332_v16 = vrot.slane %v2317_v42, %v11614_v10  ;;  %v2339_v0 = vrot.slane %v2325_v12, %v11614_v10  ;;  %v2340_v18 = vcombine.high %v2324_v14, %v15103_v44 }
 0x1c4   :  { %v3117_v13 = vrot.slane %v15231_v59, %v11611_v9  ;;  %v2373_v31 = vrot.slane %v2359_v40, %v11611_v9  ;;  %4142 = vmatprep.subr.bf16.mxu1 %v4022_v61  ;;  %v2374_v7 = vcombine.high %v2366_v25, %v15103_v44  ;;  %v4028_v49 = vshrl.u32 %v3044_v28, 16 }
 0x1c5   :  { %v4029_v24 = vshrl.u32 %v3093_v51, 16  ;;  %v826_v57 = vpack.i.b16 %v702_v5, %v15232_v63  ;;  %4143 = vmatpush1.bf16.msra.mxu1 %v4018_v56  ;;  %v12723_v47 = vrot.slane %v2324_v14, %v11614_v10  ;;  %v12726_v62 = vrot.slane %v2340_v18, %v11614_v10 }
 0x1c6   :  { %v2389_v42 = vcombine.high %v2373_v31, %v15103_v44  ;;  %v3878_v1 = vcombine.low %v2332_v16, %v2339_v0  ;;  %v12730_v27 = vrot.slane %v2374_v7, %v11614_v10  ;;  %v9299_v12 = vcombine.high %v2332_v16, %v2339_v0 }
 0x1c7   :  { %v4030_v40 = vpack.i.b16 %v4029_v24, %v4028_v49  ;;  %v829_v61 = vshrl.u32 %v702_v5, 16  ;;  %v12733_v59 = vrot.slane %v2366_v25, %v11614_v10  ;;  %v12736_v56 = vrot.slane %v2373_v31, %v11614_v10  ;;  %v15238_v31 = vld [vmem:[#allocation47_spill] sm:$0xff]  ;;  %v15239_v5 = vld [vmem:[#allocation46_spill] sm:$0xff] }
 0x1c8   :  { %15233 = vst [vmem:[#allocation34_spill] sm:$0xff] %v12730_v27  ;;  %v12739_v14 = vrot.slane %v2389_v42, %v11614_v10  ;;  %v12742_v18 = vrot.slane %v3878_v1, %v11611_v9  ;;  %v12745_v22 = vrot.slane %v9299_v12, %v11611_v9  ;;  %v15236_v25 = vshrl.u32 %v15232_v63, 16 }
 0x1c9   :  { %4144 = vmatprep.subr.bf16.mxu1 %v4030_v40  ;;  %v2212_v49 = vcombine.high %v826_v57, %v11608_v8  ;;  %v2219_v24 = vrot.slane %v826_v57, %v11611_v9  ;;  %v4026_v12 = vpack.i.b16 %v3093_v51, %v3044_v28  ;;  %v15237_v63 = vcombine.high %v15229_v11, %v15230_v3 }
 0x1ca   :  { %15234 = vst [vmem:[#allocation33_spill] sm:$0xff] %v12742_v18  ;;  %15235 = vst [vmem:[#allocation35_spill] sm:$0xff] %v12745_v22  ;;  %v830_v0 = vpack.i.b16 %v829_v61, %v15236_v25  ;;  %v3126_v57 = vcombine.low %v15239_v5, %v15238_v31  ;;  %v15241_v61 = vld [vmem:[#allocation43_spill] sm:$0xff] }
 0x1cb   :  { %v3125_v40 = vrot.slane %v15237_v63, %v11611_v9  ;;  %v2226_v25 = vrot.slane %v2212_v49, %v11611_v9  ;;  %v2227_v7 = vcombine.high %v2219_v24, %v15103_v44  ;;  %4145 = vmatpush1.bf16.msra.mxu1 %v4026_v12 }
 0x1cc   :  { %v2261_v42 = vcombine.high %v830_v0, %v11608_v8  ;;  %v2268_v1 = vrot.slane %v830_v0, %v11611_v9  ;;  %v2234_v8 = vrot.slane %v2219_v24, %v11614_v10  ;;  %v3133_v24 = vrot.slane %v3126_v57, %v11614_v10  ;;  %v15240_v57 = vld [vmem:[#allocation42_spill] sm:$0xff] }
 0x1cd   :  { %v3134_v51 = vcombine.low %v3117_v13, %v3125_v40  ;;  %v2241_v11 = vrot.slane %v2227_v7, %v11614_v10  ;;  %v2242_v3 = vcombine.high %v2226_v25, %v15103_v44  ;;  %v12777_v63 = vrot.slane %v2226_v25, %v11614_v10 }
 0x1ce   :  { %v2275_v0 = vrot.slane %v2261_v42, %v11611_v9  ;;  %v2276_v28 = vcombine.high %v2268_v1, %v15103_v44  ;;  %v12780_v49 = vrot.slane %v2268_v1, %v11614_v10 }
 0x1cf   :  { %v3141_v42 = vrot.slane %v3134_v51, %v11614_v10  ;;  %v12789_v13 = vrot.slane %v2242_v3, %v11614_v10  ;;  %v3780_v12 = vcombine.low %v2234_v8, %v2241_v11  ;;  %v9295_v40 = vcombine.high %v2234_v8, %v2241_v11 }
 0x1d0   :  { %v12783_v5 = vrot.slane %v2276_v28, %v11614_v10  ;;  %v2291_v31 = vcombine.high %v2275_v0, %v15103_v44  ;;  %v12792_v7 = vrot.slane %v2275_v0, %v11614_v10  ;;  %v15242_v51 = vcombine.low %v15240_v57, %v15241_v61 }
 0x1d1   :  { %v12799_v28 = vcombine.low %v3133_v24, %v3141_v42  ;;  %v12806_v3 = vrot.slane %v3780_v12, %v11611_v9  ;;  %v12809_v0 = vrot.slane %v9295_v40, %v11611_v9  ;;  %v15243_v42 = vcombine.high %v15240_v57, %v15241_v61  ;;  %v15244_v40 = vld [vmem:[#allocation44_spill] sm:$0xff] }
 0x1d2   :  { %v12795_v1 = vrot.slane %v2291_v31, %v11614_v10  ;;  %v3150_v16 = vrot.slane %v15242_v51, %v11611_v9  ;;  %v15245_v51 = vld [vmem:[#allocation45_spill] sm:$0xff]  ;;  %v15248_v24 = vcombine.low %v12237_v36, %v12234_v48  ;;  %v15249_v61 = vcombine.high %v12237_v36, %v12234_v48 }
 0x1d3   :  { %v3158_v12 = vrot.slane %v15243_v42, %v11611_v9  ;;  %v15246_v25 = vcombine.low %v15244_v40, %v15245_v51  ;;  %v15247_v11 = vcombine.high %v15244_v40, %v15245_v51  ;;  %v4036_v31 = vshrl.u32 %v12799_v28, 16 }
 0x1d4   :  { %v3215_v18 = vrot.slane %v15248_v24, %v11611_v9  ;;  %v3223_v57 = vrot.slane %v15249_v61, %v11611_v9  ;;  %v15251_v51 = vcombine.high %v12244_v21, %v12240_v43  ;;  %v15252_v48 = vcombine.low %v12247_v29, %v12256_v19 }
 0x1d5   :  { %v3166_v44 = vrot.slane %v15246_v25, %v11611_v9  ;;  %v3174_v8 = vrot.slane %v15247_v11, %v11611_v9  ;;  %v3175_v42 = vcombine.low %v3150_v16, %v3158_v12  ;;  %v3224_v25 = vcombine.low %v12250_v26, %v12253_v2 }
 0x1d6   :  { %v15250_v11 = vcombine.low %v12244_v21, %v12240_v43  ;;  %v3256_v22 = vrot.slane %v15251_v51, %v11611_v9  ;;  %v3232_v27 = vcombine.low %v3215_v18, %v3223_v57  ;;  %v3264_v36 = vrot.slane %v15252_v48, %v11611_v9 }
 0x1d7   :  { %v3183_v24 = vcombine.low %v3166_v44, %v3174_v8  ;;  %v15253_v26 = vcombine.high %v12247_v29, %v12256_v19  ;;  %v3182_v16 = vrot.slane %v3175_v42, %v11614_v10  ;;  %v3231_v12 = vrot.slane %v3224_v25, %v11614_v10 }
 0x1d8   :  { %v3248_v40 = vrot.slane %v15250_v11, %v11611_v9  ;;  %v15254_v44 = vcombine.low %v12129_v6, %v12132_v34  ;;  %v3239_v18 = vrot.slane %v3232_v27, %v11614_v10  ;;  %v15255_v29 = vcombine.high %v12129_v6, %v12132_v34 }
 0x1d9   :  { %v3272_v2 = vrot.slane %v15253_v26, %v11611_v9  ;;  %v3190_v21 = vrot.slane %v3183_v24, %v11614_v10  ;;  %v15256_v42 = vcombine.low %v12138_v46, %v12141_v52  ;;  %v15257_v27 = vcombine.high %v12138_v46, %v12141_v52 }
 0x1da   :  { %v3273_v61 = vcombine.low %v3248_v40, %v3256_v22  ;;  %v3313_v43 = vrot.slane %v15254_v44, %v11611_v9  ;;  %v3321_v19 = vrot.slane %v15255_v29, %v11611_v9  ;;  %v3322_v22 = vcombine.low %v12147_v33, %v12159_v55  ;;  %v15258_v33 = vld [vmem:[#allocation48_spill] sm:$0xff] }
 0x1db   :  { %v3281_v8 = vcombine.low %v3264_v36, %v3272_v2  ;;  %v3346_v25 = vrot.slane %v15256_v42, %v11611_v9  ;;  %v3354_v11 = vrot.slane %v15257_v27, %v11611_v9  ;;  %v3191_v40 = vcombine.low %v3182_v16, %v3190_v21 }
 0x1dc   :  { %v3280_v57 = vrot.slane %v3273_v61, %v11614_v10  ;;  %v3240_v51 = vcombine.low %v3231_v12, %v3239_v18  ;;  %v3330_v34 = vcombine.low %v3313_v43, %v3321_v19  ;;  %v3329_v24 = vrot.slane %v3322_v22, %v11614_v10 }
 0x1dd   :  { %v3288_v6 = vrot.slane %v3281_v8, %v11614_v10  ;;  %v15259_v55 = vcombine.low %v12144_v23, %v15258_v33  ;;  %v15260_v36 = vcombine.high %v12144_v23, %v15258_v33  ;;  %v3371_v2 = vcombine.low %v3346_v25, %v3354_v11 }
 0x1de   :  { %v4037_v46 = vshrl.u32 %v3191_v40, 16  ;;  %v4034_v52 = vpack.i.b16 %v3191_v40, %v12799_v28  ;;  %v4044_v12 = vshrl.u32 %v3240_v51, 16  ;;  %v3337_v61 = vrot.slane %v3330_v34, %v11614_v10 }
 0x1df   :  { %v3362_v48 = vrot.slane %v15259_v55, %v11611_v9  ;;  %v3370_v26 = vrot.slane %v15260_v36, %v11611_v9  ;;  %v3289_v16 = vcombine.low %v3280_v57, %v3288_v6  ;;  %v3378_v44 = vrot.slane %v3371_v2, %v11614_v10  ;;  %v15268_v55 = vld [vmem:[#allocation21_spill] sm:$0xff] }
 0x1e0   :  { %v15261_v21 = vcombine.low %v12418_v60, %v12421_v50  ;;  %v4038_v8 = vpack.i.b16 %v4037_v46, %v4036_v31  ;;  %v15262_v19 = vcombine.high %v12418_v60, %v12421_v50  ;;  %v3338_v57 = vcombine.low %v3329_v24, %v3337_v61 }
 0x1e1   :  { %v3379_v43 = vcombine.low %v3362_v48, %v3370_v26  ;;  %v4045_v29 = vshrl.u32 %v3289_v16, 16  ;;  %v4042_v23 = vpack.i.b16 %v3289_v16, %v3240_v51  ;;  %v3420_v42 = vcombine.low %v12443_v35, %v12456_v37 }
 0x1e2   :  { %v3411_v18 = vrot.slane %v15261_v21, %v11611_v9  ;;  %v3419_v28 = vrot.slane %v15262_v19, %v11611_v9  ;;  %v15263_v25 = vcombine.low %v12430_v39, %v12433_v41  ;;  %4146 = vmatprep.subr.bf16.mxu1 %v4038_v8  ;;  %v15264_v40 = vcombine.high %v12430_v39, %v12433_v41  ;;  %v15267_v41 = vld [vmem:[#allocation20_spill] sm:$0xff]  ;;  %v15273_v21 = vld [vmem:[#allocation6_spill] sm:$0xff] }
 0x1e3   :  { %v3386_v22 = vrot.slane %v3379_v43, %v11614_v10  ;;  %v4046_v31 = vpack.i.b16 %v4045_v29, %v4044_v12  ;;  %v15265_v60 = vcombine.low %v12440_v15, %v12453_v30  ;;  %4147 = vmatpush1.bf16.msra.mxu1 %v4034_v52  ;;  %v4052_v37 = vshrl.u32 %v3338_v57, 16  ;;  %v15271_v12 = vld [vmem:[#allocation50_spill] sm:$0xff] }
 0x1e4   :  { %v3444_v27 = vrot.slane %v15263_v25, %v11611_v9  ;;  %v3428_v11 = vcombine.low %v3411_v18, %v3419_v28  ;;  %v3452_v50 = vrot.slane %v15264_v40, %v11611_v9  ;;  %v3427_v6 = vrot.slane %v3420_v42, %v11614_v10  ;;  %v15274_v18 = vld [vmem:[#allocation5_spill] sm:$0xff] }
 0x1e5   :  { %v3460_v51 = vrot.slane %v15265_v60, %v11611_v9  ;;  %v3387_v35 = vcombine.low %v3378_v44, %v3386_v22  ;;  %v15266_v34 = vcombine.high %v12440_v15, %v12453_v30  ;;  %4148 = vmatprep.subr.bf16.mxu1 %v4046_v31  ;;  %v15269_v48 = vcombine.low %v15267_v41, %v15268_v55  ;;  %v15272_v15 = vld [vmem:[#allocation49_spill] sm:$0xff]  ;;  %v15277_v31 = vld [vmem:[#allocation12_spill] sm:$0xff] }
 0x1e6   :  { %v3435_v33 = vrot.slane %v3428_v11, %v11614_v10  ;;  %v3469_v39 = vcombine.low %v3444_v27, %v3452_v50  ;;  %v15270_v26 = vcombine.high %v15267_v41, %v15268_v55  ;;  %v3518_v30 = vcombine.low %v15272_v15, %v15271_v12  ;;  %v15278_v11 = vld [vmem:[#allocation13_spill] sm:$0xff] }
 0x1e7   :  { %v3468_v24 = vrot.slane %v15266_v34, %v11611_v9  ;;  %v3509_v36 = vrot.slane %v15269_v48, %v11611_v9  ;;  %v4053_v46 = vshrl.u32 %v3387_v35, 16  ;;  %v4050_v52 = vpack.i.b16 %v3387_v35, %v3338_v57  ;;  %4149 = vmatpush1.bf16.msra.mxu1 %v4042_v23 }
 0x1e8   :  { %v3517_v2 = vrot.slane %v15270_v26, %v11611_v9  ;;  %v9298_v61 = vcombine.high %v12792_v7, %v12795_v1  ;;  %v3436_v44 = vcombine.low %v3427_v6, %v3435_v33  ;;  %v15275_v8 = vcombine.low %v15273_v21, %v15274_v18 }
 0x1e9   :  { %v3477_v16 = vcombine.low %v3460_v51, %v3468_v24  ;;  %v4054_v19 = vpack.i.b16 %v4053_v46, %v4052_v37  ;;  %v3476_v28 = vrot.slane %v3469_v39, %v11614_v10  ;;  %v15276_v22 = vcombine.high %v15273_v21, %v15274_v18 }
 0x1ea   :  { %v3526_v43 = vcombine.low %v3509_v36, %v3517_v2  ;;  %v3542_v29 = vrot.slane %v15275_v8, %v11611_v9  ;;  %v3525_v25 = vrot.slane %v3518_v30, %v11614_v10  ;;  %v15279_v40 = vcombine.low %v15277_v31, %v15278_v11  ;;  %v15287_v8 = vld [vmem:[#allocation19_spill] sm:$0xff] }
 0x1eb   :  { %v3484_v57 = vrot.slane %v3477_v16, %v11614_v10  ;;  %v3550_v42 = vrot.slane %v15276_v22, %v11611_v9  ;;  %v15280_v23 = vcombine.high %v15277_v31, %v15278_v11  ;;  %4150 = vmatprep.subr.bf16.mxu1 %v4054_v19  ;;  %v15281_v37 = vcombine.low %v12614_v20, %v12617_v58  ;;  %v15290_v22 = vld [vmem:[#allocation32_spill] sm:$0xff] }
 0x1ec   :  { %v3533_v27 = vrot.slane %v3526_v43, %v11614_v10  ;;  %v3558_v50 = vrot.slane %v15279_v40, %v11611_v9  ;;  %v15282_v34 = vcombine.high %v12614_v20, %v12617_v58  ;;  %v4060_v33 = vshrl.u32 %v3436_v44, 16  ;;  %4151 = vmatpush1.bf16.msra.mxu1 %v4050_v52 }
 0x1ed   :  { %v3566_v60 = vrot.slane %v15280_v23, %v11611_v9  ;;  %v3485_v51 = vcombine.low %v3476_v28, %v3484_v57  ;;  %v3567_v35 = vcombine.low %v3542_v29, %v3550_v42  ;;  %v3607_v6 = vrot.slane %v15281_v37, %v11611_v9  ;;  %v15291_v42 = vld [vmem:[#allocation17_spill] sm:$0xff] }
 0x1ee   :  { %v3615_v24 = vrot.slane %v15282_v34, %v11611_v9  ;;  %v3616_v41 = vcombine.low %v12632_v45, %v12635_v32  ;;  %v15283_v55 = vcombine.low %v12605_v54, %v12608_v17  ;;  %v3534_v2 = vcombine.low %v3525_v25, %v3533_v27 }
 0x1ef   :  { %v3575_v39 = vcombine.low %v3558_v50, %v3566_v60  ;;  %v4061_v36 = vshrl.u32 %v3485_v51, 16  ;;  %v4058_v26 = vpack.i.b16 %v3485_v51, %v3436_v44  ;;  %v3574_v16 = vrot.slane %v3567_v35, %v11614_v10 }
 0x1f0   :  { %v3640_v48 = vrot.slane %v15283_v55, %v11611_v9  ;;  %v3624_v46 = vcombine.low %v3607_v6, %v3615_v24  ;;  %v3623_v58 = vrot.slane %v3616_v41, %v11614_v10  ;;  %v15284_v45 = vcombine.high %v12605_v54, %v12608_v17  ;;  %v15296_v24 = vld [vmem:[#allocation15_spill] sm:$0xff] }
 0x1f1   :  { %v3582_v20 = vrot.slane %v3575_v39, %v11614_v10  ;;  %v4062_v12 = vpack.i.b16 %v4061_v36, %v4060_v33  ;;  %v15285_v52 = vcombine.low %v12620_v53, %v12623_v4  ;;  %v15286_v44 = vcombine.high %v12620_v53, %v12623_v4  ;;  %v15292_v53 = vld [vmem:[#allocation18_spill] sm:$0xff]  ;;  %v15297_v33 = vld [vmem:[#allocation16_spill] sm:$0xff] }
 0x1f2   :  { %v3648_v32 = vrot.slane %v15284_v45, %v11611_v9  ;;  %v3631_v15 = vrot.slane %v3624_v46, %v11614_v10  ;;  %v15288_v54 = vcombine.low %v12544_v38, %v15287_v8  ;;  %v15289_v29 = vcombine.high %v12544_v38, %v15287_v8  ;;  %v15293_v4 = vld [vmem:[#allocation14_spill] sm:$0xff] }
 0x1f3   :  { %v3656_v30 = vrot.slane %v15285_v52, %v11611_v9  ;;  %v3664_v43 = vrot.slane %v15286_v44, %v11611_v9  ;;  %v3583_v21 = vcombine.low %v3574_v16, %v3582_v20  ;;  %4152 = vmatprep.subr.bf16.mxu1 %v4062_v12  ;;  %v4068_v28 = vshrl.u32 %v3534_v2, 16 }
 0x1f4   :  { %v3665_v18 = vcombine.low %v3640_v48, %v3648_v32  ;;  %v3705_v17 = vrot.slane %v15288_v54, %v11611_v9  ;;  %v3713_v19 = vrot.slane %v15289_v29, %v11611_v9  ;;  %v3714_v25 = vcombine.low %v15291_v42, %v15290_v22  ;;  %4153 = vmatpush1.bf16.msra.mxu1 %v4058_v26 }
 0x1f5   :  { %v3673_v57 = vcombine.low %v3656_v30, %v3664_v43  ;;  %v15294_v27 = vcombine.low %v15292_v53, %v15293_v4  ;;  %v4069_v11 = vshrl.u32 %v3583_v21, 16  ;;  %v4066_v40 = vpack.i.b16 %v3583_v21, %v3534_v2 }
 0x1f6   :  { %v3632_v50 = vcombine.low %v3623_v58, %v3631_v15  ;;  %v3722_v23 = vcombine.low %v3705_v17, %v3713_v19  ;;  %v3672_v60 = vrot.slane %v3665_v18, %v11614_v10  ;;  %v3721_v51 = vrot.slane %v3714_v25, %v11614_v10 }
 0x1f7   :  { %v3738_v31 = vrot.slane %v15294_v27, %v11611_v9  ;;  %v3680_v38 = vrot.slane %v3673_v57, %v11614_v10  ;;  %v15295_v35 = vcombine.high %v15292_v53, %v15293_v4  ;;  %v4070_v6 = vpack.i.b16 %v4069_v11, %v4068_v28  ;;  %v15310_v11 = vld [vmem:[#allocation33_spill] sm:$0xff] }
 0x1f8   :  { %v3729_v34 = vrot.slane %v3722_v23, %v11614_v10  ;;  %v15298_v39 = vcombine.low %v15296_v24, %v15297_v33  ;;  %v15299_v55 = vcombine.high %v15296_v24, %v15297_v33  ;;  %v15300_v2 = vcombine.low %v12777_v63, %v12789_v13 }
 0x1f9   :  { %v3746_v37 = vrot.slane %v15295_v35, %v11611_v9  ;;  %v3681_v36 = vcombine.low %v3672_v60, %v3680_v38  ;;  %v15301_v16 = vcombine.high %v12777_v63, %v12789_v13  ;;  %4154 = vmatprep.subr.bf16.mxu1 %v4070_v6  ;;  %v4076_v58 = vshrl.u32 %v3632_v50, 16 }
 0x1fa   :  { %v3754_v41 = vrot.slane %v15298_v39, %v11611_v9  ;;  %v3762_v48 = vrot.slane %v15299_v55, %v11611_v9  ;;  %v3803_v46 = vrot.slane %v15300_v2, %v11611_v9  ;;  %v3730_v45 = vcombine.low %v3721_v51, %v3729_v34  ;;  %4155 = vmatpush1.bf16.msra.mxu1 %v4066_v40 }
 0x1fb   :  { %v3763_v26 = vcombine.low %v3738_v31, %v3746_v37  ;;  %v3811_v20 = vrot.slane %v15301_v16, %v11611_v9  ;;  %v15302_v12 = vcombine.low %v12780_v49, %v12783_v5  ;;  %v4077_v52 = vshrl.u32 %v3681_v36, 16  ;;  %v15309_v31 = vld [vmem:[#allocation35_spill] sm:$0xff] }
 0x1fc   :  { %v3771_v32 = vcombine.low %v3754_v41, %v3762_v48  ;;  %v4074_v30 = vpack.i.b16 %v3681_v36, %v3632_v50  ;;  %v3812_v44 = vcombine.low %v12806_v3, %v12809_v0  ;;  %v9302_v63 = vcombine.high %v12736_v56, %v12739_v14 }
 0x1fd   :  { %v3836_v15 = vrot.slane %v15302_v12, %v11611_v9  ;;  %v3820_v43 = vcombine.low %v3803_v46, %v3811_v20  ;;  %v3770_v13 = vrot.slane %v3763_v26, %v11614_v10  ;;  %v15303_v18 = vcombine.high %v12780_v49, %v12783_v5  ;;  %v10531_v12 = vld [vmem:[%s14994_s4 + $0x100] ss:$16 sps:$4 sm:$0xff]  }
 0x1fe   :  { %v3778_v21 = vrot.slane %v3771_v32, %v11614_v10  ;;  %v4078_v54 = vpack.i.b16 %v4077_v52, %v4076_v58  ;;  %v15304_v3 = vcombine.low %v12792_v7, %v12795_v1  ;;  %v3860_v29 = vrot.slane %v9298_v61, %v11611_v9  ;;  %v15307_v7 = vld [vmem:[#allocation34_spill] sm:$0xff] }
 0x1ff   :  { %v3844_v8 = vrot.slane %v15303_v18, %v11611_v9  ;;  %v3827_v17 = vrot.slane %v3820_v43, %v11614_v10  ;;  %v15305_v49 = vcombine.low %v12723_v47, %v12726_v62  ;;  %v15306_v57 = vcombine.high %v12723_v47, %v12726_v62  ;;  %v10519_v32 = vld [vmem:[%s14993_s3] ss:$8 sps:$4 sm:$0xff]  }
 0x200   :  { %v3852_v0 = vrot.slane %v15304_v3, %v11611_v9  ;;  %v3779_v19 = vcombine.low %v3770_v13, %v3778_v21  ;;  %4156 = vmatprep.subr.bf16.mxu1 %v4078_v54  ;;  %v4084_v42 = vshrl.u32 %v3730_v45, 16  ;;  %v3819_v25 = vrot.slane %v3812_v44, %v11614_v10  ;;  %v10534_v52 = vld [vmem:[%s14994_s4 + $0x120] ss:$16 sps:$4 sm:$0xff]   ;;  %v10539_v44 = vld [vmem:[%s14994_s4 + $0x144] ss:$16 sps:$4 sm:$0xff]  }
 0x201   :  { %v3861_v28 = vcombine.low %v3836_v15, %v3844_v8  ;;  %v3901_v5 = vrot.slane %v15305_v49, %v11611_v9  ;;  %v3909_v22 = vrot.slane %v15306_v57, %v11611_v9  ;;  %v15308_v1 = vcombine.low %v12733_v59, %v15307_v7  ;;  %4157 = vmatpush1.bf16.msra.mxu1 %v4074_v30  ;;  %v10536_v15 = vld [vmem:[%s14994_s4 + $0x124] ss:$16 sps:$4 sm:$0xff]   ;;  %v10537_v43 = vld [vmem:[%s14994_s4 + $0x140] ss:$16 sps:$4 sm:$0xff]  }
 0x202   :  { %v3869_v53 = vcombine.low %v3852_v0, %v3860_v29  ;;  %v4085_v4 = vshrl.u32 %v3779_v19, 16  ;;  %v4082_v27 = vpack.i.b16 %v3779_v19, %v3730_v45  ;;  %v3910_v40 = vcombine.low %v15310_v11, %v15309_v31  ;;  %v10533_v45 = vld [vmem:[%s14994_s4 + $0x104] ss:$16 sps:$4 sm:$0xff]   ;;  %v10543_v13 = vld [vmem:[%s14994_s4 + $0x160] ss:$16 sps:$4 sm:$0xff]  }
 0x203   :  { %v3934_v61 = vrot.slane %v15308_v1, %v11611_v9  ;;  %v3918_v50 = vcombine.low %v3901_v5, %v3909_v22  ;;  %v3828_v23 = vcombine.low %v3819_v25, %v3827_v17  ;;  %v3868_v47 = vrot.slane %v3861_v28, %v11614_v10  ;;  %v10551_v21 = vld [vmem:[%s14994_s4 + $0x184] ss:$16 sps:$4 sm:$0xff]   ;;  %v10549_v18 = vld [vmem:[%s14994_s4 + $0x180] ss:$16 sps:$4 sm:$0xff]   ;;  %v10575_v22 = vld [vmem:[%s14994_s4 + $0x10c] ss:$16 sps:$4 sm:$0xff]  }
 0x204   :  { %v3876_v62 = vrot.slane %v3869_v53, %v11614_v10  ;;  %v15311_v60 = vcombine.high %v12733_v59, %v15307_v7  ;;  %v4086_v51 = vpack.i.b16 %v4085_v4, %v4084_v42  ;;  %v15312_v37 = vcombine.low %v12736_v56, %v12739_v14  ;;  %v10557_v8 = vld [vmem:[%s14994_s4 + $0x1a4] ss:$16 sps:$4 sm:$0xff]   ;;  %v10555_v54 = vld [vmem:[%s14994_s4 + $0x1a0] ss:$16 sps:$4 sm:$0xff]  }
 0x205   :  { %v3925_v35 = vrot.slane %v3918_v50, %v11614_v10  ;;  %v3958_v34 = vrot.slane %v9302_v63, %v11611_v9  ;;  %v3917_v39 = vrot.slane %v3910_v40, %v11614_v10  ;;  %v4092_v55 = vshrl.u32 %v3828_v23, 16  ;;  %v10545_v63 = vld [vmem:[%s14994_s4 + $0x164] ss:$16 sps:$4 sm:$0xff]   ;;  %v10558_v3 = vld [vmem:[%s14994_s4 + $0xc0] ss:$16 sps:$4 sm:$0xff]  }
 0x206   :  { %v3942_v38 = vrot.slane %v15311_v60, %v11611_v9  ;;  %v3950_v6 = vrot.slane %v15312_v37, %v11611_v9  ;;  %v3877_v24 = vcombine.low %v3868_v47, %v3876_v62  ;;  %4158 = vmatprep.subr.bf16.mxu1 %v4086_v51  ;;  %v15313_v30 = vmov 0   ;;  %v10560_v17 = vld [vmem:[%s14994_s4 + $0xc4] ss:$16 sps:$4 sm:$0xff]   ;;  %v10561_v29 = vld [vmem:[%s14994_s4 + $0x1c0] ss:$16 sps:$4 sm:$0xff]  }
 0x207   :  { %4159 = vmatpush1.bf16.msra.mxu1 %v4082_v27  ;;  %v3926_v36 = vcombine.low %v3917_v39, %v3925_v35  ;;  %4802 = vmatprep.subr.bf16.mxu0 %v10560_v17  ;;  %v10563_v0 = vld [vmem:[%s14994_s4 + $0x1c4] ss:$16 sps:$4 sm:$0xff]   ;;  %v10564_v28 = vld [vmem:[%s14994_s4 + $0xe0] ss:$16 sps:$4 sm:$0xff]   ;;  %v11350_v42 = vmov 0.0  }
 0x208   :  { %v3959_v33 = vcombine.low %v3934_v61, %v3942_v38  ;;  %v3967_v41 = vcombine.low %v3950_v6, %v3958_v34  ;;  %v4093_v59 = vshrl.u32 %v3877_v24, 16  ;;  %v4090_v48 = vpack.i.b16 %v3877_v24, %v3828_v23  ;;  %4803 = vmatpush1.bf16.msra.mxu0 %v10558_v3  ;;  %v10566_v19 = vld [vmem:[%s14994_s4 + $0xe4] ss:$16 sps:$4 sm:$0xff]   ;;  %v10567_v49 = vld [vmem:[%s14994_s4 + $0x1e0] ss:$16 sps:$4 sm:$0xff]  }
 0x209   :  { %v4100_v14 = vshrl.u32 %v3926_v36, 16  ;;  %4804 = vmatprep.subr.bf16.mxu0 %v10566_v19  ;;  %v10569_v5 = vld [vmem:[%s14994_s4 + $0x1e4] ss:$16 sps:$4 sm:$0xff]   ;;  %v4104_v25 = vcombine.low %v11350_v42, %v11350_v42  ;;  %v10591_v3 = vld [vmem:[%s14994_s4 + $0x168] ss:$16 sps:$4 sm:$0xff]  }
 0x20a   :  { %v3966_v26 = vrot.slane %v3959_v33, %v11614_v10  ;;  %v3974_v2 = vrot.slane %v3967_v41, %v11614_v10  ;;  %v4094_v46 = vpack.i.b16 %v4093_v59, %v4092_v55  ;;  %v10572_v57 = vld [vmem:[%s14994_s4 + $0x204] ss:$16 sps:$4 sm:$0xff]  }
 0x20b   :  { %v4111_v53 = vrot.slane %v4104_v25, %v11611_v9  ;;  %v10596_v17 = vld [vmem:[%s14994_s4 + $0x284] ss:$16 sps:$4 sm:$0xff]   ;;  %v10611_v25 = vld [vmem:[%s14994_s4 + $0x1cc] ss:$16 sps:$4 sm:$0xff]  }
 0x20c   :  { %v3975_v56 = vcombine.low %v3966_v26, %v3974_v2  ;;  %4160 = vmatprep.subr.bf16.mxu1 %v4094_v46  ;;  %4805 = vmatpush1.bf16.msra.mxu0 %v10564_v28  ;;  %v10602_v19 = vld [vmem:[%s14994_s4 + $0x2a4] ss:$16 sps:$4 sm:$0xff]   ;;  %v10597_v28 = vld [vmem:[%s14994_s4 + $0x188] ss:$16 sps:$4 sm:$0xff]  }
 0x20d   :  { %4161 = vmatpush1.bf16.msra.mxu1 %v4090_v48  ;;  %5065 = vmatprep.subr.bf16.mxu0 %v10572_v57  ;;  %v4112_v7 = vcombine.low %v4111_v53, %v4111_v53  ;;  %v10608_v57 = vld [vmem:[%s14994_s4 + $0x2c4] ss:$16 sps:$4 sm:$0xff]   ;;  %v10606_v53 = vld [vmem:[%s14994_s4 + $0x2c0] ss:$16 sps:$4 sm:$0xff]  }
 0x20e   :  { %v4101_v16 = vshrl.u32 %v3975_v56, 16  ;;  %v4098_v20 = vpack.i.b16 %v3975_v56, %v3926_v36 }
 0x20f   :  { %v4119_v1 = vrot.slane %v4112_v7, %v11614_v10  ;;  %v10614_v7 = vld [vmem:[%s14994_s4 + $0x2e4] ss:$16 sps:$4 sm:$0xff]  }
 0x210   :  { %v4102_v58 = vpack.i.b16 %v4101_v16, %v4100_v14  ;;  %v10570_v14 = vld [vmem:[%s14994_s4 + $0x200] ss:$16 sps:$4 sm:$0xff]  }
 0x211   :  { %v4120_v61 = vcombine.low %v4119_v1, %v4119_v1  ;;  %v4121_v4 = vcombine.high %v4119_v1, %v4119_v1  ;;  %v10609_v1 = vld [vmem:[%s14994_s4 + $0x1c8] ss:$16 sps:$4 sm:$0xff]  }
 0x212   :  { %4162 = vmatprep.subr.bf16.mxu1 %v4102_v58  ;;  %v10578_v58 = vld [vmem:[%s14994_s4 + $0x224] ss:$16 sps:$4 sm:$0xff]  }
 0x213   :  { %4163 = vmatpush1.bf16.msra.mxu1 %v4098_v20 }
 0x214   :  { %4548 = vmatprep.subr.bf16.mxu1 %v10533_v45 }
 0x216   :  { %4165 = vmatmul.mubr.bf16.vlgmr.msra.gmra.mrb[0].mxu1 %v10519_v32  ;;  %v10573_v32 = vld [vmem:[%s14994_s4 + $0x108] ss:$16 sps:$4 sm:$0xff]  }
 0x217   :  { %4549 = vmatpush1.bf16.msra.mxu1 %v10531_v12  ;;  %4580 = vmatprep.mubr.bf16.mxu1 %v15313_v30 }
 0x218   :  { %4550 = vmatprep.subr.bf16.mxu1 %v10536_v15  ;;  %v10581_v15 = vld [vmem:[%s14994_s4 + $0x12c] ss:$16 sps:$4 sm:$0xff]  }
 0x21b   :  { %4551 = vmatpush1.bf16.msra.mxu1 %v10534_v52  ;;  %v10576_v52 = vld [vmem:[%s14994_s4 + $0x220] ss:$16 sps:$4 sm:$0xff]  }
 0x21c   :  { %4552 = vmatprep.subr.bf16.mxu1 %v10539_v44  ;;  %v10584_v44 = vld [vmem:[%s14994_s4 + $0x244] ss:$16 sps:$4 sm:$0xff]  }
 0x21f   :  { %4553 = vmatpush1.bf16.msra.mxu1 %v10537_v43  ;;  %v10579_v43 = vld [vmem:[%s14994_s4 + $0x128] ss:$16 sps:$4 sm:$0xff]  }
 0x220   :  { %4554 = vmatprep.subr.bf16.mxu1 %v10545_v63  ;;  %v10587_v63 = vld [vmem:[%s14994_s4 + $0x14c] ss:$16 sps:$4 sm:$0xff]  }
 0x223   :  { %4555 = vmatpush1.bf16.msra.mxu1 %v10543_v13  ;;  %v10582_v13 = vld [vmem:[%s14994_s4 + $0x240] ss:$16 sps:$4 sm:$0xff]  }
 0x224   :  { %4556 = vmatprep.subr.bf16.mxu1 %v10551_v21  ;;  %v10590_v21 = vld [vmem:[%s14994_s4 + $0x264] ss:$16 sps:$4 sm:$0xff]  }
 0x227   :  { %4557 = vmatpush1.bf16.msra.mxu1 %v10549_v18  ;;  %v10585_v18 = vld [vmem:[%s14994_s4 + $0x148] ss:$16 sps:$4 sm:$0xff]  }
 0x228   :  { %4558 = vmatprep.subr.bf16.mxu1 %v10557_v8  ;;  %v10593_v8 = vld [vmem:[%s14994_s4 + $0x16c] ss:$16 sps:$4 sm:$0xff]  }
 0x22b   :  { %4559 = vmatpush1.bf16.msra.mxu1 %v10555_v54  ;;  %v10588_v54 = vld [vmem:[%s14994_s4 + $0x260] ss:$16 sps:$4 sm:$0xff]  }
 0x22c   :  { %4560 = vmatprep.subr.bf16.mxu1 %v10563_v0  ;;  %v10599_v0 = vld [vmem:[%s14994_s4 + $0x18c] ss:$16 sps:$4 sm:$0xff]  }
 0x22f   :  { %4561 = vmatpush1.bf16.msra.mxu1 %v10561_v29  ;;  %v10594_v29 = vld [vmem:[%s14994_s4 + $0x280] ss:$16 sps:$4 sm:$0xff]  }
 0x230   :  { %4562 = vmatprep.subr.bf16.mxu1 %v10569_v5  ;;  %v10600_v5 = vld [vmem:[%s14994_s4 + $0x2a0] ss:$16 sps:$4 sm:$0xff]  }
 0x233   :  { %4563 = vmatpush1.bf16.msra.mxu1 %v10567_v49  ;;  %v10605_v49 = vld [vmem:[%s14994_s4 + $0x1ac] ss:$16 sps:$4 sm:$0xff]  }
 0x234   :  { %4589 = vmatprep.subr.bf16.mxu1 %v10575_v22  ;;  %v10603_v22 = vld [vmem:[%s14994_s4 + $0x1a8] ss:$16 sps:$4 sm:$0xff]  }
 0x2e9   :  { %v4166_v27 = vpop.f32.mrb[0].mxu1 }
 0x2ea   :  { %v4167_v31 = vadd.f32 %v4166_v27, %v4120_v61  ;;  %v4168_v11 = vpop.f32.mrb[1].mxu1 }
 0x2eb   :  { %v4169_v40 = vadd.f32 %v4168_v11, %v4121_v4  ;;  %v4170_v50 = vpop.f32.mrb[2].mxu1  ;;  %v10615_v11 = vld [vmem:[%s14994_s4 + $0x1e8] ss:$16 sps:$4 sm:$0xff]  }
 0x2ec   :  { %v4175_v23 = vcombine.high %v4167_v31, %v11350_v42  ;;  %v13152_v47 = vrot.slane %v4167_v31, %v11611_v9  ;;  %v4171_v62 = vadd.f32 %v4170_v50, %v4120_v61  ;;  %v4172_v60 = vpop.f32.mrb[3].mxu1  ;;  %v10617_v61 = vld [vmem:[%s14994_s4 + $0x1ec] ss:$16 sps:$4 sm:$0xff]   ;;  %v10620_v31 = vld [vmem:[%s14994_s4 + $0x304] ss:$16 sps:$4 sm:$0xff]  }
 0x2ed   :  { %v4190_v38 = vcombine.high %v4169_v40, %v11350_v42  ;;  %v13156_v51 = vrot.slane %v4169_v40, %v11611_v9  ;;  %v4173_v35 = vadd.f32 %v4172_v60, %v4121_v4  ;;  %v10612_v4 = vld [vmem:[%s14994_s4 + $0x2e0] ss:$16 sps:$4 sm:$0xff]   ;;  %v10623_v40 = vld [vmem:[%s14994_s4 + $0xc] ss:$16 sps:$4 sm:$0xff]  }
 0x2ee   :  { %v13159_v37 = vrot.slane %v4175_v23, %v11611_v9  ;;  %v4241_v6 = vcombine.high %v4171_v62, %v11350_v42  ;;  %v13163_v34 = vrot.slane %v4171_v62, %v11611_v9  ;;  %v10618_v50 = vld [vmem:[%s14994_s4 + $0x300] ss:$16 sps:$4 sm:$0xff]   ;;  %v10621_v62 = vld [vmem:[%s14994_s4 + $0x8] ss:$16 sps:$4 sm:$0xff]   ;;  %v10629_v60 = vld [vmem:[%s14994_s4 + $0x2c] ss:$16 sps:$4 sm:$0xff]  }
 0x2ef   :  { %v13166_v24 = vrot.slane %v4190_v38, %v11611_v9  ;;  %v4205_v33 = vcombine.low %v13152_v47, %v13156_v51  ;;  %v4206_v39 = vcombine.high %v13152_v47, %v13156_v51  ;;  %v4256_v41 = vcombine.high %v4173_v35, %v11350_v42  ;;  %v10626_v47 = vld [vmem:[%s14994_s4 + $0x324] ss:$16 sps:$4 sm:$0xff]   ;;  %v10624_v38 = vld [vmem:[%s14994_s4 + $0x320] ss:$16 sps:$4 sm:$0xff]  }
 0x2f0   :  { %v13174_v55 = vrot.slane %v4241_v6, %v11611_v9  ;;  %v13177_v59 = vrot.slane %v4173_v35, %v11611_v9  ;;  %v10632_v51 = vld [vmem:[%s14994_s4 + $0x344] ss:$16 sps:$4 sm:$0xff]   ;;  %v10627_v35 = vld [vmem:[%s14994_s4 + $0x28] ss:$16 sps:$4 sm:$0xff]   ;;  %v10635_v6 = vld [vmem:[%s14994_s4 + $0x4c] ss:$16 sps:$4 sm:$0xff]  }
 0x2f1   :  { %v4213_v48 = vrot.slane %v4205_v33, %v11614_v10  ;;  %v4221_v36 = vcombine.low %v13159_v37, %v13166_v24  ;;  %v4222_v26 = vcombine.high %v13159_v37, %v13166_v24  ;;  %v13185_v2 = vrot.slane %v4256_v41, %v11611_v9  ;;  %v10630_v33 = vld [vmem:[%s14994_s4 + $0x340] ss:$16 sps:$4 sm:$0xff]   ;;  %v10633_v41 = vld [vmem:[%s14994_s4 + $0x48] ss:$16 sps:$4 sm:$0xff]  }
 0x2f2   :  { %v4271_v46 = vcombine.low %v13163_v34, %v13177_v59  ;;  %v4272_v56 = vcombine.high %v13163_v34, %v13177_v59  ;;  %v13295_v27 = vrot.slane %v4206_v39, %v11614_v10  ;;  %v10638_v39 = vld [vmem:[%s14994_s4 + $0x364] ss:$16 sps:$4 sm:$0xff]   ;;  %v10810_v37 = vld [vmem:[%s14994_s4 + $0x700] ss:$16 sps:$4 sm:$0xff]  }
 0x2f3   :  { %v13194_v16 = vpack.c.bf16 %v4213_v48, %v4213_v48  ;;  %v4237_v20 = vcombine.high %v4213_v48, %v11350_v42  ;;  %v4287_v9 = vcombine.low %v13174_v55, %v13185_v2  ;;  %v4288_v45 = vcombine.high %v13174_v55, %v13185_v2  ;;  %v10641_v48 = vld [vmem:[%s14994_s4 + $0x6c] ss:$16 sps:$4 sm:$0xff]   ;;  %v11002_v34 = vld [vmem:[%s14994_s4 + $0xb00] ss:$16 sps:$4 sm:$0xff]   ;;  %v11202_v2 = vld [vmem:[%s14994_s4 + $0xf24] ss:$16 sps:$4 sm:$0xff]  }
 0x2f4   :  { %v13311_v23 = vpack.c.bf16 %v13295_v27, %v13295_v27 }
 0x2f5   :  { %4823 = vmatmul.mubr.bf16.vlgmr.msra.gmra.mrb[64].mxu0 %v13194_v16  ;;  %v13208_v12 = vpack.c.bf16 %v4237_v20, %v4237_v20  ;;  %v10644_v20 = vld [vmem:[%s14994_s4 + $0x384] ss:$16 sps:$4 sm:$0xff]  }
 0x2f6   :  { %5066 = vmatpush1.bf16.msra.mxu0 %v10570_v14  ;;  %5097 = vmatprep.mubr.bf16.mxu0 %v15313_v30  ;;  %v10636_v14 = vld [vmem:[%s14994_s4 + $0x360] ss:$16 sps:$4 sm:$0xff]  }
 0x2f7   :  { %4581 = vmatmul.mubr.bf16.vlgmr.msra.gmra.mrb[4].mxu1 %v13208_v12  ;;  %5067 = vmatprep.subr.bf16.mxu0 %v10578_v58  ;;  %v10639_v58 = vld [vmem:[%s14994_s4 + $0x68] ss:$16 sps:$4 sm:$0xff]  }
 0x2f8   :  { %4590 = vmatpush1.bf16.msra.mxu1 %v10573_v32  ;;  %4621 = vmatprep.mubr.bf16.mxu1 %v15313_v30  ;;  %v10647_v32 = vld [vmem:[%s14994_s4 + $0x8c] ss:$16 sps:$4 sm:$0xff]  }
 0x2f9   :  { %4591 = vmatprep.subr.bf16.mxu1 %v10581_v15  ;;  %v10650_v15 = vld [vmem:[%s14994_s4 + $0x3a4] ss:$16 sps:$4 sm:$0xff]  }
 0x2fa   :  { %5068 = vmatpush1.bf16.msra.mxu0 %v10576_v52  ;;  %v10645_v52 = vld [vmem:[%s14994_s4 + $0x88] ss:$16 sps:$4 sm:$0xff]  }
 0x2fb   :  { %5069 = vmatprep.subr.bf16.mxu0 %v10584_v44  ;;  %v10653_v44 = vld [vmem:[%s14994_s4 + $0xac] ss:$16 sps:$4 sm:$0xff]  }
 0x2fc   :  { %4592 = vmatpush1.bf16.msra.mxu1 %v10579_v43  ;;  %v10648_v43 = vld [vmem:[%s14994_s4 + $0x3a0] ss:$16 sps:$4 sm:$0xff]  }
 0x2fd   :  { %4593 = vmatprep.subr.bf16.mxu1 %v10587_v63  ;;  %v10656_v63 = vld [vmem:[%s14994_s4 + $0x3c4] ss:$16 sps:$4 sm:$0xff]  }
 0x2fe   :  { %5070 = vmatpush1.bf16.msra.mxu0 %v10582_v13  ;;  %v10651_v13 = vld [vmem:[%s14994_s4 + $0xa8] ss:$16 sps:$4 sm:$0xff]  }
 0x2ff   :  { %5071 = vmatprep.subr.bf16.mxu0 %v10590_v21  ;;  %v10659_v21 = vld [vmem:[%s14994_s4 + $0xcc] ss:$16 sps:$4 sm:$0xff]  }
 0x300   :  { %4594 = vmatpush1.bf16.msra.mxu1 %v10585_v18  ;;  %v10654_v18 = vld [vmem:[%s14994_s4 + $0x3c0] ss:$16 sps:$4 sm:$0xff]  }
 0x301   :  { %4595 = vmatprep.subr.bf16.mxu1 %v10593_v8  ;;  %v10662_v8 = vld [vmem:[%s14994_s4 + $0x3e4] ss:$16 sps:$4 sm:$0xff]  }
 0x302   :  { %5072 = vmatpush1.bf16.msra.mxu0 %v10588_v54  ;;  %v10657_v54 = vld [vmem:[%s14994_s4 + $0xc8] ss:$16 sps:$4 sm:$0xff]  }
 0x303   :  { %5073 = vmatprep.subr.bf16.mxu0 %v10596_v17  ;;  %v10665_v17 = vld [vmem:[%s14994_s4 + $0xec] ss:$16 sps:$4 sm:$0xff]  }
 0x304   :  { %4596 = vmatpush1.bf16.msra.mxu1 %v10591_v3  ;;  %v10660_v3 = vld [vmem:[%s14994_s4 + $0x3e0] ss:$16 sps:$4 sm:$0xff]  }
 0x305   :  { %4597 = vmatprep.subr.bf16.mxu1 %v10599_v0  ;;  %v4238_v0 = vcombine.high %v13295_v27, %v11350_v42  ;;  %v10681_v27 = vld [vmem:[%s14994_s4 + $0x248] ss:$16 sps:$4 sm:$0xff]  }
 0x306   :  { %5074 = vmatpush1.bf16.msra.mxu0 %v10594_v29  ;;  %v10668_v29 = vld [vmem:[%s14994_s4 + $0x404] ss:$16 sps:$4 sm:$0xff]  }
 0x307   :  { %5075 = vmatprep.subr.bf16.mxu0 %v10602_v19  ;;  %v10663_v19 = vld [vmem:[%s14994_s4 + $0xe8] ss:$16 sps:$4 sm:$0xff]  }
 0x308   :  { %4598 = vmatpush1.bf16.msra.mxu1 %v10597_v28  ;;  %v10671_v28 = vld [vmem:[%s14994_s4 + $0x20c] ss:$16 sps:$4 sm:$0xff]  }
 0x309   :  { %4599 = vmatprep.subr.bf16.mxu1 %v10605_v49  ;;  %v10666_v49 = vld [vmem:[%s14994_s4 + $0x400] ss:$16 sps:$4 sm:$0xff]  }
 0x30a   :  { %5076 = vmatpush1.bf16.msra.mxu0 %v10600_v5  ;;  %v13415_v5 = vpack.c.bf16 %v4238_v0, %v4238_v0  ;;  %v10737_v0 = vld [vmem:[%s14994_s4 + $0x36c] ss:$16 sps:$4 sm:$0xff]  }
 0x30b   :  { %5077 = vmatprep.subr.bf16.mxu0 %v10608_v57  ;;  %v10674_v57 = vld [vmem:[%s14994_s4 + $0x424] ss:$16 sps:$4 sm:$0xff]  }
 0x30c   :  { %4600 = vmatpush1.bf16.msra.mxu1 %v10603_v22  ;;  %v10669_v22 = vld [vmem:[%s14994_s4 + $0x208] ss:$16 sps:$4 sm:$0xff]  }
 0x30d   :  { %4601 = vmatprep.subr.bf16.mxu1 %v10611_v25  ;;  %v10677_v25 = vld [vmem:[%s14994_s4 + $0x22c] ss:$16 sps:$4 sm:$0xff]  }
 0x30e   :  { %5078 = vmatpush1.bf16.msra.mxu0 %v10606_v53  ;;  %v10672_v53 = vld [vmem:[%s14994_s4 + $0x420] ss:$16 sps:$4 sm:$0xff]  }
 0x30f   :  { %5079 = vmatprep.subr.bf16.mxu0 %v10614_v7  ;;  %v10680_v7 = vld [vmem:[%s14994_s4 + $0x444] ss:$16 sps:$4 sm:$0xff]  }
 0x310   :  { %4602 = vmatpush1.bf16.msra.mxu1 %v10609_v1  ;;  %v10675_v1 = vld [vmem:[%s14994_s4 + $0x228] ss:$16 sps:$4 sm:$0xff]  }
 0x311   :  { %4603 = vmatprep.subr.bf16.mxu1 %v10617_v61  ;;  %v10683_v61 = vld [vmem:[%s14994_s4 + $0x24c] ss:$16 sps:$4 sm:$0xff]  }
 0x312   :  { %5080 = vmatpush1.bf16.msra.mxu0 %v10612_v4  ;;  %v10686_v4 = vld [vmem:[%s14994_s4 + $0x464] ss:$16 sps:$4 sm:$0xff]  }
 0x313   :  { %5344 = vmatprep.subr.bf16.mxu0 %v10620_v31  ;;  %v10689_v31 = vld [vmem:[%s14994_s4 + $0x26c] ss:$16 sps:$4 sm:$0xff]  }
 0x314   :  { %4604 = vmatpush1.bf16.msra.mxu1 %v10615_v11  ;;  %v10684_v11 = vld [vmem:[%s14994_s4 + $0x460] ss:$16 sps:$4 sm:$0xff]  }
 0x315   :  { %5098 = vmatmul.mubr.bf16.vlgmr.msra.gmra.mrb[68].mxu0 %v13311_v23  ;;  %4831 = vmatprep.subr.bf16.mxu1 %v10623_v40  ;;  %v10692_v40 = vld [vmem:[%s14994_s4 + $0x484] ss:$16 sps:$4 sm:$0xff]  }
 0x316   :  { %5345 = vmatpush1.bf16.msra.mxu0 %v10618_v50  ;;  %5376 = vmatprep.mubr.bf16.mxu0 %v15313_v30  ;;  %v10687_v50 = vld [vmem:[%s14994_s4 + $0x268] ss:$16 sps:$4 sm:$0xff]  }
 0x317   :  { %4622 = vmatmul.mubr.bf16.vlgmr.msra.gmra.mrb[8].mxu1 %v13208_v12  ;;  %5346 = vmatprep.subr.bf16.mxu0 %v10626_v47  ;;  %v10642_v12 = vld [vmem:[%s14994_s4 + $0x380] ss:$16 sps:$4 sm:$0xff]   ;;  %v10695_v47 = vld [vmem:[%s14994_s4 + $0x28c] ss:$16 sps:$4 sm:$0xff]  }
 0x318   :  { %4832 = vmatpush1.bf16.msra.mxu1 %v10621_v62  ;;  %4863 = vmatprep.mubr.bf16.mxu1 %v15313_v30  ;;  %v10690_v62 = vld [vmem:[%s14994_s4 + $0x480] ss:$16 sps:$4 sm:$0xff]  }
 0x319   :  { %4833 = vmatprep.subr.bf16.mxu1 %v10629_v60  ;;  %v10698_v60 = vld [vmem:[%s14994_s4 + $0x4a4] ss:$16 sps:$4 sm:$0xff]  }
 0x31a   :  { %5347 = vmatpush1.bf16.msra.mxu0 %v10624_v38  ;;  %v10693_v38 = vld [vmem:[%s14994_s4 + $0x288] ss:$16 sps:$4 sm:$0xff]  }
 0x31b   :  { %5348 = vmatprep.subr.bf16.mxu0 %v10632_v51  ;;  %v10701_v51 = vld [vmem:[%s14994_s4 + $0x2ac] ss:$16 sps:$4 sm:$0xff]  }
 0x31c   :  { %4834 = vmatpush1.bf16.msra.mxu1 %v10627_v35  ;;  %v10696_v35 = vld [vmem:[%s14994_s4 + $0x4a0] ss:$16 sps:$4 sm:$0xff]  }
 0x31d   :  { %4835 = vmatprep.subr.bf16.mxu1 %v10635_v6  ;;  %v10704_v6 = vld [vmem:[%s14994_s4 + $0x4c4] ss:$16 sps:$4 sm:$0xff]  }
 0x31e   :  { %5349 = vmatpush1.bf16.msra.mxu0 %v10630_v33  ;;  %v10699_v33 = vld [vmem:[%s14994_s4 + $0x2a8] ss:$16 sps:$4 sm:$0xff]  }
 0x31f   :  { %5350 = vmatprep.subr.bf16.mxu0 %v10638_v39  ;;  %v10707_v39 = vld [vmem:[%s14994_s4 + $0x2cc] ss:$16 sps:$4 sm:$0xff]  }
 0x320   :  { %4836 = vmatpush1.bf16.msra.mxu1 %v10633_v41  ;;  %v10702_v41 = vld [vmem:[%s14994_s4 + $0x4c0] ss:$16 sps:$4 sm:$0xff]  }
 0x321   :  { %4837 = vmatprep.subr.bf16.mxu1 %v10641_v48  ;;  %v10710_v48 = vld [vmem:[%s14994_s4 + $0x4e4] ss:$16 sps:$4 sm:$0xff]  }
 0x322   :  { %5351 = vmatpush1.bf16.msra.mxu0 %v10636_v14  ;;  %v10705_v14 = vld [vmem:[%s14994_s4 + $0x2c8] ss:$16 sps:$4 sm:$0xff]  }
 0x323   :  { %5352 = vmatprep.subr.bf16.mxu0 %v10644_v20  ;;  %v10713_v20 = vld [vmem:[%s14994_s4 + $0x2ec] ss:$16 sps:$4 sm:$0xff]  }
 0x324   :  { %4838 = vmatpush1.bf16.msra.mxu1 %v10639_v58  ;;  %v10708_v58 = vld [vmem:[%s14994_s4 + $0x4e0] ss:$16 sps:$4 sm:$0xff]  }
 0x325   :  { %4839 = vmatprep.subr.bf16.mxu1 %v10647_v32  ;;  %v13509_v32 = vrot.slane %v4221_v36, %v11614_v10  ;;  %v10714_v36 = vld [vmem:[%s14994_s4 + $0x500] ss:$16 sps:$4 sm:$0xff]  }
 0x326   :  { %5353 = vmatpush1.bf16.msra.mxu0 %v10642_v12  ;;  %v10716_v12 = vld [vmem:[%s14994_s4 + $0x504] ss:$16 sps:$4 sm:$0xff]  }
 0x327   :  { %5354 = vmatprep.subr.bf16.mxu0 %v10650_v15  ;;  %v10711_v15 = vld [vmem:[%s14994_s4 + $0x2e8] ss:$16 sps:$4 sm:$0xff]  }
 0x328   :  { %4840 = vmatpush1.bf16.msra.mxu1 %v10645_v52  ;;  %v10719_v52 = vld [vmem:[%s14994_s4 + $0x30c] ss:$16 sps:$4 sm:$0xff]  }
 0x329   :  { %4841 = vmatprep.subr.bf16.mxu1 %v10653_v44  ;;  %v13525_v44 = vpack.c.bf16 %v13509_v32, %v13509_v32 }
 0x32a   :  { %5355 = vmatpush1.bf16.msra.mxu0 %v10648_v43  ;;  %v10722_v43 = vld [vmem:[%s14994_s4 + $0x524] ss:$16 sps:$4 sm:$0xff]  }
 0x32b   :  { %5356 = vmatprep.subr.bf16.mxu0 %v10656_v63  ;;  %v10717_v63 = vld [vmem:[%s14994_s4 + $0x308] ss:$16 sps:$4 sm:$0xff]  }
 0x32c   :  { %4842 = vmatpush1.bf16.msra.mxu1 %v10651_v13  ;;  %v10725_v13 = vld [vmem:[%s14994_s4 + $0x32c] ss:$16 sps:$4 sm:$0xff]  }
 0x32d   :  { %4843 = vmatprep.subr.bf16.mxu1 %v10659_v21  ;;  %v10720_v21 = vld [vmem:[%s14994_s4 + $0x520] ss:$16 sps:$4 sm:$0xff]  }
 0x32e   :  { %5357 = vmatpush1.bf16.msra.mxu0 %v10654_v18  ;;  %v10728_v18 = vld [vmem:[%s14994_s4 + $0x544] ss:$16 sps:$4 sm:$0xff]  }
 0x32f   :  { %5358 = vmatprep.subr.bf16.mxu0 %v10662_v8  ;;  %v10723_v8 = vld [vmem:[%s14994_s4 + $0x328] ss:$16 sps:$4 sm:$0xff]  }
 0x330   :  { %4844 = vmatpush1.bf16.msra.mxu1 %v10657_v54  ;;  %v10731_v54 = vld [vmem:[%s14994_s4 + $0x34c] ss:$16 sps:$4 sm:$0xff]  }
 0x331   :  { %4845 = vmatprep.subr.bf16.mxu1 %v10665_v17  ;;  %v10734_v17 = vld [vmem:[%s14994_s4 + $0x564] ss:$16 sps:$4 sm:$0xff]  }
 0x332   :  { %5359 = vmatpush1.bf16.msra.mxu0 %v10660_v3  ;;  %v10729_v3 = vld [vmem:[%s14994_s4 + $0x348] ss:$16 sps:$4 sm:$0xff]  }
 0x333   :  { %5623 = vmatprep.subr.bf16.mxu0 %v10668_v29  ;;  %v10732_v29 = vld [vmem:[%s14994_s4 + $0x560] ss:$16 sps:$4 sm:$0xff]  }
 0x334   :  { %4846 = vmatpush1.bf16.msra.mxu1 %v10663_v19  ;;  %v10740_v19 = vld [vmem:[%s14994_s4 + $0x584] ss:$16 sps:$4 sm:$0xff]  }
 0x335   :  { %5377 = vmatmul.mubr.bf16.vlgmr.msra.gmra.mrb[72].mxu0 %v13415_v5  ;;  %5106 = vmatprep.subr.bf16.mxu1 %v10671_v28  ;;  %v10735_v28 = vld [vmem:[%s14994_s4 + $0x368] ss:$16 sps:$4 sm:$0xff]  }
 0x336   :  { %5624 = vmatpush1.bf16.msra.mxu0 %v10666_v49  ;;  %5655 = vmatprep.mubr.bf16.mxu0 %v15313_v30  ;;  %v10743_v49 = vld [vmem:[%s14994_s4 + $0x38c] ss:$16 sps:$4 sm:$0xff]  }
 0x337   :  { %4864 = vmatmul.mubr.bf16.vlgmr.msra.gmra.mrb[12].mxu1 %v13194_v16  ;;  %5625 = vmatprep.subr.bf16.mxu0 %v10674_v57  ;;  %v10678_v16 = vld [vmem:[%s14994_s4 + $0x440] ss:$16 sps:$4 sm:$0xff]  }
 0x338   :  { %5107 = vmatpush1.bf16.msra.mxu1 %v10669_v22  ;;  %5138 = vmatprep.mubr.bf16.mxu1 %v15313_v30  ;;  %v10738_v57 = vld [vmem:[%s14994_s4 + $0x580] ss:$16 sps:$4 sm:$0xff]   ;;  %v10746_v22 = vld [vmem:[%s14994_s4 + $0x5a4] ss:$16 sps:$4 sm:$0xff]  }
 0x339   :  { %5108 = vmatprep.subr.bf16.mxu1 %v10677_v25  ;;  %v10741_v25 = vld [vmem:[%s14994_s4 + $0x388] ss:$16 sps:$4 sm:$0xff]  }
 0x33a   :  { %5626 = vmatpush1.bf16.msra.mxu0 %v10672_v53  ;;  %v10749_v53 = vld [vmem:[%s14994_s4 + $0x3ac] ss:$16 sps:$4 sm:$0xff]  }
 0x33b   :  { %5627 = vmatprep.subr.bf16.mxu0 %v10680_v7  ;;  %v10744_v7 = vld [vmem:[%s14994_s4 + $0x5a0] ss:$16 sps:$4 sm:$0xff]  }
 0x33c   :  { %5109 = vmatpush1.bf16.msra.mxu1 %v10675_v1  ;;  %v10752_v1 = vld [vmem:[%s14994_s4 + $0x5c4] ss:$16 sps:$4 sm:$0xff]  }
 0x33d   :  { %5110 = vmatprep.subr.bf16.mxu1 %v10683_v61  ;;  %v10747_v61 = vld [vmem:[%s14994_s4 + $0x3a8] ss:$16 sps:$4 sm:$0xff]  }
 0x33e   :  { %5628 = vmatpush1.bf16.msra.mxu0 %v10678_v16  ;;  %v10755_v16 = vld [vmem:[%s14994_s4 + $0x3cc] ss:$16 sps:$4 sm:$0xff]  }
 0x33f   :  { %5629 = vmatprep.subr.bf16.mxu0 %v10686_v4  ;;  %v10750_v4 = vld [vmem:[%s14994_s4 + $0x5c0] ss:$16 sps:$4 sm:$0xff]  }
 0x340   :  { %5111 = vmatpush1.bf16.msra.mxu1 %v10681_v27  ;;  %v10758_v27 = vld [vmem:[%s14994_s4 + $0x5e4] ss:$16 sps:$4 sm:$0xff]  }
 0x341   :  { %5112 = vmatprep.subr.bf16.mxu1 %v10689_v31  ;;  %v10753_v31 = vld [vmem:[%s14994_s4 + $0x3c8] ss:$16 sps:$4 sm:$0xff]  }
 0x342   :  { %5630 = vmatpush1.bf16.msra.mxu0 %v10684_v11  ;;  %v10761_v11 = vld [vmem:[%s14994_s4 + $0x3ec] ss:$16 sps:$4 sm:$0xff]  }
 0x343   :  { %5631 = vmatprep.subr.bf16.mxu0 %v10692_v40  ;;  %v10756_v40 = vld [vmem:[%s14994_s4 + $0x5e0] ss:$16 sps:$4 sm:$0xff]  }
 0x344   :  { %5113 = vmatpush1.bf16.msra.mxu1 %v10687_v50  ;;  %v4239_v50 = vcombine.high %v13509_v32, %v11350_v42  ;;  %v10785_v32 = vld [vmem:[%s14994_s4 + $0x46c] ss:$16 sps:$4 sm:$0xff]  }
 0x345   :  { %5114 = vmatprep.subr.bf16.mxu1 %v10695_v47  ;;  %v10764_v47 = vld [vmem:[%s14994_s4 + $0x604] ss:$16 sps:$4 sm:$0xff]  }
 0x346   :  { %5632 = vmatpush1.bf16.msra.mxu0 %v10690_v62  ;;  %v10759_v62 = vld [vmem:[%s14994_s4 + $0x3e8] ss:$16 sps:$4 sm:$0xff]  }
 0x347   :  { %5633 = vmatprep.subr.bf16.mxu0 %v10698_v60  ;;  %v10767_v60 = vld [vmem:[%s14994_s4 + $0x40c] ss:$16 sps:$4 sm:$0xff]  }
 0x348   :  { %5115 = vmatpush1.bf16.msra.mxu1 %v10693_v38  ;;  %v10762_v38 = vld [vmem:[%s14994_s4 + $0x600] ss:$16 sps:$4 sm:$0xff]  }
 0x349   :  { %5116 = vmatprep.subr.bf16.mxu1 %v10701_v51  ;;  %v13629_v51 = vpack.c.bf16 %v4239_v50, %v4239_v50  ;;  %v10831_v50 = vld [vmem:[%s14994_s4 + $0x568] ss:$16 sps:$4 sm:$0xff]  }
 0x34a   :  { %5634 = vmatpush1.bf16.msra.mxu0 %v10696_v35  ;;  %v10770_v35 = vld [vmem:[%s14994_s4 + $0x624] ss:$16 sps:$4 sm:$0xff]  }
 0x34b   :  { %5635 = vmatprep.subr.bf16.mxu0 %v10704_v6  ;;  %v10765_v6 = vld [vmem:[%s14994_s4 + $0x408] ss:$16 sps:$4 sm:$0xff]  }
 0x34c   :  { %5117 = vmatpush1.bf16.msra.mxu1 %v10699_v33  ;;  %v10773_v33 = vld [vmem:[%s14994_s4 + $0x42c] ss:$16 sps:$4 sm:$0xff]  }
 0x34d   :  { %5118 = vmatprep.subr.bf16.mxu1 %v10707_v39  ;;  %v10768_v39 = vld [vmem:[%s14994_s4 + $0x620] ss:$16 sps:$4 sm:$0xff]  }
 0x34e   :  { %5636 = vmatpush1.bf16.msra.mxu0 %v10702_v41  ;;  %v10776_v41 = vld [vmem:[%s14994_s4 + $0x644] ss:$16 sps:$4 sm:$0xff]  }
 0x34f   :  { %5637 = vmatprep.subr.bf16.mxu0 %v10710_v48  ;;  %v10771_v48 = vld [vmem:[%s14994_s4 + $0x428] ss:$16 sps:$4 sm:$0xff]  }
 0x350   :  { %5119 = vmatpush1.bf16.msra.mxu1 %v10705_v14  ;;  %v10779_v14 = vld [vmem:[%s14994_s4 + $0x44c] ss:$16 sps:$4 sm:$0xff]  }
 0x351   :  { %5120 = vmatprep.subr.bf16.mxu1 %v10713_v20  ;;  %v10782_v20 = vld [vmem:[%s14994_s4 + $0x664] ss:$16 sps:$4 sm:$0xff]  }
 0x352   :  { %5638 = vmatpush1.bf16.msra.mxu0 %v10708_v58  ;;  %v10777_v58 = vld [vmem:[%s14994_s4 + $0x448] ss:$16 sps:$4 sm:$0xff]  }
 0x353   :  { %5902 = vmatprep.subr.bf16.mxu0 %v10716_v12  ;;  %v10780_v12 = vld [vmem:[%s14994_s4 + $0x660] ss:$16 sps:$4 sm:$0xff]  }
 0x354   :  { %5121 = vmatpush1.bf16.msra.mxu1 %v10711_v15  ;;  %v10788_v15 = vld [vmem:[%s14994_s4 + $0x684] ss:$16 sps:$4 sm:$0xff]  }
 0x355   :  { %5656 = vmatmul.mubr.bf16.vlgmr.msra.gmra.mrb[76].mxu0 %v13525_v44  ;;  %5385 = vmatprep.subr.bf16.mxu1 %v10719_v52  ;;  %v10783_v52 = vld [vmem:[%s14994_s4 + $0x468] ss:$16 sps:$4 sm:$0xff]  }
 0x356   :  { %5903 = vmatpush1.bf16.msra.mxu0 %v10714_v36  ;;  %5934 = vmatprep.mubr.bf16.mxu0 %v15313_v30  ;;  %v10791_v36 = vld [vmem:[%s14994_s4 + $0x48c] ss:$16 sps:$4 sm:$0xff]  }
 0x357   :  { %5139 = vmatmul.mubr.bf16.vlgmr.msra.gmra.mrb[16].mxu1 %v13311_v23  ;;  %5904 = vmatprep.subr.bf16.mxu0 %v10722_v43  ;;  %v10726_v23 = vld [vmem:[%s14994_s4 + $0x540] ss:$16 sps:$4 sm:$0xff]  }
 0x358   :  { %5386 = vmatpush1.bf16.msra.mxu1 %v10717_v63  ;;  %5417 = vmatprep.mubr.bf16.mxu1 %v15313_v30  ;;  %v10786_v43 = vld [vmem:[%s14994_s4 + $0x680] ss:$16 sps:$4 sm:$0xff]   ;;  %v10794_v63 = vld [vmem:[%s14994_s4 + $0x6a4] ss:$16 sps:$4 sm:$0xff]  }
 0x359   :  { %5387 = vmatprep.subr.bf16.mxu1 %v10725_v13  ;;  %v10789_v13 = vld [vmem:[%s14994_s4 + $0x488] ss:$16 sps:$4 sm:$0xff]  }
 0x35a   :  { %5905 = vmatpush1.bf16.msra.mxu0 %v10720_v21  ;;  %v10797_v21 = vld [vmem:[%s14994_s4 + $0x4ac] ss:$16 sps:$4 sm:$0xff]  }
 0x35b   :  { %5906 = vmatprep.subr.bf16.mxu0 %v10728_v18  ;;  %v10792_v18 = vld [vmem:[%s14994_s4 + $0x6a0] ss:$16 sps:$4 sm:$0xff]  }
 0x35c   :  { %5388 = vmatpush1.bf16.msra.mxu1 %v10723_v8  ;;  %v10800_v8 = vld [vmem:[%s14994_s4 + $0x6c4] ss:$16 sps:$4 sm:$0xff]  }
 0x35d   :  { %5389 = vmatprep.subr.bf16.mxu1 %v10731_v54  ;;  %v10795_v54 = vld [vmem:[%s14994_s4 + $0x4a8] ss:$16 sps:$4 sm:$0xff]  }
 0x35e   :  { %5907 = vmatpush1.bf16.msra.mxu0 %v10726_v23  ;;  %v10803_v23 = vld [vmem:[%s14994_s4 + $0x4cc] ss:$16 sps:$4 sm:$0xff]  }
 0x35f   :  { %5908 = vmatprep.subr.bf16.mxu0 %v10734_v17  ;;  %v10798_v17 = vld [vmem:[%s14994_s4 + $0x6c0] ss:$16 sps:$4 sm:$0xff]  }
 0x360   :  { %5390 = vmatpush1.bf16.msra.mxu1 %v10729_v3  ;;  %v10806_v3 = vld [vmem:[%s14994_s4 + $0x6e4] ss:$16 sps:$4 sm:$0xff]  }
 0x361   :  { %5391 = vmatprep.subr.bf16.mxu1 %v10737_v0  ;;  %v10801_v0 = vld [vmem:[%s14994_s4 + $0x4c8] ss:$16 sps:$4 sm:$0xff]  }
 0x362   :  { %5909 = vmatpush1.bf16.msra.mxu0 %v10732_v29  ;;  %v10809_v29 = vld [vmem:[%s14994_s4 + $0x4ec] ss:$16 sps:$4 sm:$0xff]  }
 0x363   :  { %5910 = vmatprep.subr.bf16.mxu0 %v10740_v19  ;;  %v10804_v19 = vld [vmem:[%s14994_s4 + $0x6e0] ss:$16 sps:$4 sm:$0xff]  }
 0x364   :  { %5392 = vmatpush1.bf16.msra.mxu1 %v10735_v28  ;;  %v13723_v28 = vrot.slane %v4222_v26, %v11614_v10  ;;  %v10818_v26 = vld [vmem:[%s14994_s4 + $0x724] ss:$16 sps:$4 sm:$0xff]  }
 0x365   :  { %5393 = vmatprep.subr.bf16.mxu1 %v10743_v49  ;;  %v10812_v49 = vld [vmem:[%s14994_s4 + $0x704] ss:$16 sps:$4 sm:$0xff]  }
 0x366   :  { %5911 = vmatpush1.bf16.msra.mxu0 %v10738_v57  ;;  %v10807_v57 = vld [vmem:[%s14994_s4 + $0x4e8] ss:$16 sps:$4 sm:$0xff]   ;;  %v13739_v24 = vpack.c.bf16 %v13723_v28, %v13723_v28 }
 0x367   :  { %5912 = vmatprep.subr.bf16.mxu0 %v10746_v22  ;;  %v10815_v22 = vld [vmem:[%s14994_s4 + $0x50c] ss:$16 sps:$4 sm:$0xff]  }
 0x368   :  { %5394 = vmatpush1.bf16.msra.mxu1 %v10741_v25  ;;  %v10813_v25 = vld [vmem:[%s14994_s4 + $0x508] ss:$16 sps:$4 sm:$0xff]  }
 0x369   :  { %5395 = vmatprep.subr.bf16.mxu1 %v10749_v53  ;;  %v10821_v53 = vld [vmem:[%s14994_s4 + $0x52c] ss:$16 sps:$4 sm:$0xff]  }
 0x36a   :  { %5913 = vmatpush1.bf16.msra.mxu0 %v10744_v7  ;;  %v10816_v7 = vld [vmem:[%s14994_s4 + $0x720] ss:$16 sps:$4 sm:$0xff]  }
 0x36b   :  { %5914 = vmatprep.subr.bf16.mxu0 %v10752_v1  ;;  %v10824_v1 = vld [vmem:[%s14994_s4 + $0x744] ss:$16 sps:$4 sm:$0xff]  }
 0x36c   :  { %5396 = vmatpush1.bf16.msra.mxu1 %v10747_v61  ;;  %v10819_v61 = vld [vmem:[%s14994_s4 + $0x528] ss:$16 sps:$4 sm:$0xff]  }
 0x36d   :  { %5397 = vmatprep.subr.bf16.mxu1 %v10755_v16  ;;  %v10827_v16 = vld [vmem:[%s14994_s4 + $0x54c] ss:$16 sps:$4 sm:$0xff]  }
 0x36e   :  { %5915 = vmatpush1.bf16.msra.mxu0 %v10750_v4  ;;  %v10830_v4 = vld [vmem:[%s14994_s4 + $0x764] ss:$16 sps:$4 sm:$0xff]  }
 0x36f   :  { %5916 = vmatprep.subr.bf16.mxu0 %v10758_v27  ;;  %v10825_v27 = vld [vmem:[%s14994_s4 + $0x548] ss:$16 sps:$4 sm:$0xff]  }
 0x370   :  { %5398 = vmatpush1.bf16.msra.mxu1 %v10753_v31  ;;  %v10833_v31 = vld [vmem:[%s14994_s4 + $0x56c] ss:$16 sps:$4 sm:$0xff]  }
 0x371   :  { %5399 = vmatprep.subr.bf16.mxu1 %v10761_v11  ;;  %v10828_v11 = vld [vmem:[%s14994_s4 + $0x760] ss:$16 sps:$4 sm:$0xff]  }
 0x372   :  { %5917 = vmatpush1.bf16.msra.mxu0 %v10756_v40  ;;  %v10836_v40 = vld [vmem:[%s14994_s4 + $0x784] ss:$16 sps:$4 sm:$0xff]  }
 0x373   :  { %6181 = vmatprep.subr.bf16.mxu0 %v10764_v47  ;;  %v10839_v47 = vld [vmem:[%s14994_s4 + $0x58c] ss:$16 sps:$4 sm:$0xff]  }
 0x374   :  { %5400 = vmatpush1.bf16.msra.mxu1 %v10759_v62  ;;  %v10834_v62 = vld [vmem:[%s14994_s4 + $0x780] ss:$16 sps:$4 sm:$0xff]  }
 0x375   :  { %5935 = vmatmul.mubr.bf16.vlgmr.msra.gmra.mrb[80].mxu0 %v13629_v51  ;;  %5664 = vmatprep.subr.bf16.mxu1 %v10767_v60  ;;  %v10842_v60 = vld [vmem:[%s14994_s4 + $0x7a4] ss:$16 sps:$4 sm:$0xff]  }
 0x376   :  { %6182 = vmatpush1.bf16.msra.mxu0 %v10762_v38  ;;  %6213 = vmatprep.mubr.bf16.mxu0 %v15313_v30  ;;  %v10837_v38 = vld [vmem:[%s14994_s4 + $0x588] ss:$16 sps:$4 sm:$0xff]  }
 0x377   :  { %5418 = vmatmul.mubr.bf16.vlgmr.msra.gmra.mrb[20].mxu1 %v13415_v5  ;;  %6183 = vmatprep.subr.bf16.mxu0 %v10770_v35  ;;  %v10774_v5 = vld [vmem:[%s14994_s4 + $0x640] ss:$16 sps:$4 sm:$0xff]   ;;  %v10845_v35 = vld [vmem:[%s14994_s4 + $0x5ac] ss:$16 sps:$4 sm:$0xff]  }
 0x378   :  { %5665 = vmatpush1.bf16.msra.mxu1 %v10765_v6  ;;  %5696 = vmatprep.mubr.bf16.mxu1 %v15313_v30  ;;  %v10840_v6 = vld [vmem:[%s14994_s4 + $0x7a0] ss:$16 sps:$4 sm:$0xff]  }
 0x379   :  { %5666 = vmatprep.subr.bf16.mxu1 %v10773_v33  ;;  %v10848_v33 = vld [vmem:[%s14994_s4 + $0x7c4] ss:$16 sps:$4 sm:$0xff]  }
 0x37a   :  { %6184 = vmatpush1.bf16.msra.mxu0 %v10768_v39  ;;  %v10843_v39 = vld [vmem:[%s14994_s4 + $0x5a8] ss:$16 sps:$4 sm:$0xff]  }
 0x37b   :  { %6185 = vmatprep.subr.bf16.mxu0 %v10776_v41  ;;  %v10851_v41 = vld [vmem:[%s14994_s4 + $0x5cc] ss:$16 sps:$4 sm:$0xff]  }
 0x37c   :  { %5667 = vmatpush1.bf16.msra.mxu1 %v10771_v48  ;;  %v10846_v48 = vld [vmem:[%s14994_s4 + $0x7c0] ss:$16 sps:$4 sm:$0xff]  }
 0x37d   :  { %5668 = vmatprep.subr.bf16.mxu1 %v10779_v14  ;;  %v10854_v14 = vld [vmem:[%s14994_s4 + $0x7e4] ss:$16 sps:$4 sm:$0xff]  }
 0x37e   :  { %6186 = vmatpush1.bf16.msra.mxu0 %v10774_v5  ;;  %v10849_v5 = vld [vmem:[%s14994_s4 + $0x5c8] ss:$16 sps:$4 sm:$0xff]  }
 0x37f   :  { %6187 = vmatprep.subr.bf16.mxu0 %v10782_v20  ;;  %v10857_v20 = vld [vmem:[%s14994_s4 + $0x5ec] ss:$16 sps:$4 sm:$0xff]  }
 0x380   :  { %5669 = vmatpush1.bf16.msra.mxu1 %v10777_v58  ;;  %v10852_v58 = vld [vmem:[%s14994_s4 + $0x7e0] ss:$16 sps:$4 sm:$0xff]  }
 0x381   :  { %5670 = vmatprep.subr.bf16.mxu1 %v10785_v32  ;;  %v4240_v32 = vcombine.high %v13723_v28, %v11350_v42  ;;  %v10879_v28 = vld [vmem:[%s14994_s4 + $0x668] ss:$16 sps:$4 sm:$0xff]  }
 0x382   :  { %6188 = vmatpush1.bf16.msra.mxu0 %v10780_v12  ;;  %v10860_v12 = vld [vmem:[%s14994_s4 + $0x804] ss:$16 sps:$4 sm:$0xff]  }
 0x383   :  { %6189 = vmatprep.subr.bf16.mxu0 %v10788_v15  ;;  %v10855_v15 = vld [vmem:[%s14994_s4 + $0x5e8] ss:$16 sps:$4 sm:$0xff]  }
 0x384   :  { %5671 = vmatpush1.bf16.msra.mxu1 %v10783_v52  ;;  %v10863_v52 = vld [vmem:[%s14994_s4 + $0x60c] ss:$16 sps:$4 sm:$0xff]  }
 0x385   :  { %5672 = vmatprep.subr.bf16.mxu1 %v10791_v36  ;;  %v10858_v36 = vld [vmem:[%s14994_s4 + $0x800] ss:$16 sps:$4 sm:$0xff]  }
 0x386   :  { %6190 = vmatpush1.bf16.msra.mxu0 %v10786_v43  ;;  %v13843_v43 = vpack.c.bf16 %v4240_v32, %v4240_v32  ;;  %v10912_v32 = vld [vmem:[%s14994_s4 + $0x920] ss:$16 sps:$4 sm:$0xff]  }
 0x387   :  { %6191 = vmatprep.subr.bf16.mxu0 %v10794_v63  ;;  %v10866_v63 = vld [vmem:[%s14994_s4 + $0x824] ss:$16 sps:$4 sm:$0xff]  }
 0x388   :  { %5673 = vmatpush1.bf16.msra.mxu1 %v10789_v13  ;;  %v10861_v13 = vld [vmem:[%s14994_s4 + $0x608] ss:$16 sps:$4 sm:$0xff]  }
 0x389   :  { %5674 = vmatprep.subr.bf16.mxu1 %v10797_v21  ;;  %v10869_v21 = vld [vmem:[%s14994_s4 + $0x62c] ss:$16 sps:$4 sm:$0xff]  }
 0x38a   :  { %6192 = vmatpush1.bf16.msra.mxu0 %v10792_v18  ;;  %v10864_v18 = vld [vmem:[%s14994_s4 + $0x820] ss:$16 sps:$4 sm:$0xff]  }
 0x38b   :  { %6193 = vmatprep.subr.bf16.mxu0 %v10800_v8  ;;  %v10872_v8 = vld [vmem:[%s14994_s4 + $0x844] ss:$16 sps:$4 sm:$0xff]  }
 0x38c   :  { %5675 = vmatpush1.bf16.msra.mxu1 %v10795_v54  ;;  %v10867_v54 = vld [vmem:[%s14994_s4 + $0x628] ss:$16 sps:$4 sm:$0xff]  }
 0x38d   :  { %5676 = vmatprep.subr.bf16.mxu1 %v10803_v23  ;;  %v10875_v23 = vld [vmem:[%s14994_s4 + $0x64c] ss:$16 sps:$4 sm:$0xff]  }
 0x38e   :  { %6194 = vmatpush1.bf16.msra.mxu0 %v10798_v17  ;;  %v10878_v17 = vld [vmem:[%s14994_s4 + $0x864] ss:$16 sps:$4 sm:$0xff]  }
 0x38f   :  { %6195 = vmatprep.subr.bf16.mxu0 %v10806_v3  ;;  %v10873_v3 = vld [vmem:[%s14994_s4 + $0x648] ss:$16 sps:$4 sm:$0xff]  }
 0x390   :  { %5677 = vmatpush1.bf16.msra.mxu1 %v10801_v0  ;;  %v10881_v0 = vld [vmem:[%s14994_s4 + $0x66c] ss:$16 sps:$4 sm:$0xff]  }
 0x391   :  { %5678 = vmatprep.subr.bf16.mxu1 %v10809_v29  ;;  %v10876_v29 = vld [vmem:[%s14994_s4 + $0x860] ss:$16 sps:$4 sm:$0xff]  }
 0x392   :  { %6196 = vmatpush1.bf16.msra.mxu0 %v10804_v19  ;;  %v10884_v19 = vld [vmem:[%s14994_s4 + $0x884] ss:$16 sps:$4 sm:$0xff]  }
 0x393   :  { %6460 = vmatprep.subr.bf16.mxu0 %v10812_v49  ;;  %v10887_v49 = vld [vmem:[%s14994_s4 + $0x68c] ss:$16 sps:$4 sm:$0xff]  }
 0x394   :  { %5679 = vmatpush1.bf16.msra.mxu1 %v10807_v57  ;;  %v10882_v57 = vld [vmem:[%s14994_s4 + $0x880] ss:$16 sps:$4 sm:$0xff]  }
 0x395   :  { %6214 = vmatmul.mubr.bf16.vlgmr.msra.gmra.mrb[84].mxu0 %v13739_v24  ;;  %5943 = vmatprep.subr.bf16.mxu1 %v10815_v22  ;;  %v10890_v22 = vld [vmem:[%s14994_s4 + $0x8a4] ss:$16 sps:$4 sm:$0xff]  }
 0x396   :  { %6461 = vmatpush1.bf16.msra.mxu0 %v10810_v37  ;;  %6492 = vmatprep.mubr.bf16.mxu0 %v15313_v30  ;;  %v10885_v37 = vld [vmem:[%s14994_s4 + $0x688] ss:$16 sps:$4 sm:$0xff]  }
 0x397   :  { %5697 = vmatmul.mubr.bf16.vlgmr.msra.gmra.mrb[24].mxu1 %v13525_v44  ;;  %6462 = vmatprep.subr.bf16.mxu0 %v10818_v26  ;;  %v10822_v44 = vld [vmem:[%s14994_s4 + $0x740] ss:$16 sps:$4 sm:$0xff]   ;;  %v10893_v26 = vld [vmem:[%s14994_s4 + $0x6ac] ss:$16 sps:$4 sm:$0xff]  }
 0x398   :  { %5944 = vmatpush1.bf16.msra.mxu1 %v10813_v25  ;;  %5975 = vmatprep.mubr.bf16.mxu1 %v15313_v30  ;;  %v10888_v25 = vld [vmem:[%s14994_s4 + $0x8a0] ss:$16 sps:$4 sm:$0xff]  }
 0x399   :  { %5945 = vmatprep.subr.bf16.mxu1 %v10821_v53  ;;  %v10896_v53 = vld [vmem:[%s14994_s4 + $0x8c4] ss:$16 sps:$4 sm:$0xff]  }
 0x39a   :  { %6463 = vmatpush1.bf16.msra.mxu0 %v10816_v7 }
 0x39b   :  { %6464 = vmatprep.subr.bf16.mxu0 %v10824_v1  ;;  %v10891_v1 = vld [vmem:[%s14994_s4 + $0x6a8] ss:$16 sps:$4 sm:$0xff]  }
 0x39c   :  { %5946 = vmatpush1.bf16.msra.mxu1 %v10819_v61 }
 0x39d   :  { %5947 = vmatprep.subr.bf16.mxu1 %v10827_v16  ;;  %v10899_v16 = vld [vmem:[%s14994_s4 + $0x6cc] ss:$16 sps:$4 sm:$0xff]  }
 0x39e   :  { %6465 = vmatpush1.bf16.msra.mxu0 %v10822_v44 }
 0x39f   :  { %6466 = vmatprep.subr.bf16.mxu0 %v10830_v4 }
 0x3a0   :  { %5948 = vmatpush1.bf16.msra.mxu1 %v10825_v27  ;;  %v10894_v27 = vld [vmem:[%s14994_s4 + $0x8c0] ss:$16 sps:$4 sm:$0xff]  }
 0x3a1   :  { %5949 = vmatprep.subr.bf16.mxu1 %v10833_v31 }
 0x3a2   :  { %6467 = vmatpush1.bf16.msra.mxu0 %v10828_v11 }
 0x3a3   :  { %6468 = vmatprep.subr.bf16.mxu0 %v10836_v40 }
 0x3a4   :  { %5950 = vmatpush1.bf16.msra.mxu1 %v10831_v50  ;;  %v10902_v50 = vld [vmem:[%s14994_s4 + $0x8e4] ss:$16 sps:$4 sm:$0xff]  }
 0x3a5   :  { %5951 = vmatprep.subr.bf16.mxu1 %v10839_v47 }
 0x3a6   :  { %6469 = vmatpush1.bf16.msra.mxu0 %v10834_v62 }
 0x3a7   :  { %6470 = vmatprep.subr.bf16.mxu0 %v10842_v60  ;;  %v10897_v60 = vld [vmem:[%s14994_s4 + $0x6c8] ss:$16 sps:$4 sm:$0xff]  }
 0x3a8   :  { %5952 = vmatpush1.bf16.msra.mxu1 %v10837_v38 }
 0x3a9   :  { %5953 = vmatprep.subr.bf16.mxu1 %v10845_v35  ;;  %v10905_v35 = vld [vmem:[%s14994_s4 + $0x6ec] ss:$16 sps:$4 sm:$0xff]  }
 0x3aa   :  { %6471 = vmatpush1.bf16.msra.mxu0 %v10840_v6  ;;  %v10900_v6 = vld [vmem:[%s14994_s4 + $0x8e0] ss:$16 sps:$4 sm:$0xff]  }
 0x3ab   :  { %6472 = vmatprep.subr.bf16.mxu0 %v10848_v33  ;;  %v13941_v33 = vrot.slane %v4271_v46, %v11614_v10  ;;  %v10906_v46 = vld [vmem:[%s14994_s4 + $0x900] ss:$16 sps:$4 sm:$0xff]  }
 0x3ac   :  { %5954 = vmatpush1.bf16.msra.mxu1 %v10843_v39  ;;  %v10908_v39 = vld [vmem:[%s14994_s4 + $0x904] ss:$16 sps:$4 sm:$0xff]  }
 0x3ad   :  { %5955 = vmatprep.subr.bf16.mxu1 %v10851_v41  ;;  %v10903_v41 = vld [vmem:[%s14994_s4 + $0x6e8] ss:$16 sps:$4 sm:$0xff]  }
 0x3ae   :  { %6473 = vmatpush1.bf16.msra.mxu0 %v10846_v48  ;;  %v10911_v48 = vld [vmem:[%s14994_s4 + $0x70c] ss:$16 sps:$4 sm:$0xff]  }
 0x3af   :  { %6474 = vmatprep.subr.bf16.mxu0 %v10854_v14  ;;  %v13957_v14 = vpack.c.bf16 %v13941_v33, %v13941_v33 }
 0x3b0   :  { %5956 = vmatpush1.bf16.msra.mxu1 %v10849_v5  ;;  %v10914_v5 = vld [vmem:[%s14994_s4 + $0x924] ss:$16 sps:$4 sm:$0xff]  }
 0x3b1   :  { %5957 = vmatprep.subr.bf16.mxu1 %v10857_v20  ;;  %v10909_v20 = vld [vmem:[%s14994_s4 + $0x708] ss:$16 sps:$4 sm:$0xff]  }
 0x3b2   :  { %6475 = vmatpush1.bf16.msra.mxu0 %v10852_v58  ;;  %v10917_v58 = vld [vmem:[%s14994_s4 + $0x72c] ss:$16 sps:$4 sm:$0xff]  }
 0x3b3   :  { %6739 = vmatprep.subr.bf16.mxu0 %v10860_v12  ;;  %v10920_v12 = vld [vmem:[%s14994_s4 + $0x944] ss:$16 sps:$4 sm:$0xff]  }
 0x3b4   :  { %5958 = vmatpush1.bf16.msra.mxu1 %v10855_v15  ;;  %v10915_v15 = vld [vmem:[%s14994_s4 + $0x728] ss:$16 sps:$4 sm:$0xff]  }
 0x3b5   :  { %6493 = vmatmul.mubr.bf16.vlgmr.msra.gmra.mrb[88].mxu0 %v13843_v43  ;;  %6222 = vmatprep.subr.bf16.mxu1 %v10863_v52  ;;  %v10923_v52 = vld [vmem:[%s14994_s4 + $0x74c] ss:$16 sps:$4 sm:$0xff]  }
 0x3b6   :  { %6740 = vmatpush1.bf16.msra.mxu0 %v10858_v36  ;;  %6771 = vmatprep.mubr.bf16.mxu0 %v15313_v30  ;;  %v10926_v36 = vld [vmem:[%s14994_s4 + $0x964] ss:$16 sps:$4 sm:$0xff]  }
 0x3b7   :  { %5976 = vmatmul.mubr.bf16.vlgmr.msra.gmra.mrb[28].mxu1 %v13629_v51  ;;  %6741 = vmatprep.subr.bf16.mxu0 %v10866_v63  ;;  %v10870_v51 = vld [vmem:[%s14994_s4 + $0x840] ss:$16 sps:$4 sm:$0xff]   ;;  %v10921_v63 = vld [vmem:[%s14994_s4 + $0x748] ss:$16 sps:$4 sm:$0xff]  }
 0x3b8   :  { %6223 = vmatpush1.bf16.msra.mxu1 %v10861_v13  ;;  %6254 = vmatprep.mubr.bf16.mxu1 %v15313_v30  ;;  %v10929_v13 = vld [vmem:[%s14994_s4 + $0x76c] ss:$16 sps:$4 sm:$0xff]  }
 0x3b9   :  { %6224 = vmatprep.subr.bf16.mxu1 %v10869_v21  ;;  %v10924_v21 = vld [vmem:[%s14994_s4 + $0x960] ss:$16 sps:$4 sm:$0xff]  }
 0x3ba   :  { %6742 = vmatpush1.bf16.msra.mxu0 %v10864_v18  ;;  %v10932_v18 = vld [vmem:[%s14994_s4 + $0x984] ss:$16 sps:$4 sm:$0xff]  }
 0x3bb   :  { %6743 = vmatprep.subr.bf16.mxu0 %v10872_v8  ;;  %v10927_v8 = vld [vmem:[%s14994_s4 + $0x768] ss:$16 sps:$4 sm:$0xff]  }
 0x3bc   :  { %6225 = vmatpush1.bf16.msra.mxu1 %v10867_v54  ;;  %v10935_v54 = vld [vmem:[%s14994_s4 + $0x78c] ss:$16 sps:$4 sm:$0xff]  }
 0x3bd   :  { %6226 = vmatprep.subr.bf16.mxu1 %v10875_v23  ;;  %v10930_v23 = vld [vmem:[%s14994_s4 + $0x980] ss:$16 sps:$4 sm:$0xff]  }
 0x3be   :  { %6744 = vmatpush1.bf16.msra.mxu0 %v10870_v51  ;;  %v10938_v51 = vld [vmem:[%s14994_s4 + $0x9a4] ss:$16 sps:$4 sm:$0xff]  }
 0x3bf   :  { %6745 = vmatprep.subr.bf16.mxu0 %v10878_v17  ;;  %v10933_v17 = vld [vmem:[%s14994_s4 + $0x788] ss:$16 sps:$4 sm:$0xff]  }
 0x3c0   :  { %6227 = vmatpush1.bf16.msra.mxu1 %v10873_v3  ;;  %v10941_v3 = vld [vmem:[%s14994_s4 + $0x7ac] ss:$16 sps:$4 sm:$0xff]  }
 0x3c1   :  { %6228 = vmatprep.subr.bf16.mxu1 %v10881_v0  ;;  %v10936_v0 = vld [vmem:[%s14994_s4 + $0x9a0] ss:$16 sps:$4 sm:$0xff]  }
 0x3c2   :  { %6746 = vmatpush1.bf16.msra.mxu0 %v10876_v29  ;;  %v10944_v29 = vld [vmem:[%s14994_s4 + $0x9c4] ss:$16 sps:$4 sm:$0xff]  }
 0x3c3   :  { %6747 = vmatprep.subr.bf16.mxu0 %v10884_v19 }
 0x3c4   :  { %6229 = vmatpush1.bf16.msra.mxu1 %v10879_v28  ;;  %v10939_v28 = vld [vmem:[%s14994_s4 + $0x7a8] ss:$16 sps:$4 sm:$0xff]  }
 0x3c5   :  { %6230 = vmatprep.subr.bf16.mxu1 %v10887_v49 }
 0x3c6   :  { %6748 = vmatpush1.bf16.msra.mxu0 %v10882_v57 }
 0x3c7   :  { %6749 = vmatprep.subr.bf16.mxu0 %v10890_v22  ;;  %v10947_v22 = vld [vmem:[%s14994_s4 + $0x7cc] ss:$16 sps:$4 sm:$0xff]  }
 0x3c8   :  { %6231 = vmatpush1.bf16.msra.mxu1 %v10885_v37  ;;  %v4824_v7 = vpop.f32.mrb[64].mxu0 }
 0x3c9   :  { %v4826_v61 = vpop.f32.mrb[65].mxu0  ;;  %6232 = vmatprep.subr.bf16.mxu1 %v10893_v26 }
 0x3ca   :  { %6750 = vmatpush1.bf16.msra.mxu0 %v10888_v25  ;;  %v4582_v44 = vpop.f32.mrb[4].mxu1  ;;  %v4828_v4 = vpop.f32.mrb[66].mxu0 }
 0x3cb   :  { %v13921_v31 = vadd.f32 %v4824_v7, %v4582_v44  ;;  %v4584_v11 = vpop.f32.mrb[5].mxu1  ;;  %v4829_v40 = vpop.f32.mrb[67].mxu0  ;;  %6751 = vmatprep.subr.bf16.mxu0 %v10896_v53  ;;  %v10942_v53 = vld [vmem:[%s14994_s4 + $0x9c0] ss:$16 sps:$4 sm:$0xff]   ;;  %v10945_v44 = vld [vmem:[%s14994_s4 + $0x7c8] ss:$16 sps:$4 sm:$0xff]  }
 0x3cc   :  { %v13926_v47 = vadd.f32 %v4826_v61, %v4584_v11  ;;  %6233 = vmatpush1.bf16.msra.mxu1 %v10891_v1  ;;  %v4586_v62 = vpop.f32.mrb[6].mxu1  ;;  %v10950_v61 = vld [vmem:[%s14994_s4 + $0x9e4] ss:$16 sps:$4 sm:$0xff]   ;;  %v4303_v11 = vcombine.high %v13941_v33, %v11350_v42  ;;  %v10960_v33 = vld [vmem:[%s14994_s4 + $0xa20] ss:$16 sps:$4 sm:$0xff]  }
 0x3cd   :  { %v4587_v38 = vpop.f32.mrb[7].mxu1  ;;  %6234 = vmatprep.subr.bf16.mxu1 %v10899_v16  ;;  %v10956_v40 = vld [vmem:[%s14994_s4 + $0xa04] ss:$16 sps:$4 sm:$0xff]   ;;  %v10954_v62 = vld [vmem:[%s14994_s4 + $0xa00] ss:$16 sps:$4 sm:$0xff]  }
 0x3ce   :  { %6752 = vmatpush1.bf16.msra.mxu0 %v10894_v27  ;;  %v10953_v27 = vld [vmem:[%s14994_s4 + $0x7ec] ss:$16 sps:$4 sm:$0xff]   ;;  %v10962_v38 = vld [vmem:[%s14994_s4 + $0xa24] ss:$16 sps:$4 sm:$0xff]  }
 0x3cf   :  { %6753 = vmatprep.subr.bf16.mxu0 %v10902_v50  ;;  %v10951_v50 = vld [vmem:[%s14994_s4 + $0x7e8] ss:$16 sps:$4 sm:$0xff]  }
 0x3d0   :  { %6235 = vmatpush1.bf16.msra.mxu1 %v10897_v60  ;;  %v14071_v60 = vpack.c.bf16 %v4303_v11, %v4303_v11  ;;  %v11016_v11 = vld [vmem:[%s14994_s4 + $0xb44] ss:$16 sps:$4 sm:$0xff]  }
 0x3d1   :  { %6236 = vmatprep.subr.bf16.mxu1 %v10905_v35  ;;  %v10957_v35 = vld [vmem:[%s14994_s4 + $0x808] ss:$16 sps:$4 sm:$0xff]  }
 0x3d2   :  { %6754 = vmatpush1.bf16.msra.mxu0 %v10900_v6  ;;  %v10965_v6 = vld [vmem:[%s14994_s4 + $0x82c] ss:$16 sps:$4 sm:$0xff]  }
 0x3d3   :  { %7018 = vmatprep.subr.bf16.mxu0 %v10908_v39  ;;  %v10968_v39 = vld [vmem:[%s14994_s4 + $0xa44] ss:$16 sps:$4 sm:$0xff]  }
 0x3d4   :  { %6237 = vmatpush1.bf16.msra.mxu1 %v10903_v41  ;;  %v10963_v41 = vld [vmem:[%s14994_s4 + $0x828] ss:$16 sps:$4 sm:$0xff]  }
 0x3d5   :  { %6772 = vmatmul.mubr.bf16.vlgmr.msra.gmra.mrb[92].mxu0 %v13957_v14  ;;  %6501 = vmatprep.subr.bf16.mxu1 %v10911_v48  ;;  %v10971_v48 = vld [vmem:[%s14994_s4 + $0x84c] ss:$16 sps:$4 sm:$0xff]  }
 0x3d6   :  { %7019 = vmatpush1.bf16.msra.mxu0 %v10906_v46  ;;  %7050 = vmatprep.mubr.bf16.mxu0 %v15313_v30  ;;  %v10974_v46 = vld [vmem:[%s14994_s4 + $0xa64] ss:$16 sps:$4 sm:$0xff]  }
 0x3d7   :  { %6255 = vmatmul.mubr.bf16.vlgmr.msra.gmra.mrb[32].mxu1 %v13739_v24  ;;  %7020 = vmatprep.subr.bf16.mxu0 %v10914_v5  ;;  %v10918_v24 = vld [vmem:[%s14994_s4 + $0x940] ss:$16 sps:$4 sm:$0xff]   ;;  %v10969_v5 = vld [vmem:[%s14994_s4 + $0x848] ss:$16 sps:$4 sm:$0xff]  }
 0x3d8   :  { %6502 = vmatpush1.bf16.msra.mxu1 %v10909_v20  ;;  %6533 = vmatprep.mubr.bf16.mxu1 %v15313_v30  ;;  %v10977_v20 = vld [vmem:[%s14994_s4 + $0x86c] ss:$16 sps:$4 sm:$0xff]  }
 0x3d9   :  { %6503 = vmatprep.subr.bf16.mxu1 %v10917_v58  ;;  %v10972_v58 = vld [vmem:[%s14994_s4 + $0xa60] ss:$16 sps:$4 sm:$0xff]  }
 0x3da   :  { %7021 = vmatpush1.bf16.msra.mxu0 %v10912_v32  ;;  %v10980_v32 = vld [vmem:[%s14994_s4 + $0xa84] ss:$16 sps:$4 sm:$0xff]  }
 0x3db   :  { %7022 = vmatprep.subr.bf16.mxu0 %v10920_v12  ;;  %v10975_v12 = vld [vmem:[%s14994_s4 + $0x868] ss:$16 sps:$4 sm:$0xff]  }
 0x3dc   :  { %6504 = vmatpush1.bf16.msra.mxu1 %v10915_v15  ;;  %v10983_v15 = vld [vmem:[%s14994_s4 + $0x88c] ss:$16 sps:$4 sm:$0xff]  }
 0x3dd   :  { %6505 = vmatprep.subr.bf16.mxu1 %v10923_v52  ;;  %v10978_v52 = vld [vmem:[%s14994_s4 + $0xa80] ss:$16 sps:$4 sm:$0xff]  }
 0x3de   :  { %7023 = vmatpush1.bf16.msra.mxu0 %v10918_v24  ;;  %v10986_v24 = vld [vmem:[%s14994_s4 + $0xaa4] ss:$16 sps:$4 sm:$0xff]  }
 0x3df   :  { %7024 = vmatprep.subr.bf16.mxu0 %v10926_v36  ;;  %v10981_v36 = vld [vmem:[%s14994_s4 + $0x888] ss:$16 sps:$4 sm:$0xff]  }
 0x3e0   :  { %6506 = vmatpush1.bf16.msra.mxu1 %v10921_v63  ;;  %v10989_v63 = vld [vmem:[%s14994_s4 + $0x8ac] ss:$16 sps:$4 sm:$0xff]  }
 0x3e1   :  { %6507 = vmatprep.subr.bf16.mxu1 %v10929_v13  ;;  %v10984_v13 = vld [vmem:[%s14994_s4 + $0xaa0] ss:$16 sps:$4 sm:$0xff]  }
 0x3e2   :  { %7025 = vmatpush1.bf16.msra.mxu0 %v10924_v21  ;;  %v10992_v21 = vld [vmem:[%s14994_s4 + $0xac4] ss:$16 sps:$4 sm:$0xff]  }
 0x3e3   :  { %7026 = vmatprep.subr.bf16.mxu0 %v10932_v18 }
 0x3e4   :  { %6508 = vmatpush1.bf16.msra.mxu1 %v10927_v8  ;;  %v10987_v8 = vld [vmem:[%s14994_s4 + $0x8a8] ss:$16 sps:$4 sm:$0xff]  }
 0x3e5   :  { %6509 = vmatprep.subr.bf16.mxu1 %v10935_v54 }
 0x3e6   :  { %7027 = vmatpush1.bf16.msra.mxu0 %v10930_v23 }
 0x3e7   :  { %7028 = vmatprep.subr.bf16.mxu0 %v10938_v51  ;;  %v10995_v51 = vld [vmem:[%s14994_s4 + $0x8cc] ss:$16 sps:$4 sm:$0xff]  }
 0x3e8   :  { %v5099_v19 = vpop.f32.mrb[68].mxu0  ;;  %6510 = vmatpush1.bf16.msra.mxu1 %v10933_v17 }
 0x3e9   :  { %v14030_v49 = vadd.f32 %v5099_v19, %v13921_v31  ;;  %v5101_v57 = vpop.f32.mrb[69].mxu0  ;;  %6511 = vmatprep.subr.bf16.mxu1 %v10941_v3  ;;  %v10948_v31 = vld [vmem:[%s14994_s4 + $0x9e0] ss:$16 sps:$4 sm:$0xff]  }
 0x3ea   :  { %v14036_v37 = vadd.f32 %v5101_v57, %v13926_v47  ;;  %v14038_v26 = vpop.f32.mrb[8].mxu1  ;;  %v5103_v25 = vpop.f32.mrb[70].mxu0  ;;  %7029 = vmatpush1.bf16.msra.mxu0 %v10936_v0  ;;  %v10959_v47 = vld [vmem:[%s14994_s4 + $0x80c] ss:$16 sps:$4 sm:$0xff]   ;;  %v10998_v57 = vld [vmem:[%s14994_s4 + $0xae4] ss:$16 sps:$4 sm:$0xff]  }
 0x3eb   :  { %v14043_v7 = vpop.f32.mrb[9].mxu1  ;;  %v5104_v1 = vpop.f32.mrb[71].mxu0  ;;  %7030 = vmatprep.subr.bf16.mxu0 %v10944_v29  ;;  %v10990_v29 = vld [vmem:[%s14994_s4 + $0xac0] ss:$16 sps:$4 sm:$0xff]   ;;  %v10993_v25 = vld [vmem:[%s14994_s4 + $0x8c8] ss:$16 sps:$4 sm:$0xff]  }
 0x3ec   :  { %v4627_v16 = vpop.f32.mrb[10].mxu1  ;;  %6512 = vmatpush1.bf16.msra.mxu1 %v10939_v28  ;;  %v10996_v1 = vld [vmem:[%s14994_s4 + $0xae0] ss:$16 sps:$4 sm:$0xff]  }
 0x3ed   :  { %v4628_v4 = vpop.f32.mrb[11].mxu1  ;;  %6513 = vmatprep.subr.bf16.mxu1 %v10947_v22  ;;  %v10999_v16 = vld [vmem:[%s14994_s4 + $0x8e8] ss:$16 sps:$4 sm:$0xff]  }
 0x3ee   :  { %7031 = vmatpush1.bf16.msra.mxu0 %v10942_v53  ;;  %v11005_v4 = vld [vmem:[%s14994_s4 + $0x908] ss:$16 sps:$4 sm:$0xff]  }
 0x3ef   :  { %7032 = vmatprep.subr.bf16.mxu0 %v10950_v61  ;;  %v11004_v61 = vld [vmem:[%s14994_s4 + $0xb04] ss:$16 sps:$4 sm:$0xff]  }
 0x3f0   :  { %6514 = vmatpush1.bf16.msra.mxu1 %v10945_v44  ;;  %v11007_v44 = vld [vmem:[%s14994_s4 + $0x90c] ss:$16 sps:$4 sm:$0xff]  }
 0x3f1   :  { %6515 = vmatprep.subr.bf16.mxu1 %v10953_v27  ;;  %v11013_v27 = vld [vmem:[%s14994_s4 + $0x92c] ss:$16 sps:$4 sm:$0xff]  }
 0x3f2   :  { %7033 = vmatpush1.bf16.msra.mxu0 %v10948_v31  ;;  %v11008_v31 = vld [vmem:[%s14994_s4 + $0xb20] ss:$16 sps:$4 sm:$0xff]  }
 0x3f3   :  { %7297 = vmatprep.subr.bf16.mxu0 %v10956_v40  ;;  %v11011_v40 = vld [vmem:[%s14994_s4 + $0x928] ss:$16 sps:$4 sm:$0xff]  }
 0x3f4   :  { %6516 = vmatpush1.bf16.msra.mxu1 %v10951_v50  ;;  %v11019_v50 = vld [vmem:[%s14994_s4 + $0x94c] ss:$16 sps:$4 sm:$0xff]  }
 0x3f5   :  { %7051 = vmatmul.mubr.bf16.vlgmr.msra.gmra.mrb[96].mxu0 %v14071_v60  ;;  %6780 = vmatprep.subr.bf16.mxu1 %v10959_v47  ;;  %v11022_v47 = vld [vmem:[%s14994_s4 + $0xb64] ss:$16 sps:$4 sm:$0xff]  }
 0x3f6   :  { %7298 = vmatpush1.bf16.msra.mxu0 %v10954_v62  ;;  %7329 = vmatprep.mubr.bf16.mxu0 %v15313_v30  ;;  %v11017_v62 = vld [vmem:[%s14994_s4 + $0x948] ss:$16 sps:$4 sm:$0xff]  }
 0x3f7   :  { %6534 = vmatmul.mubr.bf16.vlgmr.msra.gmra.mrb[36].mxu1 %v13843_v43  ;;  %7299 = vmatprep.subr.bf16.mxu0 %v10962_v38  ;;  %v10966_v43 = vld [vmem:[%s14994_s4 + $0xa40] ss:$16 sps:$4 sm:$0xff]   ;;  %v11025_v38 = vld [vmem:[%s14994_s4 + $0x96c] ss:$16 sps:$4 sm:$0xff]  }
 0x3f8   :  { %6781 = vmatpush1.bf16.msra.mxu1 %v10957_v35  ;;  %6812 = vmatprep.mubr.bf16.mxu1 %v15313_v30  ;;  %v11020_v35 = vld [vmem:[%s14994_s4 + $0xb60] ss:$16 sps:$4 sm:$0xff]  }
 0x3f9   :  { %6782 = vmatprep.subr.bf16.mxu1 %v10965_v6  ;;  %v11028_v6 = vld [vmem:[%s14994_s4 + $0xb84] ss:$16 sps:$4 sm:$0xff]  }
 0x3fa   :  { %7300 = vmatpush1.bf16.msra.mxu0 %v10960_v33  ;;  %v11023_v33 = vld [vmem:[%s14994_s4 + $0x968] ss:$16 sps:$4 sm:$0xff]  }
 0x3fb   :  { %7301 = vmatprep.subr.bf16.mxu0 %v10968_v39  ;;  %v11031_v39 = vld [vmem:[%s14994_s4 + $0x98c] ss:$16 sps:$4 sm:$0xff]  }
 0x3fc   :  { %6783 = vmatpush1.bf16.msra.mxu1 %v10963_v41  ;;  %v11026_v41 = vld [vmem:[%s14994_s4 + $0xb80] ss:$16 sps:$4 sm:$0xff]  }
 0x3fd   :  { %6784 = vmatprep.subr.bf16.mxu1 %v10971_v48  ;;  %v11034_v48 = vld [vmem:[%s14994_s4 + $0xba4] ss:$16 sps:$4 sm:$0xff]  }
 0x3fe   :  { %7302 = vmatpush1.bf16.msra.mxu0 %v10966_v43  ;;  %v11029_v43 = vld [vmem:[%s14994_s4 + $0x988] ss:$16 sps:$4 sm:$0xff]  }
 0x3ff   :  { %7303 = vmatprep.subr.bf16.mxu0 %v10974_v46  ;;  %v11037_v46 = vld [vmem:[%s14994_s4 + $0x9ac] ss:$16 sps:$4 sm:$0xff]  }
 0x400   :  { %6785 = vmatpush1.bf16.msra.mxu1 %v10969_v5  ;;  %v11032_v5 = vld [vmem:[%s14994_s4 + $0xba0] ss:$16 sps:$4 sm:$0xff]  }
 0x401   :  { %6786 = vmatprep.subr.bf16.mxu1 %v10977_v20  ;;  %v11040_v20 = vld [vmem:[%s14994_s4 + $0xbc4] ss:$16 sps:$4 sm:$0xff]  }
 0x402   :  { %7304 = vmatpush1.bf16.msra.mxu0 %v10972_v58 }
 0x403   :  { %7305 = vmatprep.subr.bf16.mxu0 %v10980_v32  ;;  %v11035_v32 = vld [vmem:[%s14994_s4 + $0x9a8] ss:$16 sps:$4 sm:$0xff]  }
 0x404   :  { %6787 = vmatpush1.bf16.msra.mxu1 %v10975_v12 }
 0x405   :  { %6788 = vmatprep.subr.bf16.mxu1 %v10983_v15 }
 0x406   :  { %7306 = vmatpush1.bf16.msra.mxu0 %v10978_v52  ;;  %v11043_v52 = vld [vmem:[%s14994_s4 + $0x9cc] ss:$16 sps:$4 sm:$0xff]  }
 0x407   :  { %7307 = vmatprep.subr.bf16.mxu0 %v10986_v24 }
 0x408   :  { %v5378_v18 = vpop.f32.mrb[72].mxu0  ;;  %6789 = vmatpush1.bf16.msra.mxu1 %v10981_v36 }
 0x409   :  { %v14144_v54 = vadd.f32 %v5378_v18, %v14030_v49  ;;  %v5380_v23 = vpop.f32.mrb[73].mxu0  ;;  %6790 = vmatprep.subr.bf16.mxu1 %v10989_v63 }
 0x40a   :  { %v14150_v17 = vadd.f32 %v5380_v23, %v14036_v37  ;;  %v4865_v3 = vpop.f32.mrb[12].mxu1  ;;  %v5382_v0 = vpop.f32.mrb[74].mxu0  ;;  %7308 = vmatpush1.bf16.msra.mxu0 %v10984_v13  ;;  %v11038_v13 = vld [vmem:[%s14994_s4 + $0xbc0] ss:$16 sps:$4 sm:$0xff]  }
 0x40b   :  { %v14156_v19 = vadd.f32 %v4865_v3, %v14038_v26  ;;  %v4867_v28 = vpop.f32.mrb[13].mxu1  ;;  %v5383_v49 = vpop.f32.mrb[75].mxu0  ;;  %7309 = vmatprep.subr.bf16.mxu0 %v10992_v21  ;;  %v11001_v26 = vld [vmem:[%s14994_s4 + $0x8ec] ss:$16 sps:$4 sm:$0xff]  }
 0x40c   :  { %v14162_v22 = vadd.f32 %v4867_v28, %v14043_v7  ;;  %v4869_v37 = vpop.f32.mrb[14].mxu1  ;;  %6791 = vmatpush1.bf16.msra.mxu1 %v10987_v8  ;;  %v14177_v7 = vrot.slane %v4272_v56, %v11614_v10  ;;  %v11010_v56 = vld [vmem:[%s14994_s4 + $0xb24] ss:$16 sps:$4 sm:$0xff]   ;;  %v11049_v0 = vld [vmem:[%s14994_s4 + $0x9ec] ss:$16 sps:$4 sm:$0xff]  }
 0x40d   :  { %v4870_v53 = vpop.f32.mrb[15].mxu1  ;;  %6792 = vmatprep.subr.bf16.mxu1 %v10995_v51  ;;  %v11052_v28 = vld [vmem:[%s14994_s4 + $0xc04] ss:$16 sps:$4 sm:$0xff]   ;;  %v11047_v49 = vld [vmem:[%s14994_s4 + $0x9e8] ss:$16 sps:$4 sm:$0xff]  }
 0x40e   :  { %7310 = vmatpush1.bf16.msra.mxu0 %v10990_v29  ;;  %v14193_v59 = vpack.c.bf16 %v14177_v7, %v14177_v7  ;;  %v11044_v29 = vld [vmem:[%s14994_s4 + $0xbe0] ss:$16 sps:$4 sm:$0xff]   ;;  %v11053_v53 = vld [vmem:[%s14994_s4 + $0xa08] ss:$16 sps:$4 sm:$0xff]  }
 0x40f   :  { %7311 = vmatprep.subr.bf16.mxu0 %v10998_v57  ;;  %v11055_v57 = vld [vmem:[%s14994_s4 + $0xa0c] ss:$16 sps:$4 sm:$0xff]  }
 0x410   :  { %6793 = vmatpush1.bf16.msra.mxu1 %v10993_v25  ;;  %v11058_v25 = vld [vmem:[%s14994_s4 + $0xc24] ss:$16 sps:$4 sm:$0xff]  }
 0x411   :  { %6794 = vmatprep.subr.bf16.mxu1 %v11001_v26  ;;  %v11061_v26 = vld [vmem:[%s14994_s4 + $0xa2c] ss:$16 sps:$4 sm:$0xff]  }
 0x412   :  { %7312 = vmatpush1.bf16.msra.mxu0 %v10996_v1  ;;  %v11056_v1 = vld [vmem:[%s14994_s4 + $0xc20] ss:$16 sps:$4 sm:$0xff]  }
 0x413   :  { %7576 = vmatprep.subr.bf16.mxu0 %v11004_v61  ;;  %v11059_v61 = vld [vmem:[%s14994_s4 + $0xa28] ss:$16 sps:$4 sm:$0xff]  }
 0x414   :  { %6795 = vmatpush1.bf16.msra.mxu1 %v10999_v16  ;;  %v11067_v16 = vld [vmem:[%s14994_s4 + $0xa4c] ss:$16 sps:$4 sm:$0xff]  }
 0x415   :  { %7330 = vmatmul.mubr.bf16.vlgmr.msra.gmra.mrb[100].mxu0 %v14193_v59  ;;  %7059 = vmatprep.subr.bf16.mxu1 %v11007_v44  ;;  %v11070_v44 = vld [vmem:[%s14994_s4 + $0xc64] ss:$16 sps:$4 sm:$0xff]  }
 0x416   :  { %7577 = vmatpush1.bf16.msra.mxu0 %v11002_v34  ;;  %7608 = vmatprep.mubr.bf16.mxu0 %v15313_v30  ;;  %v11065_v34 = vld [vmem:[%s14994_s4 + $0xa48] ss:$16 sps:$4 sm:$0xff]  }
 0x417   :  { %6813 = vmatmul.mubr.bf16.vlgmr.msra.gmra.mrb[40].mxu1 %v13957_v14  ;;  %7578 = vmatprep.subr.bf16.mxu0 %v11010_v56  ;;  %v11014_v14 = vld [vmem:[%s14994_s4 + $0xb40] ss:$16 sps:$4 sm:$0xff]   ;;  %v11073_v56 = vld [vmem:[%s14994_s4 + $0xa6c] ss:$16 sps:$4 sm:$0xff]  }
 0x418   :  { %7060 = vmatpush1.bf16.msra.mxu1 %v11005_v4  ;;  %7091 = vmatprep.mubr.bf16.mxu1 %v15313_v30  ;;  %v11068_v4 = vld [vmem:[%s14994_s4 + $0xc60] ss:$16 sps:$4 sm:$0xff]  }
 0x419   :  { %7061 = vmatprep.subr.bf16.mxu1 %v11013_v27  ;;  %v11076_v27 = vld [vmem:[%s14994_s4 + $0xc84] ss:$16 sps:$4 sm:$0xff]  }
 0x41a   :  { %7579 = vmatpush1.bf16.msra.mxu0 %v11008_v31  ;;  %v11071_v31 = vld [vmem:[%s14994_s4 + $0xa68] ss:$16 sps:$4 sm:$0xff]  }
 0x41b   :  { %7580 = vmatprep.subr.bf16.mxu0 %v11016_v11  ;;  %v11079_v11 = vld [vmem:[%s14994_s4 + $0xa8c] ss:$16 sps:$4 sm:$0xff]  }
 0x41c   :  { %7062 = vmatpush1.bf16.msra.mxu1 %v11011_v40  ;;  %v11074_v40 = vld [vmem:[%s14994_s4 + $0xc80] ss:$16 sps:$4 sm:$0xff]  }
 0x41d   :  { %7063 = vmatprep.subr.bf16.mxu1 %v11019_v50  ;;  %v11082_v50 = vld [vmem:[%s14994_s4 + $0xca4] ss:$16 sps:$4 sm:$0xff]  }
 0x41e   :  { %7581 = vmatpush1.bf16.msra.mxu0 %v11014_v14  ;;  %v11077_v14 = vld [vmem:[%s14994_s4 + $0xa88] ss:$16 sps:$4 sm:$0xff]  }
 0x41f   :  { %7582 = vmatprep.subr.bf16.mxu0 %v11022_v47  ;;  %v11085_v47 = vld [vmem:[%s14994_s4 + $0xaac] ss:$16 sps:$4 sm:$0xff]  }
 0x420   :  { %7064 = vmatpush1.bf16.msra.mxu1 %v11017_v62  ;;  %v11080_v62 = vld [vmem:[%s14994_s4 + $0xca0] ss:$16 sps:$4 sm:$0xff]  }
 0x421   :  { %7065 = vmatprep.subr.bf16.mxu1 %v11025_v38  ;;  %v11088_v38 = vld [vmem:[%s14994_s4 + $0xcc4] ss:$16 sps:$4 sm:$0xff]  }
 0x422   :  { %7583 = vmatpush1.bf16.msra.mxu0 %v11020_v35 }
 0x423   :  { %7584 = vmatprep.subr.bf16.mxu0 %v11028_v6  ;;  %v11083_v6 = vld [vmem:[%s14994_s4 + $0xaa8] ss:$16 sps:$4 sm:$0xff]  }
 0x424   :  { %7066 = vmatpush1.bf16.msra.mxu1 %v11023_v33 }
 0x425   :  { %7067 = vmatprep.subr.bf16.mxu1 %v11031_v39 }
 0x426   :  { %7585 = vmatpush1.bf16.msra.mxu0 %v11026_v41  ;;  %v11091_v41 = vld [vmem:[%s14994_s4 + $0xacc] ss:$16 sps:$4 sm:$0xff]  }
 0x427   :  { %7586 = vmatprep.subr.bf16.mxu0 %v11034_v48 }
 0x428   :  { %v5657_v58 = vpop.f32.mrb[76].mxu0  ;;  %7068 = vmatpush1.bf16.msra.mxu1 %v11029_v43 }
 0x429   :  { %v14266_v12 = vadd.f32 %v5657_v58, %v14144_v54  ;;  %v5659_v15 = vpop.f32.mrb[77].mxu0  ;;  %7069 = vmatprep.subr.bf16.mxu1 %v11037_v46  ;;  %v11046_v54 = vld [vmem:[%s14994_s4 + $0xbe4] ss:$16 sps:$4 sm:$0xff]  }
 0x42a   :  { %v14272_v24 = vadd.f32 %v5659_v15, %v14150_v17  ;;  %v5140_v36 = vpop.f32.mrb[16].mxu1  ;;  %v5661_v63 = vpop.f32.mrb[78].mxu0  ;;  %7587 = vmatpush1.bf16.msra.mxu0 %v11032_v5  ;;  %v11041_v17 = vld [vmem:[%s14994_s4 + $0x9c8] ss:$16 sps:$4 sm:$0xff]   ;;  %v11086_v5 = vld [vmem:[%s14994_s4 + $0xcc0] ss:$16 sps:$4 sm:$0xff]  }
 0x42b   :  { %v14278_v21 = vadd.f32 %v5140_v36, %v14156_v19  ;;  %v5142_v18 = vpop.f32.mrb[17].mxu1  ;;  %v5662_v8 = vpop.f32.mrb[79].mxu0  ;;  %7588 = vmatprep.subr.bf16.mxu0 %v11040_v20  ;;  %v4304_v19 = vcombine.high %v14177_v7, %v11350_v42  ;;  %v11064_v7 = vld [vmem:[%s14994_s4 + $0xc44] ss:$16 sps:$4 sm:$0xff]   ;;  %v11097_v63 = vld [vmem:[%s14994_s4 + $0xaec] ss:$16 sps:$4 sm:$0xff]  }
 0x42c   :  { %v14284_v23 = vadd.f32 %v5142_v18, %v14162_v22  ;;  %v5144_v51 = vpop.f32.mrb[18].mxu1  ;;  %7070 = vmatpush1.bf16.msra.mxu1 %v11035_v32  ;;  %v11050_v22 = vld [vmem:[%s14994_s4 + $0xc00] ss:$16 sps:$4 sm:$0xff]   ;;  %v11100_v18 = vld [vmem:[%s14994_s4 + $0xd04] ss:$16 sps:$4 sm:$0xff]  }
 0x42d   :  { %v5145_v3 = vpop.f32.mrb[19].mxu1  ;;  %7071 = vmatprep.subr.bf16.mxu1 %v11043_v52  ;;  %v14309_v37 = vpack.c.bf16 %v4304_v19, %v4304_v19  ;;  %v11095_v8 = vld [vmem:[%s14994_s4 + $0xae8] ss:$16 sps:$4 sm:$0xff]   ;;  %v11106_v51 = vld [vmem:[%s14994_s4 + $0xd24] ss:$16 sps:$4 sm:$0xff]  }
 0x42e   :  { %7589 = vmatpush1.bf16.msra.mxu0 %v11038_v13  ;;  %v11092_v13 = vld [vmem:[%s14994_s4 + $0xce0] ss:$16 sps:$4 sm:$0xff]   ;;  %v11109_v3 = vld [vmem:[%s14994_s4 + $0xb2c] ss:$16 sps:$4 sm:$0xff]   ;;  %v11107_v19 = vld [vmem:[%s14994_s4 + $0xb28] ss:$16 sps:$4 sm:$0xff]  }
 0x42f   :  { %7590 = vmatprep.subr.bf16.mxu0 %v11046_v54  ;;  %v11103_v54 = vld [vmem:[%s14994_s4 + $0xb0c] ss:$16 sps:$4 sm:$0xff]  }
 0x430   :  { %7072 = vmatpush1.bf16.msra.mxu1 %v11041_v17  ;;  %v11101_v17 = vld [vmem:[%s14994_s4 + $0xb08] ss:$16 sps:$4 sm:$0xff]  }
 0x431   :  { %7073 = vmatprep.subr.bf16.mxu1 %v11049_v0  ;;  %v11104_v0 = vld [vmem:[%s14994_s4 + $0xd20] ss:$16 sps:$4 sm:$0xff]  }
 0x432   :  { %7591 = vmatpush1.bf16.msra.mxu0 %v11044_v29  ;;  %v11112_v29 = vld [vmem:[%s14994_s4 + $0xd44] ss:$16 sps:$4 sm:$0xff]  }
 0x433   :  { %7855 = vmatprep.subr.bf16.mxu0 %v11052_v28  ;;  %v11115_v28 = vld [vmem:[%s14994_s4 + $0xb4c] ss:$16 sps:$4 sm:$0xff]  }
 0x434   :  { %7074 = vmatpush1.bf16.msra.mxu1 %v11047_v49  ;;  %v11118_v49 = vld [vmem:[%s14994_s4 + $0xd64] ss:$16 sps:$4 sm:$0xff]  }
 0x435   :  { %7609 = vmatmul.mubr.bf16.vlgmr.msra.gmra.mrb[104].mxu0 %v14309_v37  ;;  %7338 = vmatprep.subr.bf16.mxu1 %v11055_v57  ;;  %v11113_v57 = vld [vmem:[%s14994_s4 + $0xb48] ss:$16 sps:$4 sm:$0xff]  }
 0x436   :  { %7856 = vmatpush1.bf16.msra.mxu0 %v11050_v22  ;;  %7887 = vmatprep.mubr.bf16.mxu0 %v15313_v30  ;;  %v11121_v22 = vld [vmem:[%s14994_s4 + $0xb6c] ss:$16 sps:$4 sm:$0xff]  }
 0x437   :  { %7092 = vmatmul.mubr.bf16.vlgmr.msra.gmra.mrb[44].mxu1 %v14071_v60  ;;  %7857 = vmatprep.subr.bf16.mxu0 %v11058_v25  ;;  %v11062_v60 = vld [vmem:[%s14994_s4 + $0xc40] ss:$16 sps:$4 sm:$0xff]  }
 0x438   :  { %7339 = vmatpush1.bf16.msra.mxu1 %v11053_v53  ;;  %7370 = vmatprep.mubr.bf16.mxu1 %v15313_v30  ;;  %v11116_v25 = vld [vmem:[%s14994_s4 + $0xd60] ss:$16 sps:$4 sm:$0xff]   ;;  %v11124_v53 = vld [vmem:[%s14994_s4 + $0xd84] ss:$16 sps:$4 sm:$0xff]  }
 0x439   :  { %7340 = vmatprep.subr.bf16.mxu1 %v11061_v26  ;;  %v11119_v26 = vld [vmem:[%s14994_s4 + $0xb68] ss:$16 sps:$4 sm:$0xff]  }
 0x43a   :  { %7858 = vmatpush1.bf16.msra.mxu0 %v11056_v1  ;;  %v11127_v1 = vld [vmem:[%s14994_s4 + $0xb8c] ss:$16 sps:$4 sm:$0xff]  }
 0x43b   :  { %7859 = vmatprep.subr.bf16.mxu0 %v11064_v7  ;;  %v11122_v7 = vld [vmem:[%s14994_s4 + $0xd80] ss:$16 sps:$4 sm:$0xff]  }
 0x43c   :  { %7341 = vmatpush1.bf16.msra.mxu1 %v11059_v61  ;;  %v11130_v61 = vld [vmem:[%s14994_s4 + $0xda4] ss:$16 sps:$4 sm:$0xff]  }
 0x43d   :  { %7342 = vmatprep.subr.bf16.mxu1 %v11067_v16  ;;  %v11125_v16 = vld [vmem:[%s14994_s4 + $0xb88] ss:$16 sps:$4 sm:$0xff]  }
 0x43e   :  { %7860 = vmatpush1.bf16.msra.mxu0 %v11062_v60  ;;  %v11133_v60 = vld [vmem:[%s14994_s4 + $0xbac] ss:$16 sps:$4 sm:$0xff]  }
 0x43f   :  { %7861 = vmatprep.subr.bf16.mxu0 %v11070_v44  ;;  %v11128_v44 = vld [vmem:[%s14994_s4 + $0xda0] ss:$16 sps:$4 sm:$0xff]  }
 0x440   :  { %7343 = vmatpush1.bf16.msra.mxu1 %v11065_v34  ;;  %v11136_v34 = vld [vmem:[%s14994_s4 + $0xdc4] ss:$16 sps:$4 sm:$0xff]  }
 0x441   :  { %7344 = vmatprep.subr.bf16.mxu1 %v11073_v56 }
 0x442   :  { %7862 = vmatpush1.bf16.msra.mxu0 %v11068_v4  ;;  %v11131_v4 = vld [vmem:[%s14994_s4 + $0xba8] ss:$16 sps:$4 sm:$0xff]  }
 0x443   :  { %7863 = vmatprep.subr.bf16.mxu0 %v11076_v27 }
 0x444   :  { %7345 = vmatpush1.bf16.msra.mxu1 %v11071_v31 }
 0x445   :  { %7346 = vmatprep.subr.bf16.mxu1 %v11079_v11  ;;  %v11139_v11 = vld [vmem:[%s14994_s4 + $0xbcc] ss:$16 sps:$4 sm:$0xff]  }
 0x446   :  { %7864 = vmatpush1.bf16.msra.mxu0 %v11074_v40 }
 0x447   :  { %7865 = vmatprep.subr.bf16.mxu0 %v11082_v50 }
 0x448   :  { %v5936_v35 = vpop.f32.mrb[80].mxu0  ;;  %7347 = vmatpush1.bf16.msra.mxu1 %v11077_v14 }
 0x449   :  { %v14382_v33 = vadd.f32 %v5936_v35, %v14266_v12  ;;  %v5938_v39 = vpop.f32.mrb[81].mxu0  ;;  %7348 = vmatprep.subr.bf16.mxu1 %v11085_v47  ;;  %v11094_v12 = vld [vmem:[%s14994_s4 + $0xce4] ss:$16 sps:$4 sm:$0xff]   ;;  %v11134_v47 = vld [vmem:[%s14994_s4 + $0xdc0] ss:$16 sps:$4 sm:$0xff]  }
 0x44a   :  { %v14388_v48 = vadd.f32 %v5938_v39, %v14272_v24  ;;  %v5419_v43 = vpop.f32.mrb[20].mxu1  ;;  %v5940_v46 = vpop.f32.mrb[82].mxu0  ;;  %7866 = vmatpush1.bf16.msra.mxu0 %v11080_v62  ;;  %v11089_v24 = vld [vmem:[%s14994_s4 + $0xac8] ss:$16 sps:$4 sm:$0xff]  }
 0x44b   :  { %v14394_v20 = vadd.f32 %v5419_v43, %v14278_v21  ;;  %v5421_v58 = vpop.f32.mrb[21].mxu1  ;;  %v5941_v32 = vpop.f32.mrb[83].mxu0  ;;  %7867 = vmatprep.subr.bf16.mxu0 %v11088_v38  ;;  %v14415_v21 = vrot.slane %v4287_v9, %v11614_v10  ;;  %v11098_v9 = vld [vmem:[%s14994_s4 + $0xd00] ss:$16 sps:$4 sm:$0xff]   ;;  %v11145_v43 = vld [vmem:[%s14994_s4 + $0xbec] ss:$16 sps:$4 sm:$0xff]  }
 0x44c   :  { %v14400_v15 = vadd.f32 %v5421_v58, %v14284_v23  ;;  %v5423_v52 = vpop.f32.mrb[22].mxu1  ;;  %7349 = vmatpush1.bf16.msra.mxu1 %v11083_v6  ;;  %v11142_v6 = vld [vmem:[%s14994_s4 + $0xde4] ss:$16 sps:$4 sm:$0xff]   ;;  %v11140_v46 = vld [vmem:[%s14994_s4 + $0xde0] ss:$16 sps:$4 sm:$0xff]  }
 0x44d   :  { %v5424_v36 = vpop.f32.mrb[23].mxu1  ;;  %7350 = vmatprep.subr.bf16.mxu1 %v11091_v41  ;;  %v14431_v23 = vpack.c.bf16 %v14415_v21, %v14415_v21  ;;  %v11137_v41 = vld [vmem:[%s14994_s4 + $0xbc8] ss:$16 sps:$4 sm:$0xff]   ;;  %v11151_v32 = vld [vmem:[%s14994_s4 + $0xc0c] ss:$16 sps:$4 sm:$0xff]  }
 0x44e   :  { %7868 = vmatpush1.bf16.msra.mxu0 %v11086_v5  ;;  %v4305_v5 = vcombine.high %v14415_v21, %v11350_v42  ;;  %v11143_v58 = vld [vmem:[%s14994_s4 + $0xbe8] ss:$16 sps:$4 sm:$0xff]   ;;  %v11154_v52 = vld [vmem:[%s14994_s4 + $0xe24] ss:$16 sps:$4 sm:$0xff]   ;;  %v11157_v36 = vld [vmem:[%s14994_s4 + $0xc2c] ss:$16 sps:$4 sm:$0xff]  }
 0x44f   :  { %7869 = vmatprep.subr.bf16.mxu0 %v11094_v12  ;;  %v11146_v12 = vld [vmem:[%s14994_s4 + $0xe00] ss:$16 sps:$4 sm:$0xff]   ;;  %v11155_v21 = vld [vmem:[%s14994_s4 + $0xc28] ss:$16 sps:$4 sm:$0xff]  }
 0x450   :  { %7351 = vmatpush1.bf16.msra.mxu1 %v11089_v24  ;;  %v11149_v24 = vld [vmem:[%s14994_s4 + $0xc08] ss:$16 sps:$4 sm:$0xff]  }
 0x451   :  { %7352 = vmatprep.subr.bf16.mxu1 %v11097_v63  ;;  %v11152_v63 = vld [vmem:[%s14994_s4 + $0xe20] ss:$16 sps:$4 sm:$0xff]  }
 0x452   :  { %7870 = vmatpush1.bf16.msra.mxu0 %v11092_v13  ;;  %v11160_v13 = vld [vmem:[%s14994_s4 + $0xe44] ss:$16 sps:$4 sm:$0xff]  }
 0x453   :  { %8134 = vmatprep.subr.bf16.mxu0 %v11100_v18  ;;  %v11163_v18 = vld [vmem:[%s14994_s4 + $0xc4c] ss:$16 sps:$4 sm:$0xff]  }
 0x454   :  { %7353 = vmatpush1.bf16.msra.mxu1 %v11095_v8  ;;  %v11166_v8 = vld [vmem:[%s14994_s4 + $0xe64] ss:$16 sps:$4 sm:$0xff]  }
 0x455   :  { %7888 = vmatmul.mubr.bf16.vlgmr.msra.gmra.mrb[108].mxu0 %v14431_v23  ;;  %7617 = vmatprep.subr.bf16.mxu1 %v11103_v54  ;;  %v11161_v54 = vld [vmem:[%s14994_s4 + $0xc48] ss:$16 sps:$4 sm:$0xff]  }
 0x456   :  { %8135 = vmatpush1.bf16.msra.mxu0 %v11098_v9  ;;  %8166 = vmatprep.mubr.bf16.mxu0 %v15313_v30  ;;  %v11169_v9 = vld [vmem:[%s14994_s4 + $0xc6c] ss:$16 sps:$4 sm:$0xff]  }
 0x457   :  { %7371 = vmatmul.mubr.bf16.vlgmr.msra.gmra.mrb[48].mxu1 %v14193_v59  ;;  %8136 = vmatprep.subr.bf16.mxu0 %v11106_v51  ;;  %v11110_v59 = vld [vmem:[%s14994_s4 + $0xd40] ss:$16 sps:$4 sm:$0xff]  }
 0x458   :  { %7618 = vmatpush1.bf16.msra.mxu1 %v11101_v17  ;;  %7649 = vmatprep.mubr.bf16.mxu1 %v15313_v30  ;;  %v11164_v51 = vld [vmem:[%s14994_s4 + $0xe60] ss:$16 sps:$4 sm:$0xff]   ;;  %v11172_v17 = vld [vmem:[%s14994_s4 + $0xe84] ss:$16 sps:$4 sm:$0xff]  }
 0x459   :  { %7619 = vmatprep.subr.bf16.mxu1 %v11109_v3  ;;  %v11167_v3 = vld [vmem:[%s14994_s4 + $0xc68] ss:$16 sps:$4 sm:$0xff]  }
 0x45a   :  { %8137 = vmatpush1.bf16.msra.mxu0 %v11104_v0  ;;  %v11175_v0 = vld [vmem:[%s14994_s4 + $0xc8c] ss:$16 sps:$4 sm:$0xff]  }
 0x45b   :  { %8138 = vmatprep.subr.bf16.mxu0 %v11112_v29  ;;  %v11170_v29 = vld [vmem:[%s14994_s4 + $0xe80] ss:$16 sps:$4 sm:$0xff]  }
 0x45c   :  { %7620 = vmatpush1.bf16.msra.mxu1 %v11107_v19  ;;  %v11178_v19 = vld [vmem:[%s14994_s4 + $0xea4] ss:$16 sps:$4 sm:$0xff]  }
 0x45d   :  { %7621 = vmatprep.subr.bf16.mxu1 %v11115_v28  ;;  %v11173_v28 = vld [vmem:[%s14994_s4 + $0xc88] ss:$16 sps:$4 sm:$0xff]  }
 0x45e   :  { %8139 = vmatpush1.bf16.msra.mxu0 %v11110_v59  ;;  %v11181_v59 = vld [vmem:[%s14994_s4 + $0xcac] ss:$16 sps:$4 sm:$0xff]  }
 0x45f   :  { %8140 = vmatprep.subr.bf16.mxu0 %v11118_v49  ;;  %v11176_v49 = vld [vmem:[%s14994_s4 + $0xea0] ss:$16 sps:$4 sm:$0xff]  }
 0x460   :  { %7622 = vmatpush1.bf16.msra.mxu1 %v11113_v57  ;;  %v11184_v57 = vld [vmem:[%s14994_s4 + $0xec4] ss:$16 sps:$4 sm:$0xff]  }
 0x461   :  { %7623 = vmatprep.subr.bf16.mxu1 %v11121_v22 }
 0x462   :  { %8141 = vmatpush1.bf16.msra.mxu0 %v11116_v25  ;;  %v11179_v25 = vld [vmem:[%s14994_s4 + $0xca8] ss:$16 sps:$4 sm:$0xff]  }
 0x463   :  { %8142 = vmatprep.subr.bf16.mxu0 %v11124_v53 }
 0x464   :  { %7624 = vmatpush1.bf16.msra.mxu1 %v11119_v26 }
 0x465   :  { %7625 = vmatprep.subr.bf16.mxu1 %v11127_v1  ;;  %v11187_v1 = vld [vmem:[%s14994_s4 + $0xccc] ss:$16 sps:$4 sm:$0xff]  }
 0x466   :  { %8143 = vmatpush1.bf16.msra.mxu0 %v11122_v7 }
 0x467   :  { %8144 = vmatprep.subr.bf16.mxu0 %v11130_v61 }
 0x468   :  { %v6215_v56 = vpop.f32.mrb[84].mxu0  ;;  %7626 = vmatpush1.bf16.msra.mxu1 %v11125_v16 }
 0x469   :  { %v14504_v27 = vadd.f32 %v6215_v56, %v14382_v33  ;;  %v6217_v31 = vpop.f32.mrb[85].mxu0  ;;  %7627 = vmatprep.subr.bf16.mxu1 %v11133_v60  ;;  %v11182_v60 = vld [vmem:[%s14994_s4 + $0xec0] ss:$16 sps:$4 sm:$0xff]  }
 0x46a   :  { %v14510_v40 = vadd.f32 %v6217_v31, %v14388_v48  ;;  %v5698_v50 = vpop.f32.mrb[24].mxu1  ;;  %v6219_v14 = vpop.f32.mrb[86].mxu0  ;;  %8145 = vmatpush1.bf16.msra.mxu0 %v11128_v44 }
 0x46b   :  { %v14516_v62 = vadd.f32 %v5698_v50, %v14394_v20  ;;  %v5700_v38 = vpop.f32.mrb[25].mxu1  ;;  %v6220_v35 = vpop.f32.mrb[87].mxu0  ;;  %8146 = vmatprep.subr.bf16.mxu0 %v11136_v34  ;;  %v11148_v20 = vld [vmem:[%s14994_s4 + $0xe04] ss:$16 sps:$4 sm:$0xff]   ;;  %v11193_v50 = vld [vmem:[%s14994_s4 + $0xcec] ss:$16 sps:$4 sm:$0xff]  }
 0x46c   :  { %v14522_v33 = vadd.f32 %v5700_v38, %v14400_v15  ;;  %v5702_v39 = vpop.f32.mrb[26].mxu1  ;;  %7628 = vmatpush1.bf16.msra.mxu1 %v11131_v4  ;;  %v14547_v15 = vpack.c.bf16 %v4305_v5, %v4305_v5  ;;  %v11190_v4 = vld [vmem:[%s14994_s4 + $0xee4] ss:$16 sps:$4 sm:$0xff]   ;;  %v11188_v14 = vld [vmem:[%s14994_s4 + $0xee0] ss:$16 sps:$4 sm:$0xff]  }
 0x46d   :  { %v5703_v48 = vpop.f32.mrb[27].mxu1  ;;  %7629 = vmatprep.subr.bf16.mxu1 %v11139_v11  ;;  %v11185_v11 = vld [vmem:[%s14994_s4 + $0xcc8] ss:$16 sps:$4 sm:$0xff]   ;;  %v11199_v35 = vld [vmem:[%s14994_s4 + $0xd0c] ss:$16 sps:$4 sm:$0xff]  }
 0x46e   :  { %8147 = vmatpush1.bf16.msra.mxu0 %v11134_v47  ;;  %v14653_v47 = vrot.slane %v4288_v45, %v11614_v10  ;;  %v11191_v38 = vld [vmem:[%s14994_s4 + $0xce8] ss:$16 sps:$4 sm:$0xff]   ;;  %v11194_v10 = vld [vmem:[%s14994_s4 + $0xf00] ss:$16 sps:$4 sm:$0xff]   ;;  %v11208_v39 = vld [vmem:[%s14994_s4 + $0xf44] ss:$16 sps:$4 sm:$0xff]  }
 0x46f   :  { %8148 = vmatprep.subr.bf16.mxu0 %v11142_v6  ;;  %v11197_v45 = vld [vmem:[%s14994_s4 + $0xd08] ss:$16 sps:$4 sm:$0xff]   ;;  %v11205_v6 = vld [vmem:[%s14994_s4 + $0xd2c] ss:$16 sps:$4 sm:$0xff]  }
 0x470   :  { %7630 = vmatpush1.bf16.msra.mxu1 %v11137_v41  ;;  %v14669_v55 = vpack.c.bf16 %v14653_v47, %v14653_v47  ;;  %v11203_v41 = vld [vmem:[%s14994_s4 + $0xd28] ss:$16 sps:$4 sm:$0xff]   ;;  %v11211_v48 = vld [vmem:[%s14994_s4 + $0xd4c] ss:$16 sps:$4 sm:$0xff]  }
 0x471   :  { %7631 = vmatprep.subr.bf16.mxu1 %v11145_v43  ;;  %v11214_v43 = vld [vmem:[%s14994_s4 + $0xf64] ss:$16 sps:$4 sm:$0xff]   ;;  %v11217_v5 = vld [vmem:[%s14994_s4 + $0xd6c] ss:$16 sps:$4 sm:$0xff]  }
 0x472   :  { %8149 = vmatpush1.bf16.msra.mxu0 %v11140_v46  ;;  %v11209_v46 = vld [vmem:[%s14994_s4 + $0xd48] ss:$16 sps:$4 sm:$0xff]  }
 0x473   :  { %8413 = vmatprep.subr.bf16.mxu0 %v11148_v20  ;;  %v11212_v20 = vld [vmem:[%s14994_s4 + $0xf60] ss:$16 sps:$4 sm:$0xff]  }
 0x474   :  { %7632 = vmatpush1.bf16.msra.mxu1 %v11143_v58  ;;  %v11220_v58 = vld [vmem:[%s14994_s4 + $0xf84] ss:$16 sps:$4 sm:$0xff]  }
 0x475   :  { %8167 = vmatmul.mubr.bf16.vlgmr.msra.gmra.mrb[112].mxu0 %v14547_v15  ;;  %7896 = vmatprep.subr.bf16.mxu1 %v11151_v32  ;;  %v11215_v32 = vld [vmem:[%s14994_s4 + $0xd68] ss:$16 sps:$4 sm:$0xff]  }
 0x476   :  { %8414 = vmatpush1.bf16.msra.mxu0 %v11146_v12  ;;  %8445 = vmatprep.mubr.bf16.mxu0 %v15313_v30  ;;  %v11223_v12 = vld [vmem:[%s14994_s4 + $0xd8c] ss:$16 sps:$4 sm:$0xff]  }
 0x477   :  { %7650 = vmatmul.mubr.bf16.vlgmr.msra.gmra.mrb[52].mxu1 %v14309_v37  ;;  %8415 = vmatprep.subr.bf16.mxu0 %v11154_v52  ;;  %v11158_v37 = vld [vmem:[%s14994_s4 + $0xe40] ss:$16 sps:$4 sm:$0xff]  }
 0x478   :  { %7897 = vmatpush1.bf16.msra.mxu1 %v11149_v24  ;;  %7928 = vmatprep.mubr.bf16.mxu1 %v15313_v30  ;;  %v11218_v52 = vld [vmem:[%s14994_s4 + $0xf80] ss:$16 sps:$4 sm:$0xff]   ;;  %v11226_v24 = vld [vmem:[%s14994_s4 + $0xfa4] ss:$16 sps:$4 sm:$0xff]  }
 0x479   :  { %7898 = vmatprep.subr.bf16.mxu1 %v11157_v36  ;;  %v11221_v36 = vld [vmem:[%s14994_s4 + $0xd88] ss:$16 sps:$4 sm:$0xff]  }
 0x47a   :  { %8416 = vmatpush1.bf16.msra.mxu0 %v11152_v63  ;;  %v11229_v63 = vld [vmem:[%s14994_s4 + $0xdac] ss:$16 sps:$4 sm:$0xff]  }
 0x47b   :  { %8417 = vmatprep.subr.bf16.mxu0 %v11160_v13  ;;  %v11224_v13 = vld [vmem:[%s14994_s4 + $0xfa0] ss:$16 sps:$4 sm:$0xff]  }
 0x47c   :  { %7899 = vmatpush1.bf16.msra.mxu1 %v11155_v21  ;;  %v11232_v21 = vld [vmem:[%s14994_s4 + $0xfc4] ss:$16 sps:$4 sm:$0xff]  }
 0x47d   :  { %7900 = vmatprep.subr.bf16.mxu1 %v11163_v18 }
 0x47e   :  { %8418 = vmatpush1.bf16.msra.mxu0 %v11158_v37  ;;  %v11227_v37 = vld [vmem:[%s14994_s4 + $0xda8] ss:$16 sps:$4 sm:$0xff]  }
 0x47f   :  { %8419 = vmatprep.subr.bf16.mxu0 %v11166_v8 }
 0x480   :  { %7901 = vmatpush1.bf16.msra.mxu1 %v11161_v54 }
 0x481   :  { %7902 = vmatprep.subr.bf16.mxu1 %v11169_v9  ;;  %v11235_v9 = vld [vmem:[%s14994_s4 + $0xdcc] ss:$16 sps:$4 sm:$0xff]  }
 0x482   :  { %8420 = vmatpush1.bf16.msra.mxu0 %v11164_v51 }
 0x483   :  { %8421 = vmatprep.subr.bf16.mxu0 %v11172_v17 }
 0x484   :  { %7903 = vmatpush1.bf16.msra.mxu1 %v11167_v3 }
 0x485   :  { %7904 = vmatprep.subr.bf16.mxu1 %v11175_v0  ;;  %v11230_v0 = vld [vmem:[%s14994_s4 + $0xfc0] ss:$16 sps:$4 sm:$0xff]  }
 0x486   :  { %8422 = vmatpush1.bf16.msra.mxu0 %v11170_v29 }
 0x487   :  { %8423 = vmatprep.subr.bf16.mxu0 %v11178_v19 }
 0x488   :  { %v6494_v22 = vpop.f32.mrb[88].mxu0  ;;  %7905 = vmatpush1.bf16.msra.mxu1 %v11173_v28 }
 0x489   :  { %v14620_v53 = vadd.f32 %v6494_v22, %v14504_v27  ;;  %v6496_v26 = vpop.f32.mrb[89].mxu0  ;;  %7906 = vmatprep.subr.bf16.mxu1 %v11181_v59  ;;  %v11238_v59 = vld [vmem:[%s14994_s4 + $0xfe4] ss:$16 sps:$4 sm:$0xff]   ;;  %v11233_v22 = vld [vmem:[%s14994_s4 + $0xdc8] ss:$16 sps:$4 sm:$0xff]  }
 0x48a   :  { %v14626_v7 = vadd.f32 %v6496_v26, %v14510_v40  ;;  %v5977_v61 = vpop.f32.mrb[28].mxu1  ;;  %v6498_v16 = vpop.f32.mrb[90].mxu0  ;;  %8424 = vmatpush1.bf16.msra.mxu0 %v11176_v49  ;;  %v11236_v26 = vld [vmem:[%s14994_s4 + $0xfe0] ss:$16 sps:$4 sm:$0xff]  }
 0x48b   :  { %v14632_v44 = vadd.f32 %v5977_v61, %v14516_v62  ;;  %v5979_v34 = vpop.f32.mrb[29].mxu1  ;;  %v6499_v56 = vpop.f32.mrb[91].mxu0  ;;  %8425 = vmatprep.subr.bf16.mxu0 %v11184_v57  ;;  %v11196_v62 = vld [vmem:[%s14994_s4 + $0xf04] ss:$16 sps:$4 sm:$0xff]   ;;  %v11244_v61 = vld [vmem:[%s14994_s4 + $0xe0c] ss:$16 sps:$4 sm:$0xff]  }
 0x48c   :  { %v14638_v27 = vadd.f32 %v5979_v34, %v14522_v33  ;;  %v5981_v31 = vpop.f32.mrb[30].mxu1  ;;  %7907 = vmatpush1.bf16.msra.mxu1 %v11179_v25  ;;  %v11200_v33 = vld [vmem:[%s14994_s4 + $0xf20] ss:$16 sps:$4 sm:$0xff]   ;;  %v11250_v34 = vld [vmem:[%s14994_s4 + $0xe4c] ss:$16 sps:$4 sm:$0xff]  }
 0x48d   :  { %v5982_v40 = vpop.f32.mrb[31].mxu1  ;;  %7908 = vmatprep.subr.bf16.mxu1 %v11187_v1  ;;  %v4306_v1 = vcombine.high %v14653_v47, %v11350_v42  ;;  %v11247_v42 = vld [vmem:[%s14994_s4 + $0xe2c] ss:$16 sps:$4 sm:$0xff]   ;;  %v11248_v56 = vld [vmem:[%s14994_s4 + $0xe48] ss:$16 sps:$4 sm:$0xff]  }
 0x48e   :  { %8426 = vmatpush1.bf16.msra.mxu0 %v11182_v60  ;;  %v11242_v60 = vld [vmem:[%s14994_s4 + $0xe08] ss:$16 sps:$4 sm:$0xff]  }
 0x48f   :  { %8427 = vmatprep.subr.bf16.mxu0 %v11190_v4  ;;  %v14771_v16 = vpack.c.bf16 %v4306_v1, %v4306_v1  ;;  %v11251_v4 = vld [vmem:[%s14994_s4 + $0xe68] ss:$16 sps:$4 sm:$0xff]   ;;  %v11295_v1 = vld [vmem:[%s14996_s6 + $0x10] sm:$0xff]  }
 0x490   :  { %7909 = vmatpush1.bf16.msra.mxu1 %v11185_v11  ;;  %v11254_v31 = vld [vmem:[%s14994_s4 + $0xe88] ss:$16 sps:$4 sm:$0xff]   ;;  %v11259_v11 = vld [vmem:[%s14994_s4 + $0xeac] ss:$16 sps:$4 sm:$0xff]  }
 0x491   :  { %7910 = vmatprep.subr.bf16.mxu1 %v11193_v50  ;;  %v11257_v50 = vld [vmem:[%s14994_s4 + $0xea8] ss:$16 sps:$4 sm:$0xff]  }
 0x492   :  { %8428 = vmatpush1.bf16.msra.mxu0 %v11188_v14 }
 0x493   :  { %8692 = vmatprep.subr.bf16.mxu0 %v11196_v62  ;;  %v11262_v62 = vld [vmem:[%s14994_s4 + $0xecc] ss:$16 sps:$4 sm:$0xff]  }
 0x494   :  { %7911 = vmatpush1.bf16.msra.mxu1 %v11191_v38 }
 0x495   :  { %8446 = vmatmul.mubr.bf16.vlgmr.msra.gmra.mrb[116].mxu0 %v14669_v55  ;;  %8175 = vmatprep.subr.bf16.mxu1 %v11199_v35 }
 0x496   :  { %8693 = vmatpush1.bf16.msra.mxu0 %v11194_v10  ;;  %8724 = vmatprep.mubr.bf16.mxu0 %v15313_v30 }
 0x497   :  { %7929 = vmatmul.mubr.bf16.vlgmr.msra.gmra.mrb[56].mxu1 %v14431_v23  ;;  %8694 = vmatprep.subr.bf16.mxu0 %v11202_v2  ;;  %v11206_v23 = vld [vmem:[%s14994_s4 + $0xf40] ss:$16 sps:$4 sm:$0xff]  }
 0x498   :  { %8176 = vmatpush1.bf16.msra.mxu1 %v11197_v45  ;;  %8207 = vmatprep.mubr.bf16.mxu1 %v15313_v30 }
 0x499   :  { %8177 = vmatprep.subr.bf16.mxu1 %v11205_v6 }
 0x49a   :  { %8695 = vmatpush1.bf16.msra.mxu0 %v11200_v33 }
 0x49b   :  { %8696 = vmatprep.subr.bf16.mxu0 %v11208_v39 }
 0x49c   :  { %8178 = vmatpush1.bf16.msra.mxu1 %v11203_v41  ;;  %v11260_v41 = vld [vmem:[%s14994_s4 + $0xec8] ss:$16 sps:$4 sm:$0xff]  }
 0x49d   :  { %8179 = vmatprep.subr.bf16.mxu1 %v11211_v48 }
 0x49e   :  { %8697 = vmatpush1.bf16.msra.mxu0 %v11206_v23  ;;  %v11265_v23 = vld [vmem:[%s14994_s4 + $0xeec] ss:$16 sps:$4 sm:$0xff]  }
 0x49f   :  { %8698 = vmatprep.subr.bf16.mxu0 %v11214_v43  ;;  %v11263_v43 = vld [vmem:[%s14994_s4 + $0xee8] ss:$16 sps:$4 sm:$0xff]  }
 0x4a0   :  { %8180 = vmatpush1.bf16.msra.mxu1 %v11209_v46  ;;  %v11268_v46 = vld [vmem:[%s14994_s4 + $0xf0c] ss:$16 sps:$4 sm:$0xff]  }
 0x4a1   :  { %8181 = vmatprep.subr.bf16.mxu1 %v11217_v5  ;;  %v11266_v5 = vld [vmem:[%s14994_s4 + $0xf08] ss:$16 sps:$4 sm:$0xff]  }
 0x4a2   :  { %8699 = vmatpush1.bf16.msra.mxu0 %v11212_v20  ;;  %v11271_v20 = vld [vmem:[%s14994_s4 + $0xf2c] ss:$16 sps:$4 sm:$0xff]  }
 0x4a3   :  { %8700 = vmatprep.subr.bf16.mxu0 %v11220_v58  ;;  %v11269_v58 = vld [vmem:[%s14994_s4 + $0xf28] ss:$16 sps:$4 sm:$0xff]  }
 0x4a4   :  { %8182 = vmatpush1.bf16.msra.mxu1 %v11215_v32  ;;  %v11274_v32 = vld [vmem:[%s14994_s4 + $0xf4c] ss:$16 sps:$4 sm:$0xff]  }
 0x4a5   :  { %8183 = vmatprep.subr.bf16.mxu1 %v11223_v12  ;;  %v11272_v12 = vld [vmem:[%s14994_s4 + $0xf48] ss:$16 sps:$4 sm:$0xff]  }
 0x4a6   :  { %8701 = vmatpush1.bf16.msra.mxu0 %v11218_v52  ;;  %v11280_v52 = vld [vmem:[%s14994_s4 + $0xf8c] ss:$16 sps:$4 sm:$0xff]  }
 0x4a7   :  { %8702 = vmatprep.subr.bf16.mxu0 %v11226_v24  ;;  %v11278_v24 = vld [vmem:[%s14994_s4 + $0xf88] ss:$16 sps:$4 sm:$0xff]  }
 0x4a8   :  { %v6773_v18 = vpop.f32.mrb[92].mxu0  ;;  %8184 = vmatpush1.bf16.msra.mxu1 %v11221_v36  ;;  %v11283_v36 = vld [vmem:[%s14994_s4 + $0xfac] ss:$16 sps:$4 sm:$0xff]  }
 0x4a9   :  { %v6821_v8 = vadd.f32 %v6773_v18, %v14620_v53  ;;  %v6775_v54 = vpop.f32.mrb[93].mxu0  ;;  %8185 = vmatprep.subr.bf16.mxu1 %v11229_v63  ;;  %v11241_v53 = vld [vmem:[%s14994_s4 + $0xdec] ss:$16 sps:$4 sm:$0xff]  }
 0x4aa   :  { %v6822_v51 = vadd.f32 %v6775_v54, %v14626_v7  ;;  %v6256_v17 = vpop.f32.mrb[32].mxu1  ;;  %v6777_v3 = vpop.f32.mrb[94].mxu0  ;;  %8703 = vmatpush1.bf16.msra.mxu0 %v11224_v13  ;;  %v11239_v7 = vld [vmem:[%s14994_s4 + $0xde8] ss:$16 sps:$4 sm:$0xff]  }
 0x4ab   :  { %v6265_v29 = vadd.f32 %v6256_v17, %v14632_v44  ;;  %v6258_v19 = vpop.f32.mrb[33].mxu1  ;;  %v6778_v28 = vpop.f32.mrb[95].mxu0  ;;  %8704 = vmatprep.subr.bf16.mxu0 %v11232_v21  ;;  %v11245_v44 = vld [vmem:[%s14994_s4 + $0xe28] ss:$16 sps:$4 sm:$0xff]  }
 0x4ac   :  { %v6266_v49 = vadd.f32 %v6258_v19, %v14638_v27  ;;  %v6260_v57 = vpop.f32.mrb[34].mxu1  ;;  %8186 = vmatpush1.bf16.msra.mxu1 %v11227_v37  ;;  %v11256_v27 = vld [vmem:[%s14994_s4 + $0xe8c] ss:$16 sps:$4 sm:$0xff]   ;;  %v11281_v13 = vld [vmem:[%s14994_s4 + $0xfa8] ss:$16 sps:$4 sm:$0xff]  }
 0x4ad   :  { %v6261_v25 = vpop.f32.mrb[35].mxu1  ;;  %8187 = vmatprep.subr.bf16.mxu1 %v11235_v9  ;;  %v11286_v37 = vld [vmem:[%s14994_s4 + $0xfcc] ss:$16 sps:$4 sm:$0xff]   ;;  %v11284_v19 = vld [vmem:[%s14994_s4 + $0xfc8] ss:$16 sps:$4 sm:$0xff]   ;;  %v11291_v57 = vld [vmem:[%s14996_s6] sm:$0xff]  }
 0x4ae   :  { %8705 = vmatpush1.bf16.msra.mxu0 %v11230_v0  ;;  %v11289_v28 = vld [vmem:[%s14994_s4 + $0xfec] ss:$16 sps:$4 sm:$0xff]   ;;  %v11287_v25 = vld [vmem:[%s14994_s4 + $0xfe8] ss:$16 sps:$4 sm:$0xff]  }
 0x4af   :  { %8706 = vmatprep.subr.bf16.mxu0 %v11238_v59 }
 0x4b0   :  { %8188 = vmatpush1.bf16.msra.mxu1 %v11233_v22  ;;  %v11292_v22 = vld [vmem:[%s14996_s6 + $0x48] sm:$0xff]  }
 0x4b1   :  { %8189 = vmatprep.subr.bf16.mxu1 %v11241_v53  ;;  %v11293_v53 = vld [vmem:[%s14996_s6 + $0x8] sm:$0xff]  }
 0x4b2   :  { %8707 = vmatpush1.bf16.msra.mxu0 %v11236_v26  ;;  %v11294_v26 = vld [vmem:[%s14996_s6 + $0x50] sm:$0xff]  }
 0x4b4   :  { %8190 = vmatpush1.bf16.msra.mxu1 %v11239_v7  ;;  %v11296_v7 = vld [vmem:[%s14996_s6 + $0x58] sm:$0xff]  }
 0x4b5   :  { %8725 = vmatmul.mubr.bf16.vlgmr.msra.gmra.mrb[120].mxu0 %v14771_v16  ;;  %8454 = vmatprep.subr.bf16.mxu1 %v11244_v61  ;;  %v11297_v61 = vld [vmem:[%s14996_s6 + $0x18] sm:$0xff]  }
 0x4b7   :  { %8208 = vmatmul.mubr.bf16.vlgmr.msra.gmra.mrb[60].mxu1 %v14547_v15  ;;  %v11253_v15 = vld [vmem:[%s14994_s4 + $0xe6c] ss:$16 sps:$4 sm:$0xff]  }
 0x4b8   :  { %8455 = vmatpush1.bf16.msra.mxu1 %v11242_v60  ;;  %8486 = vmatprep.mubr.bf16.mxu1 %v15313_v30  ;;  %v11298_v60 = vld [vmem:[%s14996_s6 + $0x60] sm:$0xff]  }
 0x4b9   :  { %8456 = vmatprep.subr.bf16.mxu1 %v11247_v42  ;;  %v11299_v42 = vld [vmem:[%s14996_s6 + $0x20] sm:$0xff]  }
 0x4bc   :  { %8457 = vmatpush1.bf16.msra.mxu1 %v11245_v44 }
 0x4bd   :  { %8458 = vmatprep.subr.bf16.mxu1 %v11250_v34 }
 0x4c0   :  { %8459 = vmatpush1.bf16.msra.mxu1 %v11248_v56 }
 0x4c1   :  { %8460 = vmatprep.subr.bf16.mxu1 %v11253_v15 }
 0x4c4   :  { %8461 = vmatpush1.bf16.msra.mxu1 %v11251_v4 }
 0x4c5   :  { %8462 = vmatprep.subr.bf16.mxu1 %v11256_v27 }
 0x4c8   :  { %v7052_v40 = vpop.f32.mrb[96].mxu0  ;;  %8463 = vmatpush1.bf16.msra.mxu1 %v11254_v31 }
 0x4c9   :  { %v7100_v14 = vadd.f32 %v7052_v40, %v6821_v8  ;;  %v7054_v47 = vpop.f32.mrb[97].mxu0  ;;  %8464 = vmatprep.subr.bf16.mxu1 %v11259_v11 }
 0x4ca   :  { %v7101_v38 = vadd.f32 %v7054_v47, %v6822_v51  ;;  %v6535_v35 = vpop.f32.mrb[36].mxu1  ;;  %v7056_v10 = vpop.f32.mrb[98].mxu0 }
 0x4cb   :  { %v6544_v2 = vadd.f32 %v6535_v35, %v6265_v29  ;;  %v6537_v45 = vpop.f32.mrb[37].mxu1  ;;  %v7057_v6 = vpop.f32.mrb[99].mxu0  ;;  %v11303_v35 = vld [vmem:[%s14996_s6 + $0x30] sm:$0xff]   ;;  %v11304_v10 = vld [vmem:[%s14996_s6 + $0x78] sm:$0xff]  }
 0x4cc   :  { %v6545_v33 = vadd.f32 %v6537_v45, %v6266_v49  ;;  %v6539_v39 = vpop.f32.mrb[38].mxu1  ;;  %8465 = vmatpush1.bf16.msra.mxu1 %v11257_v50  ;;  %v11290_v49 = vld [vmem:[%s14996_s6 + $0x40] sm:$0xff]   ;;  %v11301_v50 = vld [vmem:[%s14996_s6 + $0x28] sm:$0xff]  }
 0x4cd   :  { %v6540_v48 = vpop.f32.mrb[39].mxu1  ;;  %8466 = vmatprep.subr.bf16.mxu1 %v11262_v62  ;;  %10365 = vmatprep.subr.bf16.mxu0 %v11290_v49  ;;  %v11317_v49 = vld [vmem:[%s14996_s6 + $0xa8] sm:$0xff]  }
 0x4ce   :  { %10366 = vmatpush3.bf16.msra.mxu0 %v11291_v57  ;;  %v11318_v57 = vld [vmem:[%s14996_s6 + $0xf0] sm:$0xff]  }
 0x4cf   :  { %10367 = vmatprep.subr.bf16.mxu0 %v11292_v22  ;;  %v11319_v22 = vld [vmem:[%s14996_s6 + $0xb0] sm:$0xff]  }
 0x4d0   :  { %8467 = vmatpush1.bf16.msra.mxu1 %v11260_v41 }
 0x4d1   :  { %8468 = vmatprep.subr.bf16.mxu1 %v11265_v23 }
 0x4d2   :  { %10368 = vmatpush3.bf16.msra.mxu0 %v11293_v53  ;;  %v11321_v53 = vld [vmem:[%s14996_s6 + $0xb8] sm:$0xff]  }
 0x4d3   :  { %10369 = vmatprep.subr.bf16.mxu0 %v11294_v26 }
 0x4d4   :  { %8469 = vmatpush1.bf16.msra.mxu1 %v11263_v43 }
 0x4d5   :  { %8733 = vmatprep.subr.bf16.mxu1 %v11268_v46 }
 0x4d6   :  { %10370 = vmatpush3.bf16.msra.mxu0 %v11295_v1 }
 0x4d7   :  { %8487 = vmatmul.mubr.bf16.vlgmr.msra.gmra.mrb[64].mxu1 %v14669_v55  ;;  %v11277_v55 = vld [vmem:[%s14994_s4 + $0xf6c] ss:$16 sps:$4 sm:$0xff]   ;;  %10371 = vmatprep.subr.bf16.mxu0 %v11296_v7 }
 0x4d8   :  { %8734 = vmatpush1.bf16.msra.mxu1 %v11266_v5  ;;  %8765 = vmatprep.mubr.bf16.mxu1 %v15313_v30  ;;  %v11275_v30 = vld [vmem:[%s14994_s4 + $0xf68] ss:$16 sps:$4 sm:$0xff]   ;;  %s9163_s4 = sshll.u32 %s11351_s9, 4  ;;  %s9164_s4 = int_to_ptr.vmem [resolvable:$true] %s9163_s4 }
 0x4d9   :  { %8735 = vmatprep.subr.bf16.mxu1 %v11271_v20  ;;  %s11323_s10 = scalar_lea.vmem %s9164_s4, 32  ;;  %p11328_p1 = scmp.lt.s32.totalorder %s9164_s4, %s9164_s4 }
 0x4da   :  { %10372 = vmatpush3.bf16.msra.mxu0 %v11297_v61  ;;  %p11324_p0 = scmp.ne.s32.totalorder %s9164_s4, %s11323_s10  ;;  %p11329_p2 = scmp.lt.s32.totalorder %s11323_s10, %s11323_s10 }
 0x4db   :  { %10373 = vmatprep.subr.bf16.mxu0 %v11298_v60 }
 0x4dc   :  { %8736 = vmatpush1.bf16.msra.mxu1 %v11269_v58  ;;  %p11330_p3 = por %p11329_p2, %p11328_p1 }
 0x4dd   :  { %8737 = vmatprep.subr.bf16.mxu1 %v11274_v32  ;;  %v11306_v32 = vld [vmem:[%s14996_s6 + $0xc0] sm:$0xff]  }
 0x4de   :  { %10374 = vmatpush3.bf16.msra.mxu0 %v11299_v42  ;;  %p11331_p4 = pnand %p11330_p3, %p11324_p0 }
 0x4e0   :  { %8738 = vmatpush1.bf16.msra.mxu1 %v11272_v12  ;;  %v11307_v12 = vld [vmem:[%s14996_s6 + $0x80] sm:$0xff]  }
 0x4e1   :  { %8739 = vmatprep.subr.bf16.mxu1 %v11277_v55  ;;  %v11308_v55 = vld [vmem:[%s14996_s6 + $0xc8] sm:$0xff]  }
 0x4e4   :  { %8740 = vmatpush1.bf16.msra.mxu1 %v11275_v30  ;;  %v11309_v30 = vld [vmem:[%s14996_s6 + $0x88] sm:$0xff]  }
 0x4e5   :  { %8741 = vmatprep.subr.bf16.mxu1 %v11280_v52  ;;  %v11310_v52 = vld [vmem:[%s14996_s6 + $0xd0] sm:$0xff]  }
 0x4e8   :  { %v7331_v63 = vpop.f32.mrb[100].mxu0  ;;  %8742 = vmatpush1.bf16.msra.mxu1 %v11278_v24  ;;  %v11311_v24 = vld [vmem:[%s14996_s6 + $0x90] sm:$0xff]  }
 0x4e9   :  { %v7379_v21 = vadd.f32 %v7331_v63, %v7100_v14  ;;  %v7333_v18 = vpop.f32.mrb[101].mxu0  ;;  %8743 = vmatprep.subr.bf16.mxu1 %v11283_v36  ;;  %v11312_v36 = vld [vmem:[%s14996_s6 + $0xd8] sm:$0xff]  }
 0x4ea   :  { %v7380_v8 = vadd.f32 %v7333_v18, %v7101_v38  ;;  %v6814_v54 = vpop.f32.mrb[40].mxu1  ;;  %v7335_v9 = vpop.f32.mrb[102].mxu0  ;;  %v11302_v38 = vld [vmem:[%s14996_s6 + $0x70] sm:$0xff]   ;;  %v11313_v63 = vld [vmem:[%s14996_s6 + $0x98] sm:$0xff]   ;;  %v11316_v18 = vld [vmem:[%s14996_s6 + $0xe8] sm:$0xff]  }
 0x4eb   :  { %v6823_v51 = vadd.f32 %v6814_v54, %v6544_v2  ;;  %v6816_v17 = vpop.f32.mrb[41].mxu1  ;;  %v7336_v3 = vpop.f32.mrb[103].mxu0  ;;  %v11305_v2 = vld [vmem:[%s14996_s6 + $0x38] sm:$0xff]  }
 0x4ec   :  { %v6824_v0 = vadd.f32 %v6816_v17, %v6545_v33  ;;  %v6818_v29 = vpop.f32.mrb[42].mxu1  ;;  %8744 = vmatpush1.bf16.msra.mxu1 %v11281_v13  ;;  %v11314_v13 = vld [vmem:[%s14996_s6 + $0xe0] sm:$0xff]  }
 0x4ed   :  { %v6819_v59 = vpop.f32.mrb[43].mxu1  ;;  %8745 = vmatprep.subr.bf16.mxu1 %v11286_v37 }
 0x4f0   :  { %8746 = vmatpush1.bf16.msra.mxu1 %v11284_v19 }
 0x4f1   :  { %8747 = vmatprep.subr.bf16.mxu1 %v11289_v28 }
 0x4f4   :  { %8748 = vmatpush1.bf16.msra.mxu1 %v11287_v25  ;;  %v11320_v25 = vld [vmem:[%s14996_s6 + $0xf8] sm:$0xff]  }
 0x4f5   :  { %10387 = vmatprep.subr.bf16.mxu1 %v11306_v32 }
 0x4f7   :  { %8766 = vmatmul.mubr.bf16.vlgmr.msra.gmra.mrb[68].mxu1 %v14771_v16  ;;  %v11300_v16 = vld [vmem:[%s14996_s6 + $0x68] sm:$0xff]  }
 0x4f8   :  { %10375 = vmatprep.subr.bf16.mxu0 %v11300_v16  ;;  %10388 = vmatpush3.bf16.msra.mxu1 %v11307_v12 }
 0x4f9   :  { %10376 = vmatpush3.bf16.msra.mxu0 %v11301_v50  ;;  %10389 = vmatprep.subr.bf16.mxu1 %v11308_v55 }
 0x4fa   :  { %10377 = vmatprep.subr.bf16.mxu0 %v11302_v38 }
 0x4fc   :  { %10390 = vmatpush3.bf16.msra.mxu1 %v11309_v30 }
 0x4fd   :  { %10378 = vmatpush3.bf16.msra.mxu0 %v11303_v35  ;;  %10391 = vmatprep.subr.bf16.mxu1 %v11310_v52 }
 0x4fe   :  { %10379 = vmatprep.subr.bf16.mxu0 %v11304_v10 }
 0x500   :  { %10392 = vmatpush3.bf16.msra.mxu1 %v11311_v24 }
 0x501   :  { %10380 = vmatpush3.bf16.msra.mxu0 %v11305_v2  ;;  %10393 = vmatprep.subr.bf16.mxu1 %v11312_v36 }
 0x504   :  { %10394 = vmatpush3.bf16.msra.mxu1 %v11313_v63 }
 0x505   :  { %10395 = vmatprep.subr.bf16.mxu1 %v11314_v13 }
 0x508   :  { %v7610_v44 = vpop.f32.mrb[104].mxu0 }
 0x509   :  { %v7658_v34 = vadd.f32 %v7610_v44, %v7379_v21  ;;  %v7612_v56 = vpop.f32.mrb[105].mxu0  ;;  %v11315_v21 = vld [vmem:[%s14996_s6 + $0xa0] sm:$0xff]  }
 0x50a   :  { %v7659_v15 = vadd.f32 %v7612_v56, %v7380_v8  ;;  %v7093_v4 = vpop.f32.mrb[44].mxu1  ;;  %v7614_v27 = vpop.f32.mrb[106].mxu0  ;;  %10396 = vmatpush3.bf16.msra.mxu1 %v11315_v21 }
 0x50b   :  { %v7102_v31 = vadd.f32 %v7093_v4, %v6823_v51  ;;  %v7095_v11 = vpop.f32.mrb[45].mxu1  ;;  %v7615_v40 = vpop.f32.mrb[107].mxu0  ;;  %10397 = vmatprep.subr.bf16.mxu1 %v11316_v18  ;;  %v15314_v27 = vld [vmem:[#allocation11_spill] sm:$0xff] }
 0x50c   :  { %v7103_v14 = vadd.f32 %v7095_v11, %v6824_v0  ;;  %v7097_v47 = vpop.f32.mrb[46].mxu1  ;;  %v8778_v11 = vld [vmem:[%s14995_s5] sm:$0xf]  ;;  %v8786_v40 = vsub.s32 1, %v15314_v27  ;;  %v8790_v36 = vsub.s32 2, %v15314_v27  ;;  %v8794_v63 = vsub.s32 3, %v15314_v27 }
 0x50d   :  { %v7098_v62 = vpop.f32.mrb[47].mxu1 }
 0x50e   :  { %10398 = vmatpush3.bf16.msra.mxu1 %v11317_v49  ;;  %v8787_v47 = vrot.slane %v8778_v11, %v8786_v40  ;;  %v8791_v13 = vrot.slane %v8778_v11, %v8790_v36  ;;  %v8795_v18 = vrot.slane %v8778_v11, %v8794_v63 }
 0x50f   :  { %10399 = vmatprep.subr.bf16.mxu1 %v11318_v57 }
 0x512   :  { %10400 = vmatpush3.bf16.msra.mxu1 %v11319_v22 }
 0x513   :  { %10401 = vmatprep.subr.bf16.mxu1 %v11320_v25 }
 0x516   :  { %10402 = vmatpush3.bf16.msra.mxu1 %v11321_v53  ;;  %v10297_v53 = vld [vmem:[%s14997_s7] ss:$0 sm:$0xff] }
 0x528   :  { %v7889_v45 = vpop.f32.mrb[108].mxu0 }
 0x529   :  { %v7937_v6 = vadd.f32 %v7889_v45, %v7658_v34  ;;  %v7891_v33 = vpop.f32.mrb[109].mxu0 }
 0x52a   :  { %v7938_v39 = vadd.f32 %v7891_v33, %v7659_v15  ;;  %v7372_v41 = vpop.f32.mrb[48].mxu1  ;;  %v7893_v48 = vpop.f32.mrb[110].mxu0 }
 0x52b   :  { %v7381_v23 = vadd.f32 %v7372_v41, %v7102_v31  ;;  %v7374_v43 = vpop.f32.mrb[49].mxu1  ;;  %v7894_v46 = vpop.f32.mrb[111].mxu0  ;;  %v8782_v31 = vsub.s32 0, %v15314_v27 }
 0x52c   :  { %v7382_v5 = vadd.f32 %v7374_v43, %v7103_v14  ;;  %v7376_v20 = vpop.f32.mrb[50].mxu1 }
 0x52d   :  { %v7377_v58 = vpop.f32.mrb[51].mxu1  ;;  %v8783_v50 = vrot.slane %v8778_v11, %v8782_v31 }
 0x548   :  { %v8168_v37 = vpop.f32.mrb[112].mxu0 }
 0x549   :  { %v8216_v8 = vadd.f32 %v8168_v37, %v7937_v6  ;;  %v8170_v54 = vpop.f32.mrb[113].mxu0 }
 0x54a   :  { %v8217_v9 = vadd.f32 %v8170_v54, %v7938_v39  ;;  %v7651_v51 = vpop.f32.mrb[52].mxu1  ;;  %v8172_v17 = vpop.f32.mrb[114].mxu0 }
 0x54b   :  { %v7660_v3 = vadd.f32 %v7651_v51, %v7381_v23  ;;  %v7653_v0 = vpop.f32.mrb[53].mxu1  ;;  %v8173_v29 = vpop.f32.mrb[115].mxu0 }
 0x54c   :  { %v7661_v19 = vadd.f32 %v7653_v0, %v7382_v5  ;;  %v7655_v28 = vpop.f32.mrb[54].mxu1 }
 0x54d   :  { %v7656_v59 = vpop.f32.mrb[55].mxu1 }
 0x568   :  { %v8447_v26 = vpop.f32.mrb[116].mxu0 }
 0x569   :  { %v8495_v1 = vadd.f32 %v8447_v26, %v8216_v8  ;;  %v8449_v7 = vpop.f32.mrb[117].mxu0 }
 0x56a   :  { %v8496_v61 = vadd.f32 %v8449_v7, %v8217_v9  ;;  %v7930_v60 = vpop.f32.mrb[56].mxu1  ;;  %v8451_v42 = vpop.f32.mrb[118].mxu0 }
 0x56b   :  { %v7939_v16 = vadd.f32 %v7930_v60, %v7660_v3  ;;  %v7932_v44 = vpop.f32.mrb[57].mxu1  ;;  %v8452_v34 = vpop.f32.mrb[119].mxu0 }
 0x56c   :  { %v7940_v56 = vadd.f32 %v7932_v44, %v7661_v19  ;;  %v7934_v15 = vpop.f32.mrb[58].mxu1 }
 0x56d   :  { %v7935_v4 = vpop.f32.mrb[59].mxu1 }
 0x588   :  { %v8726_v14 = vpop.f32.mrb[120].mxu0 }
 0x589   :  { %v8774_v62 = vadd.f32 %v8726_v14, %v8495_v1  ;;  %v8728_v38 = vpop.f32.mrb[121].mxu0 }
 0x58a   :  { %v8775_v35 = vadd.f32 %v8728_v38, %v8496_v61  ;;  %v8209_v10 = vpop.f32.mrb[60].mxu1  ;;  %v8730_v2 = vpop.f32.mrb[122].mxu0 }
 0x58b   :  { %v8800_v45 = vadd.f32 %v8783_v50, %v8774_v62  ;;  %v8218_v6 = vadd.f32 %v8209_v10, %v7939_v16  ;;  %v8211_v33 = vpop.f32.mrb[61].mxu1  ;;  %v8731_v39 = vpop.f32.mrb[123].mxu0 }
 0x58c   :  { %v8801_v41 = vadd.f32 %v8787_v47, %v8775_v35  ;;  %v8219_v48 = vadd.f32 %v8211_v33, %v7940_v56  ;;  %v8213_v23 = vpop.f32.mrb[62].mxu1 }
 0x58d   :  { %v8804_v43 = vmax.f32 %v8800_v45, 0.0  ;;  %v8214_v46 = vpop.f32.mrb[63].mxu1 }
 0x58e   :  { %v8805_v5 = vmax.f32 %v8801_v41, 0.0 }
 0x58f   :  { %v8808_v58 = vpack.c.bf16 %v8804_v43, %v8804_v43 }
 0x590   :  { %v8809_v20 = vpack.c.bf16 %v8805_v5, %v8805_v5 }
 0x592   :  { %9107 = vmatprep.mubr.bf16.mxu0 %v8809_v20 }
 0x593   :  { %9108 = vmatmul.mubr.bf16.vlgmr.msra.gmra.mrb[124].mxu0 %v8808_v58 }
 0x5aa   :  { %v8488_v32 = vpop.f32.mrb[64].mxu1 }
 0x5ab   :  { %v8497_v12 = vadd.f32 %v8488_v32, %v8218_v6  ;;  %v8490_v55 = vpop.f32.mrb[65].mxu1 }
 0x5ac   :  { %v8498_v30 = vadd.f32 %v8490_v55, %v8219_v48  ;;  %v8492_v52 = vpop.f32.mrb[66].mxu1 }
 0x5ad   :  { %v8493_v24 = vpop.f32.mrb[67].mxu1 }
 0x5ca   :  { %v8767_v21 = vpop.f32.mrb[68].mxu1 }
 0x5cb   :  { %v8776_v37 = vadd.f32 %v8767_v21, %v8497_v12  ;;  %v8769_v8 = vpop.f32.mrb[69].mxu1 }
 0x5cc   :  { %v8777_v54 = vadd.f32 %v8769_v8, %v8498_v30  ;;  %v8771_v9 = vpop.f32.mrb[70].mxu1 }
 0x5cd   :  { %v8802_v51 = vadd.f32 %v8791_v13, %v8776_v37  ;;  %v8772_v17 = vpop.f32.mrb[71].mxu1 }
 0x5ce   :  { %v8803_v3 = vadd.f32 %v8795_v18, %v8777_v54 }
 0x5cf   :  { %v8806_v0 = vmax.f32 %v8802_v51, 0.0 }
 0x5d0   :  { %v8807_v29 = vmax.f32 %v8803_v3, 0.0 }
 0x5d1   :  { %v8810_v28 = vpack.c.bf16 %v8806_v0, %v8806_v0 }
 0x5d2   :  { %v8811_v19 = vpack.c.bf16 %v8807_v29, %v8807_v29 }
 0x5d4   :  { %9147 = vmatprep.mubr.bf16.mxu1 %v8811_v19 }
 0x5d5   :  { %9148 = vmatmul.mubr.bf16.vlgmr.msra.gmra.mrb[72].mxu1 %v8810_v28 }
 0x666   :  { %v10381_v59 = vpop.f32.mrb[124].mxu0 }
 0x667   :  { %v10382_v49 = vpop.f32.mrb[125].mxu0 }
 0x668   :  { %v10383_v57 = vadd.f32 %v10382_v49, %v10381_v59  ;;  %v10384_v22 = vpop.f32.mrb[126].mxu0 }
 0x669   :  { %v10385_v25 = vpop.f32.mrb[127].mxu0 }
 0x66a   :  { %v9110_v7 = vadd.f32 %v10383_v57, %v10297_v53 }
 0x6a8   :  { %v10403_v26 = vpop.f32.mrb[72].mxu1 }
 0x6a9   :  { %v10404_v1 = vpop.f32.mrb[73].mxu1 }
 0x6aa   :  { %v10405_v61 = vadd.f32 %v10404_v1, %v10403_v26  ;;  %v10406_v60 = vpop.f32.mrb[74].mxu1 }
 0x6ab   :  { %v10407_v42 = vpop.f32.mrb[75].mxu1 }
 0x6ac   :  { %v9150_v16 = vadd.f32 %v10405_v61, %v9110_v7 }
 0x6ae   :  { %9156 = vst.msk [vmem:[#allocation2] sm:$0x3] %vm9155_vm1, %v9150_v16 }
 0x6af   :  { %11334 = shalt.err (!%p11331_p4)
}
 0x6b0   :  { %s11335_s12 = scalar_lea.hbm %s14998_s8, 32 }
 0x6b1   :  { %p11336_p5 = scmp.ne.s32.totalorder %s14998_s8, %s11335_s12  ;;  %p11339_p6 = scmp.lt.u32.totalorder %s11335_s12, %s14998_s8 }
 0x6b3   :  { %p11341_p7 = pnand %p11339_p6, %p11336_p5 }
 0x6b5   :  { %11344 = shalt.err (!%p11341_p7)
}
 0x6b6   :  { %9166 = dma.vmem_to_hbm [thread:$0]  %s9164_s4, 32, %s14998_s8, [#allocation3]  }
 0x6b7   :  { %11345 = dma.done.wait [#allocation3], 32  }
 0x6b8   :  { %11346 = vsyncadd [#allocation3], 4294967264 }
 0x6b9   :  { %9170 = vsyncpa [#allocation3], 1 }

</bundles_post_ra>
